<compile_context>
chip_gen: v7x
topology: tpu7x:2x2x1
jax: 0.10.0
libtpu: 0.0.40
codegen_flags: <defaults>
</compile_context>

<pallas_src>
import math
from functools import partial

import jax
import jax.numpy as jnp
from jax import lax
from jax.experimental import pallas as pl
from jax.experimental.pallas import tpu as pltpu


_CONV_STRIDES = (2, 1, 2, 1, 2, 1, 2, 1)
_CONV_CHANNELS = ((1, 16), (16, 16), (16, 16), (16, 16),
                  (16, 32), (32, 32), (32, 32), (32, 32))
_HP = 128  # per-gate lane stride (padded hidden) inside the LSTM kernel


def _conv_out(n, stride):
    # 3x3 conv, padding=1
    return (n - 1) // stride + 1


# --------------------------------------------------------------------------
# Generic fused matmul + bias (+ optional ReLU) kernel.
# Used once: the hoisted bidirectional LSTM input projection (lane-dense N).
# --------------------------------------------------------------------------
def _mm_bias_kernel(x_ref, w_ref, b_ref, o_ref, *, apply_relu):
    acc = jnp.dot(x_ref[...], w_ref[...], preferred_element_type=jnp.float32)
    acc = acc + b_ref[...]
    if apply_relu:
        acc = jnp.maximum(acc, 0.0)
    o_ref[...] = acc.astype(o_ref.dtype)


def matmul_bias(x, w, b, *, apply_relu=False, tm=512):
    M, K = x.shape
    K2, N = w.shape
    assert K == K2
    tm = M if M <= tm else tm             # no HBM pad; ragged last block is masked
    return pl.pallas_call(
        partial(_mm_bias_kernel, apply_relu=apply_relu),
        grid=(pl.cdiv(M, tm),),
        in_specs=[
            pl.BlockSpec((tm, K), lambda i: (i, 0)),
            pl.BlockSpec((K, N), lambda i: (0, 0)),
            pl.BlockSpec((1, N), lambda i: (0, 0)),
        ],
        out_specs=pl.BlockSpec((tm, N), lambda i: (i, 0)),
        out_shape=jax.ShapeDtypeStruct((M, N), jnp.float32),
        compiler_params=pltpu.CompilerParams(dimension_semantics=("parallel",)),
    )(x, w, b.reshape(1, N))


# --------------------------------------------------------------------------
# Fused 8-layer conv stack (conv3x3 + bias + ReLU per layer), one kernel.
# Activation layout: (H, N_images, W*C).  Per output row ho, per kernel row kh
# (skipping rows that fall in the zero padding), accumulate
#     (G, W_in*Cin) @ T_kh (W_in*Cin, W_out*Cout)
# where T_kh packs the three kw taps, the stride and the W zero-padding.
# --------------------------------------------------------------------------
def _conv_stack_kernel(*refs, layer_dims, strides):
    nl = len(strides)
    x_ref = refs[0]
    t_refs = refs[1:1 + nl]
    b_refs = refs[1 + nl:1 + 2 * nl]
    o_ref = refs[1 + 2 * nl]
    scratch = refs[2 + 2 * nl:]

    src = x_ref
    for li in range(nl):
        h_in, h_out = layer_dims[li]
        s = strides[li]
        t_ref = t_refs[li]
        b_ref = b_refs[li]
        dst = o_ref if li == nl - 1 else scratch[li]
        for ho in range(h_out):
            acc = None
            for kh in range(3):
                r = s * ho + kh - 1
                if 0 <= r < h_in:            # static skip = H zero-padding
                    c = jnp.dot(src[r], t_ref[kh],
                                preferred_element_type=jnp.float32)
                    acc = c if acc is None else acc + c
            dst[ho] = jnp.maximum(acc + b_ref[...], 0.0).astype(dst.dtype)
        src = dst


def _toeplitz_weights(w, w_in, stride):
    """(3,3,Cin,Cout) HWIO conv weights -> (3, W_in*Cin, W_out*Cout) packed."""
    _, _, cin, cout = w.shape
    w_out = _conv_out(w_in, stride)
    wi = jnp.arange(w_in)
    wo = jnp.arange(w_out)
    mats = []
    for kh in range(3):
        t = jnp.zeros((w_in, cin, w_out, cout), jnp.float32)
        for kw in range(3):
            sel = (wi[:, None] == stride * wo[None, :] + (kw - 1))
            t = t + sel.astype(jnp.float32)[:, None, :, None] * \
                w[kh, kw][None, :, None, :]
        mats.append(t.reshape(w_in * cin, w_out * cout))
    return jnp.stack(mats, axis=0)


def conv_stack(x_imgs, params, *, block_images=64):
    """x_imgs: (N, H, W) single channel -> features (N, C*Hf*Wf) NCHW-flattened."""
    n_img, H, W = x_imgs.shape
    g = n_img if n_img <= block_images else block_images
    x = jnp.transpose(x_imgs.astype(jnp.float32), (1, 0, 2))   # (H, N, W*1)

    layer_dims, t_list, b_list, scratch = [], [], [], []
    h_in, w_in = H, W
    for li, (s, (_, cout)) in enumerate(zip(_CONV_STRIDES, _CONV_CHANNELS)):
        h_out, w_out = _conv_out(h_in, s), _conv_out(w_in, s)
        layer_dims.append((h_in, h_out))
        t_list.append(_toeplitz_weights(params[f"conv{li + 1}_w"], w_in, s))
        b_list.append(jnp.tile(params[f"conv{li + 1}_b"], w_out)
                      .reshape(1, w_out * cout))
        if li < len(_CONV_STRIDES) - 1:
            scratch.append(pltpu.VMEM((h_out, g, w_out * cout), jnp.float32))
        h_in, w_in = h_out, w_out

    cf = _CONV_CHANNELS[-1][1]
    hf, wf = h_in, w_in

    in_specs = [pl.BlockSpec((H, g, W), lambda i: (0, i, 0))]
    in_specs += [pl.BlockSpec(t.shape, lambda i: (0, 0, 0)) for t in t_list]
    in_specs += [pl.BlockSpec(b.shape, lambda i: (0, 0)) for b in b_list]

    out = pl.pallas_call(
        partial(_conv_stack_kernel, layer_dims=tuple(layer_dims),
                strides=_CONV_STRIDES),
        grid=(pl.cdiv(n_img, g),),
        in_specs=in_specs,
        out_specs=pl.BlockSpec((hf, g, wf * cf), lambda i: (0, i, 0)),
        out_shape=jax.ShapeDtypeStruct((hf, n_img, wf * cf), jnp.float32),
        scratch_shapes=scratch,
        compiler_params=pltpu.CompilerParams(dimension_semantics=("parallel",)),
    )(x, *t_list, *b_list)

    # (Hf, N, Wf*Cf) -> (N, Cf, Hf, Wf) -> NCHW flatten (matches torch.flatten)
    feat = jnp.transpose(out.reshape(hf, n_img, wf, cf), (1, 3, 0, 2))
    return feat.reshape(n_img, cf * hf * wf)


# --------------------------------------------------------------------------
# Fused bidirectional LSTM.  gates_x (= x @ Wih + b) is precomputed outside the
# serial loop; only h @ Whh remains per step.  Grid = (direction, time_chunk).
# Gates are padded to 128 lanes per gate so all slicing is vreg-aligned.
# --------------------------------------------------------------------------
def _lstm_kernel(gx_ref, whh_ref, o_ref, h_sc, c_sc, *, hidden, tb):
    hp = whh_ref.shape[0]

    @pl.when(pl.program_id(1) == 0)
    def _():
        h_sc[...] = jnp.zeros_like(h_sc)
        c_sc[...] = jnp.zeros_like(c_sc)

    reverse = pl.program_id(0) == 1

    def step(j, carry):
        t = jnp.where(reverse, tb - 1 - j, j)
        gates = gx_ref[t] + jnp.dot(h_sc[...], whh_ref[...],
                                    preferred_element_type=jnp.float32)
        i = jax.nn.sigmoid(gates[:, 0 * hp:1 * hp])
        f = jax.nn.sigmoid(gates[:, 1 * hp:2 * hp])
        gg = jnp.tanh(gates[:, 2 * hp:3 * hp])
        o = jax.nn.sigmoid(gates[:, 3 * hp:4 * hp])
        c = f * c_sc[...] + i * gg
        h = o * jnp.tanh(c)
        c_sc[...] = c
        h_sc[...] = h
        o_ref[t] = h[:, :hidden]
        return carry

    lax.fori_loop(0, tb, step, 0)


def bilstm(feat, params, *, hidden, time_block=16):
    """feat: (Tseq, A, D) -> (Tseq, A, 2*hidden), PyTorch bi-LSTM semantics."""
    tseq, a, d = feat.shape
    hp = _HP
    assert hidden <= hp

    def pad_dir(wih, whh, bias):
        wih_p = jnp.zeros((d, 4 * hp), jnp.float32)
        whh_p = jnp.zeros((hp, 4 * hp), jnp.float32)
        b_p = jnp.zeros((4 * hp,), jnp.float32)
        for gi in range(4):
            src = slice(gi * hidden, (gi + 1) * hidden)
            dst = slice(gi * hp, gi * hp + hidden)
            wih_p = wih_p.at[:, dst].set(wih[:, src])
            whh_p = whh_p.at[:hidden, dst].set(whh[:, src])
            b_p = b_p.at[dst].set(bias[src])
        return wih_p, whh_p, b_p

    wih_f, whh_f, b_f = pad_dir(params["lstm_wih_f"], params["lstm_whh_f"],
                                params["lstm_b_f"])
    wih_b, whh_b, b_b = pad_dir(params["lstm_wih_b"], params["lstm_whh_b"],
                                params["lstm_b_b"])

    # Hoisted input projection for BOTH directions, one lane-dense matmul.
    gx = matmul_bias(feat.reshape(tseq * a, d),
                     jnp.concatenate([wih_f, wih_b], axis=1),
                     jnp.concatenate([b_f, b_b], axis=0))      # (T*A, 2*4*HP)
    gx = gx.reshape(tseq, a, 2, 4 * hp).transpose(2, 0, 1, 3)   # (2, T, A, 4HP)

    tb = tseq if tseq <= time_block else time_block
    n_chunks = (tseq + tb - 1) // tb
    tp = n_chunks * tb
    if tp != tseq:
        # zero gates keep (h, c) == 0, so end-padding is exact for both dirs
        gx = jnp.pad(gx, ((0, 0), (0, tp - tseq), (0, 0), (0, 0)))

    whh_both = jnp.stack([whh_f, whh_b], axis=0)                # (2, HP, 4HP)

    def t_map(di, ti):
        return (di, jnp.where(di == 0, ti, n_chunks - 1 - ti), 0, 0)

    h_out = pl.pallas_call(
        partial(_lstm_kernel, hidden=hidden, tb=tb),
        grid=(2, n_chunks),
        in_specs=[
            pl.BlockSpec((None, tb, a, 4 * hp), t_map),
            pl.BlockSpec((None, hp, 4 * hp), lambda di, ti: (di, 0, 0)),
        ],
        out_specs=pl.BlockSpec((None, tb, a, hidden), t_map),
        out_shape=jax.ShapeDtypeStruct((2, tp, a, hidden), jnp.float32),
        scratch_shapes=[pltpu.VMEM((a, hp), jnp.float32),
                        pltpu.VMEM((a, hp), jnp.float32)],
        compiler_params=pltpu.CompilerParams(
            dimension_semantics=("parallel", "arbitrary")),
    )(gx, whh_both)

    h_out = h_out[:, :tseq]                                     # (2, T, A, H)
    return jnp.transpose(h_out, (1, 2, 0, 3)).reshape(tseq, a, 2 * hidden)


# --------------------------------------------------------------------------
# Full DeepLight forward
# --------------------------------------------------------------------------
def deeplight_forward(batch_data, params, *, cnn_out_dim, num_slices,
                      hidden=40, temp_frame=None):
    B, T, A, M, L = batch_data.shape
    assert A == num_slices
    if temp_frame is not None:
        T = 1
        batch_data = batch_data[:, temp_frame][:, None]

    imgs = batch_data.reshape(B * T * A, M, L).astype(jnp.float32)
    feat = conv_stack(imgs, params)                  # (B*T*A, cnn_out_dim)
    assert feat.shape[1] == cnn_out_dim
    feat = feat.reshape(B * T, A, cnn_out_dim)

    h = bilstm(feat, params, hidden=hidden)          # (B*T, A, 2H)
    h = h.reshape(B * T, A * 2 * hidden)

    # N=1 projection + temporal mean: plain XLA (a Pallas call is pure overhead)
    out = h @ params["fc_w"] + params["fc_b"]
    if temp_frame is None:
        out = out.reshape(B, T).mean(axis=1, keepdims=True)
    return out


# --------------------------------------------------------------------------
# Deterministic synthetic parameters (same shapes as the PyTorch module)
# --------------------------------------------------------------------------
def init_params(key, cnn_out_dim, num_slices, hidden=40):
    params = {}
    keys = iter(jax.random.split(key, 64))
    for li, (cin, cout) in enumerate(_CONV_CHANNELS):
        fan_in, fan_out = cin * 9, cout * 9
        std = math.sqrt(2.0 / (fan_in + fan_out))
        params[f"conv{li + 1}_w"] = std * jax.random.normal(
            next(keys), (3, 3, cin, cout), jnp.float32)
        bound = 1.0 / math.sqrt(fan_in)
        params[f"conv{li + 1}_b"] = jax.random.uniform(
            next(keys), (cout,), jnp.float32, -bound, bound)
    k = 1.0 / math.sqrt(hidden)
    for d in ("f", "b"):
        params[f"lstm_wih_{d}"] = jax.random.uniform(
            next(keys), (cnn_out_dim, 4 * hidden), jnp.float32, -k, k)
        params[f"lstm_whh_{d}"] = jax.random.uniform(
            next(keys), (hidden, 4 * hidden), jnp.float32, -k, k)
        params[f"lstm_b_{d}"] = jax.random.uniform(
            next(keys), (4 * hidden,), jnp.float32, -k, k)   # b_ih + b_hh combined
    fc_in = 2 * num_slices * hidden
    std = math.sqrt(2.0 / (fc_in + 1))
    params["fc_w"] = std * jax.random.normal(next(keys), (fc_in, 1), jnp.float32)
    b = 1.0 / math.sqrt(fc_in)
    params["fc_b"] = jax.random.uniform(next(keys), (1,), jnp.float32, -b, b)
    return params


# --------------------------------------------------------------------------
# Pure-JAX reference (correctness check for the Pallas path)
# --------------------------------------------------------------------------
def _ref_conv_relu(x, w, b, stride):
    y = lax.conv_general_dilated(
        x, w, (stride, stride), padding=((1, 1), (1, 1)),
        dimension_numbers=("NHWC", "HWIO", "NHWC"),
        precision=lax.Precision.HIGHEST)
    return jnp.maximum(y + b, 0.0)


def _ref_lstm_dir(x, wih, whh, bias, hidden):
    def step(carry, x_t):
        h, c = carry
        gates = x_t @ wih + h @ whh + bias
        i = jax.nn.sigmoid(gates[:, :hidden])
        f = jax.nn.sigmoid(gates[:, hidden:2 * hidden])
        g = jnp.tanh(gates[:, 2 * hidden:3 * hidden])
        o = jax.nn.sigmoid(gates[:, 3 * hidden:])
        c = f * c + i * g
        h = o * jnp.tanh(c)
        return (h, c), h

    a = x.shape[1]
    init = (jnp.zeros((a, hidden), jnp.float32), jnp.zeros((a, hidden), jnp.float32))
    _, hs = lax.scan(step, init, x)
    return hs


def reference_forward(batch_data, params, *, cnn_out_dim, num_slices, hidden=40):
    B, T, A, M, L = batch_data.shape
    x = batch_data.reshape(B * T * A, M, L)[..., None].astype(jnp.float32)
    for li, s in enumerate(_CONV_STRIDES):
        x = _ref_conv_relu(x, params[f"conv{li + 1}_w"], params[f"conv{li + 1}_b"], s)
    feat = jnp.transpose(x, (0, 3, 1, 2)).reshape(B * T, A, cnn_out_dim)
    h_f = _ref_lstm_dir(feat, params["lstm_wih_f"], params["lstm_whh_f"],
                        params["lstm_b_f"], hidden)
    h_b = _ref_lstm_dir(feat[::-1], params["lstm_wih_b"], params["lstm_whh_b"],
                        params["lstm_b_b"], hidden)[::-1]
    h = jnp.concatenate([h_f, h_b], axis=-1).reshape(B * T, A * 2 * hidden)
    out = h @ params["fc_w"] + params["fc_b"]
    return out.reshape(B, T).mean(axis=1, keepdims=True)


# --------------------------------------------------------------------------
if __name__ == "__main__":
    # M=L=16 -> four stride-2 convs give 1x1x32 features: cnn_out_dim = 32.
    B, T, A, M, L = 2, 2, 4, 16, 16
    cnn_out_dim, hidden = 32, 40

    key = jax.random.PRNGKey(0)
    kp, kx = jax.random.split(key)
    params = init_params(kp, cnn_out_dim, A, hidden)
    batch_data = jax.random.normal(kx, (B, T, A, M, L), jnp.float32)

    fwd = jax.jit(partial(deeplight_forward, cnn_out_dim=cnn_out_dim,
                          num_slices=A, hidden=hidden))
    out = jax.block_until_ready(fwd(batch_data, params))

    assert out.shape == (B, 1), out.shape
    assert bool(jnp.all(jnp.isfinite(out)))

    ref = reference_forward(batch_data, params, cnn_out_dim=cnn_out_dim,
                            num_slices=A, hidden=hidden)
    assert bool(jnp.allclose(out, ref, atol=1e-2, rtol=1e-2)), (out, ref)

    print("KERNEL_OK")
</pallas_src>

<mosaic_0001>
module attributes {stable_mosaic.version = 11 : i64} {
  func.func @_conv_stack_kernel(%arg0: i32, %arg1: memref<16x16x16xf32, #tpu.memory_space<vmem>>, %arg2: memref<3x16x128xf32, #tpu.memory_space<vmem>>, %arg3: memref<3x128x128xf32, #tpu.memory_space<vmem>>, %arg4: memref<3x128x64xf32, #tpu.memory_space<vmem>>, %arg5: memref<3x64x64xf32, #tpu.memory_space<vmem>>, %arg6: memref<3x64x64xf32, #tpu.memory_space<vmem>>, %arg7: memref<3x64x64xf32, #tpu.memory_space<vmem>>, %arg8: memref<3x64x32xf32, #tpu.memory_space<vmem>>, %arg9: memref<3x32x32xf32, #tpu.memory_space<vmem>>, %arg10: memref<1x128xf32, #tpu.memory_space<vmem>>, %arg11: memref<1x128xf32, #tpu.memory_space<vmem>>, %arg12: memref<1x64xf32, #tpu.memory_space<vmem>>, %arg13: memref<1x64xf32, #tpu.memory_space<vmem>>, %arg14: memref<1x64xf32, #tpu.memory_space<vmem>>, %arg15: memref<1x64xf32, #tpu.memory_space<vmem>>, %arg16: memref<1x32xf32, #tpu.memory_space<vmem>>, %arg17: memref<1x32xf32, #tpu.memory_space<vmem>>, %arg18: memref<1x16x32xf32, #tpu.memory_space<vmem>>, %arg19: memref<8x16x128xf32, #tpu.memory_space<vmem>>, %arg20: memref<8x16x128xf32, #tpu.memory_space<vmem>>, %arg21: memref<4x16x64xf32, #tpu.memory_space<vmem>>, %arg22: memref<4x16x64xf32, #tpu.memory_space<vmem>>, %arg23: memref<2x16x64xf32, #tpu.memory_space<vmem>>, %arg24: memref<2x16x64xf32, #tpu.memory_space<vmem>>, %arg25: memref<1x16x32xf32, #tpu.memory_space<vmem>>) attributes {dimension_semantics = [#tpu.dimension_semantics<parallel>], iteration_bounds = array<i64: 1>, scalar_prefetch = 0 : i64, scratch_operands = 7 : i64, tpu.core_type = #tpu.core_type<tc>, window_params = [{transform_indices = @transform_0, window_bounds = array<i64: 16, 16, 16>}, {pipeline_mode = #tpu.pipeline_mode<synchronous>, transform_indices = @transform_1, window_bounds = array<i64: 3, 16, 128>}, {pipeline_mode = #tpu.pipeline_mode<synchronous>, transform_indices = @transform_2, window_bounds = array<i64: 3, 128, 128>}, {pipeline_mode = #tpu.pipeline_mode<synchronous>, transform_indices = @transform_3, window_bounds = array<i64: 3, 128, 64>}, {pipeline_mode = #tpu.pipeline_mode<synchronous>, transform_indices = @transform_4, window_bounds = array<i64: 3, 64, 64>}, {pipeline_mode = #tpu.pipeline_mode<synchronous>, transform_indices = @transform_5, window_bounds = array<i64: 3, 64, 64>}, {pipeline_mode = #tpu.pipeline_mode<synchronous>, transform_indices = @transform_6, window_bounds = array<i64: 3, 64, 64>}, {pipeline_mode = #tpu.pipeline_mode<synchronous>, transform_indices = @transform_7, window_bounds = array<i64: 3, 64, 32>}, {pipeline_mode = #tpu.pipeline_mode<synchronous>, transform_indices = @transform_8, window_bounds = array<i64: 3, 32, 32>}, {pipeline_mode = #tpu.pipeline_mode<synchronous>, transform_indices = @transform_9, window_bounds = array<i64: 1, 128>}, {pipeline_mode = #tpu.pipeline_mode<synchronous>, transform_indices = @transform_10, window_bounds = array<i64: 1, 128>}, {pipeline_mode = #tpu.pipeline_mode<synchronous>, transform_indices = @transform_11, window_bounds = array<i64: 1, 64>}, {pipeline_mode = #tpu.pipeline_mode<synchronous>, transform_indices = @transform_12, window_bounds = array<i64: 1, 64>}, {pipeline_mode = #tpu.pipeline_mode<synchronous>, transform_indices = @transform_13, window_bounds = array<i64: 1, 64>}, {pipeline_mode = #tpu.pipeline_mode<synchronous>, transform_indices = @transform_14, window_bounds = array<i64: 1, 64>}, {pipeline_mode = #tpu.pipeline_mode<synchronous>, transform_indices = @transform_15, window_bounds = array<i64: 1, 32>}, {pipeline_mode = #tpu.pipeline_mode<synchronous>, transform_indices = @transform_16, window_bounds = array<i64: 1, 32>}, {transform_indices = @transform_17, window_bounds = array<i64: 1, 16, 32>}]} {
    %c0 = arith.constant 0 : index
    %c0_0 = arith.constant 0 : index
    %c0_1 = arith.constant 0 : index
    %0 = vector.load %arg1[%c0, %c0_0, %c0_1] : memref<16x16x16xf32, #tpu.memory_space<vmem>>, vector<1x16x16xf32>
    %1 = vector.shape_cast %0 : vector<1x16x16xf32> to vector<16x16xf32>
    %c1 = arith.constant 1 : index
    %c0_2 = arith.constant 0 : index
    %c0_3 = arith.constant 0 : index
    %2 = vector.load %arg2[%c1, %c0_2, %c0_3] : memref<3x16x128xf32, #tpu.memory_space<vmem>>, vector<1x16x128xf32>
    %3 = vector.shape_cast %2 : vector<1x16x128xf32> to vector<16x128xf32>
    %cst = arith.constant dense<0.000000e+00> : vector<16x128xf32>
    %4 = tpu.matmul %1, %3, %cst {dimension_numbers = #tpu.dot_dimension_numbers<[1], [0], [0], [1], [0, 0, 1, 1], [], []>} : vector<16x16xf32>, vector<16x128xf32>, vector<16x128xf32> -> vector<16x128xf32>
    %c1_4 = arith.constant 1 : index
    %c0_5 = arith.constant 0 : index
    %c0_6 = arith.constant 0 : index
    %5 = vector.load %arg1[%c1_4, %c0_5, %c0_6] : memref<16x16x16xf32, #tpu.memory_space<vmem>>, vector<1x16x16xf32>
    %6 = vector.shape_cast %5 : vector<1x16x16xf32> to vector<16x16xf32>
    %c2 = arith.constant 2 : index
    %c0_7 = arith.constant 0 : index
    %c0_8 = arith.constant 0 : index
    %7 = vector.load %arg2[%c2, %c0_7, %c0_8] : memref<3x16x128xf32, #tpu.memory_space<vmem>>, vector<1x16x128xf32>
    %8 = vector.shape_cast %7 : vector<1x16x128xf32> to vector<16x128xf32>
    %cst_9 = arith.constant dense<0.000000e+00> : vector<16x128xf32>
    %9 = tpu.matmul %6, %8, %cst_9 {dimension_numbers = #tpu.dot_dimension_numbers<[1], [0], [0], [1], [0, 0, 1, 1], [], []>} : vector<16x16xf32>, vector<16x128xf32>, vector<16x128xf32> -> vector<16x128xf32>
    %10 = arith.addf %4, %9 : vector<16x128xf32>
    %c0_10 = arith.constant 0 : index
    %c0_11 = arith.constant 0 : index
    %11 = vector.load %arg10[%c0_10, %c0_11] : memref<1x128xf32, #tpu.memory_space<vmem>>, vector<1x128xf32>
    %12 = vector.broadcast %11 : vector<1x128xf32> to vector<16x128xf32>
    %13 = arith.addf %10, %12 : vector<16x128xf32>
    %cst_12 = arith.constant 0.000000e+00 : f32
    %14 = vector.broadcast %cst_12 : f32 to vector<16x128xf32>
    %15 = arith.maximumf %13, %14 : vector<16x128xf32>
    %c0_13 = arith.constant 0 : index
    %c0_14 = arith.constant 0 : index
    %c0_15 = arith.constant 0 : index
    %16 = vector.load %arg19[%c0_13, %c0_14, %c0_15] : memref<8x16x128xf32, #tpu.memory_space<vmem>>, vector<1x16x128xf32>
    %17 = vector.shape_cast %16 : vector<1x16x128xf32> to vector<16x128xf32>
    %18 = vector.shape_cast %15 : vector<16x128xf32> to vector<1x16x128xf32>
    tpu.vector_store %arg19[%c0_13, %c0_14, %c0_15], %18 {strides = array<i32>} : memref<8x16x128xf32, #tpu.memory_space<vmem>>, vector<1x16x128xf32>,
    %c1_16 = arith.constant 1 : index
    %c0_17 = arith.constant 0 : index
    %c0_18 = arith.constant 0 : index
    %19 = vector.load %arg1[%c1_16, %c0_17, %c0_18] : memref<16x16x16xf32, #tpu.memory_space<vmem>>, vector<1x16x16xf32>
    %20 = vector.shape_cast %19 : vector<1x16x16xf32> to vector<16x16xf32>
    %c0_19 = arith.constant 0 : index
    %c0_20 = arith.constant 0 : index
    %c0_21 = arith.constant 0 : index
    %21 = vector.load %arg2[%c0_19, %c0_20, %c0_21] : memref<3x16x128xf32, #tpu.memory_space<vmem>>, vector<1x16x128xf32>
    %22 = vector.shape_cast %21 : vector<1x16x128xf32> to vector<16x128xf32>
    %cst_22 = arith.constant dense<0.000000e+00> : vector<16x128xf32>
    %23 = tpu.matmul %20, %22, %cst_22 {dimension_numbers = #tpu.dot_dimension_numbers<[1], [0], [0], [1], [0, 0, 1, 1], [], []>} : vector<16x16xf32>, vector<16x128xf32>, vector<16x128xf32> -> vector<16x128xf32>
    %c2_23 = arith.constant 2 : index
    %c0_24 = arith.constant 0 : index
    %c0_25 = arith.constant 0 : index
    %24 = vector.load %arg1[%c2_23, %c0_24, %c0_25] : memref<16x16x16xf32, #tpu.memory_space<vmem>>, vector<1x16x16xf32>
    %25 = vector.shape_cast %24 : vector<1x16x16xf32> to vector<16x16xf32>
    %c1_26 = arith.constant 1 : index
    %c0_27 = arith.constant 0 : index
    %c0_28 = arith.constant 0 : index
    %26 = vector.load %arg2[%c1_26, %c0_27, %c0_28] : memref<3x16x128xf32, #tpu.memory_space<vmem>>, vector<1x16x128xf32>
    %27 = vector.shape_cast %26 : vector<1x16x128xf32> to vector<16x128xf32>
    %cst_29 = arith.constant dense<0.000000e+00> : vector<16x128xf32>
    %28 = tpu.matmul %25, %27, %cst_29 {dimension_numbers = #tpu.dot_dimension_numbers<[1], [0], [0], [1], [0, 0, 1, 1], [], []>} : vector<16x16xf32>, vector<16x128xf32>, vector<16x128xf32> -> vector<16x128xf32>
    %29 = arith.addf %23, %28 : vector<16x128xf32>
    %c3 = arith.constant 3 : index
    %c0_30 = arith.constant 0 : index
    %c0_31 = arith.constant 0 : index
    %30 = vector.load %arg1[%c3, %c0_30, %c0_31] : memref<16x16x16xf32, #tpu.memory_space<vmem>>, vector<1x16x16xf32>
    %31 = vector.shape_cast %30 : vector<1x16x16xf32> to vector<16x16xf32>
    %c2_32 = arith.constant 2 : index
    %c0_33 = arith.constant 0 : index
    %c0_34 = arith.constant 0 : index
    %32 = vector.load %arg2[%c2_32, %c0_33, %c0_34] : memref<3x16x128xf32, #tpu.memory_space<vmem>>, vector<1x16x128xf32>
    %33 = vector.shape_cast %32 : vector<1x16x128xf32> to vector<16x128xf32>
    %cst_35 = arith.constant dense<0.000000e+00> : vector<16x128xf32>
    %34 = tpu.matmul %31, %33, %cst_35 {dimension_numbers = #tpu.dot_dimension_numbers<[1], [0], [0], [1], [0, 0, 1, 1], [], []>} : vector<16x16xf32>, vector<16x128xf32>, vector<16x128xf32> -> vector<16x128xf32>
    %35 = arith.addf %29, %34 : vector<16x128xf32>
    %c0_36 = arith.constant 0 : index
    %c0_37 = arith.constant 0 : index
    %36 = vector.load %arg10[%c0_36, %c0_37] : memref<1x128xf32, #tpu.memory_space<vmem>>, vector<1x128xf32>
    %37 = vector.broadcast %36 : vector<1x128xf32> to vector<16x128xf32>
    %38 = arith.addf %35, %37 : vector<16x128xf32>
    %cst_38 = arith.constant 0.000000e+00 : f32
    %39 = vector.broadcast %cst_38 : f32 to vector<16x128xf32>
    %40 = arith.maximumf %38, %39 : vector<16x128xf32>
    %c1_39 = arith.constant 1 : index
    %c0_40 = arith.constant 0 : index
    %c0_41 = arith.constant 0 : index
    %41 = vector.load %arg19[%c1_39, %c0_40, %c0_41] : memref<8x16x128xf32, #tpu.memory_space<vmem>>, vector<1x16x128xf32>
    %42 = vector.shape_cast %41 : vector<1x16x128xf32> to vector<16x128xf32>
    %43 = vector.shape_cast %40 : vector<16x128xf32> to vector<1x16x128xf32>
    tpu.vector_store %arg19[%c1_39, %c0_40, %c0_41], %43 {strides = array<i32>} : memref<8x16x128xf32, #tpu.memory_space<vmem>>, vector<1x16x128xf32>,
    %c3_42 = arith.constant 3 : index
    %c0_43 = arith.constant 0 : index
    %c0_44 = arith.constant 0 : index
    %44 = vector.load %arg1[%c3_42, %c0_43, %c0_44] : memref<16x16x16xf32, #tpu.memory_space<vmem>>, vector<1x16x16xf32>
    %45 = vector.shape_cast %44 : vector<1x16x16xf32> to vector<16x16xf32>
    %c0_45 = arith.constant 0 : index
    %c0_46 = arith.constant 0 : index
    %c0_47 = arith.constant 0 : index
    %46 = vector.load %arg2[%c0_45, %c0_46, %c0_47] : memref<3x16x128xf32, #tpu.memory_space<vmem>>, vector<1x16x128xf32>
    %47 = vector.shape_cast %46 : vector<1x16x128xf32> to vector<16x128xf32>
    %cst_48 = arith.constant dense<0.000000e+00> : vector<16x128xf32>
    %48 = tpu.matmul %45, %47, %cst_48 {dimension_numbers = #tpu.dot_dimension_numbers<[1], [0], [0], [1], [0, 0, 1, 1], [], []>} : vector<16x16xf32>, vector<16x128xf32>, vector<16x128xf32> -> vector<16x128xf32>
    %c4 = arith.constant 4 : index
    %c0_49 = arith.constant 0 : index
    %c0_50 = arith.constant 0 : index
    %49 = vector.load %arg1[%c4, %c0_49, %c0_50] : memref<16x16x16xf32, #tpu.memory_space<vmem>>, vector<1x16x16xf32>
    %50 = vector.shape_cast %49 : vector<1x16x16xf32> to vector<16x16xf32>
    %c1_51 = arith.constant 1 : index
    %c0_52 = arith.constant 0 : index
    %c0_53 = arith.constant 0 : index
    %51 = vector.load %arg2[%c1_51, %c0_52, %c0_53] : memref<3x16x128xf32, #tpu.memory_space<vmem>>, vector<1x16x128xf32>
    %52 = vector.shape_cast %51 : vector<1x16x128xf32> to vector<16x128xf32>
    %cst_54 = arith.constant dense<0.000000e+00> : vector<16x128xf32>
    %53 = tpu.matmul %50, %52, %cst_54 {dimension_numbers = #tpu.dot_dimension_numbers<[1], [0], [0], [1], [0, 0, 1, 1], [], []>} : vector<16x16xf32>, vector<16x128xf32>, vector<16x128xf32> -> vector<16x128xf32>
    %54 = arith.addf %48, %53 : vector<16x128xf32>
    %c5 = arith.constant 5 : index
    %c0_55 = arith.constant 0 : index
    %c0_56 = arith.constant 0 : index
    %55 = vector.load %arg1[%c5, %c0_55, %c0_56] : memref<16x16x16xf32, #tpu.memory_space<vmem>>, vector<1x16x16xf32>
    %56 = vector.shape_cast %55 : vector<1x16x16xf32> to vector<16x16xf32>
    %c2_57 = arith.constant 2 : index
    %c0_58 = arith.constant 0 : index
    %c0_59 = arith.constant 0 : index
    %57 = vector.load %arg2[%c2_57, %c0_58, %c0_59] : memref<3x16x128xf32, #tpu.memory_space<vmem>>, vector<1x16x128xf32>
    %58 = vector.shape_cast %57 : vector<1x16x128xf32> to vector<16x128xf32>
    %cst_60 = arith.constant dense<0.000000e+00> : vector<16x128xf32>
    %59 = tpu.matmul %56, %58, %cst_60 {dimension_numbers = #tpu.dot_dimension_numbers<[1], [0], [0], [1], [0, 0, 1, 1], [], []>} : vector<16x16xf32>, vector<16x128xf32>, vector<16x128xf32> -> vector<16x128xf32>
    %60 = arith.addf %54, %59 : vector<16x128xf32>
    %c0_61 = arith.constant 0 : index
    %c0_62 = arith.constant 0 : index
    %61 = vector.load %arg10[%c0_61, %c0_62] : memref<1x128xf32, #tpu.memory_space<vmem>>, vector<1x128xf32>
    %62 = vector.broadcast %61 : vector<1x128xf32> to vector<16x128xf32>
    %63 = arith.addf %60, %62 : vector<16x128xf32>
    %cst_63 = arith.constant 0.000000e+00 : f32
    %64 = vector.broadcast %cst_63 : f32 to vector<16x128xf32>
    %65 = arith.maximumf %63, %64 : vector<16x128xf32>
    %c2_64 = arith.constant 2 : index
    %c0_65 = arith.constant 0 : index
    %c0_66 = arith.constant 0 : index
    %66 = vector.load %arg19[%c2_64, %c0_65, %c0_66] : memref<8x16x128xf32, #tpu.memory_space<vmem>>, vector<1x16x128xf32>
    %67 = vector.shape_cast %66 : vector<1x16x128xf32> to vector<16x128xf32>
    %68 = vector.shape_cast %65 : vector<16x128xf32> to vector<1x16x128xf32>
    tpu.vector_store %arg19[%c2_64, %c0_65, %c0_66], %68 {strides = array<i32>} : memref<8x16x128xf32, #tpu.memory_space<vmem>>, vector<1x16x128xf32>,
    %c5_67 = arith.constant 5 : index
    %c0_68 = arith.constant 0 : index
    %c0_69 = arith.constant 0 : index
    %69 = vector.load %arg1[%c5_67, %c0_68, %c0_69] : memref<16x16x16xf32, #tpu.memory_space<vmem>>, vector<1x16x16xf32>
    %70 = vector.shape_cast %69 : vector<1x16x16xf32> to vector<16x16xf32>
    %c0_70 = arith.constant 0 : index
    %c0_71 = arith.constant 0 : index
    %c0_72 = arith.constant 0 : index
    %71 = vector.load %arg2[%c0_70, %c0_71, %c0_72] : memref<3x16x128xf32, #tpu.memory_space<vmem>>, vector<1x16x128xf32>
    %72 = vector.shape_cast %71 : vector<1x16x128xf32> to vector<16x128xf32>
    %cst_73 = arith.constant dense<0.000000e+00> : vector<16x128xf32>
    %73 = tpu.matmul %70, %72, %cst_73 {dimension_numbers = #tpu.dot_dimension_numbers<[1], [0], [0], [1], [0, 0, 1, 1], [], []>} : vector<16x16xf32>, vector<16x128xf32>, vector<16x128xf32> -> vector<16x128xf32>
    %c6 = arith.constant 6 : index
    %c0_74 = arith.constant 0 : index
    %c0_75 = arith.constant 0 : index
    %74 = vector.load %arg1[%c6, %c0_74, %c0_75] : memref<16x16x16xf32, #tpu.memory_space<vmem>>, vector<1x16x16xf32>
    %75 = vector.shape_cast %74 : vector<1x16x16xf32> to vector<16x16xf32>
    %c1_76 = arith.constant 1 : index
    %c0_77 = arith.constant 0 : index
    %c0_78 = arith.constant 0 : index
    %76 = vector.load %arg2[%c1_76, %c0_77, %c0_78] : memref<3x16x128xf32, #tpu.memory_space<vmem>>, vector<1x16x128xf32>
    %77 = vector.shape_cast %76 : vector<1x16x128xf32> to vector<16x128xf32>
    %cst_79 = arith.constant dense<0.000000e+00> : vector<16x128xf32>
    %78 = tpu.matmul %75, %77, %cst_79 {dimension_numbers = #tpu.dot_dimension_numbers<[1], [0], [0], [1], [0, 0, 1, 1], [], []>} : vector<16x16xf32>, vector<16x128xf32>, vector<16x128xf32> -> vector<16x128xf32>
    %79 = arith.addf %73, %78 : vector<16x128xf32>
    %c7 = arith.constant 7 : index
    %c0_80 = arith.constant 0 : index
    %c0_81 = arith.constant 0 : index
    %80 = vector.load %arg1[%c7, %c0_80, %c0_81] : memref<16x16x16xf32, #tpu.memory_space<vmem>>, vector<1x16x16xf32>
    %81 = vector.shape_cast %80 : vector<1x16x16xf32> to vector<16x16xf32>
    %c2_82 = arith.constant 2 : index
    %c0_83 = arith.constant 0 : index
    %c0_84 = arith.constant 0 : index
    %82 = vector.load %arg2[%c2_82, %c0_83, %c0_84] : memref<3x16x128xf32, #tpu.memory_space<vmem>>, vector<1x16x128xf32>
    %83 = vector.shape_cast %82 : vector<1x16x128xf32> to vector<16x128xf32>
    %cst_85 = arith.constant dense<0.000000e+00> : vector<16x128xf32>
    %84 = tpu.matmul %81, %83, %cst_85 {dimension_numbers = #tpu.dot_dimension_numbers<[1], [0], [0], [1], [0, 0, 1, 1], [], []>} : vector<16x16xf32>, vector<16x128xf32>, vector<16x128xf32> -> vector<16x128xf32>
    %85 = arith.addf %79, %84 : vector<16x128xf32>
    %c0_86 = arith.constant 0 : index
    %c0_87 = arith.constant 0 : index
    %86 = vector.load %arg10[%c0_86, %c0_87] : memref<1x128xf32, #tpu.memory_space<vmem>>, vector<1x128xf32>
    %87 = vector.broadcast %86 : vector<1x128xf32> to vector<16x128xf32>
    %88 = arith.addf %85, %87 : vector<16x128xf32>
    %cst_88 = arith.constant 0.000000e+00 : f32
    %89 = vector.broadcast %cst_88 : f32 to vector<16x128xf32>
    %90 = arith.maximumf %88, %89 : vector<16x128xf32>
    %c3_89 = arith.constant 3 : index
    %c0_90 = arith.constant 0 : index
    %c0_91 = arith.constant 0 : index
    %91 = vector.load %arg19[%c3_89, %c0_90, %c0_91] : memref<8x16x128xf32, #tpu.memory_space<vmem>>, vector<1x16x128xf32>
    %92 = vector.shape_cast %91 : vector<1x16x128xf32> to vector<16x128xf32>
    %93 = vector.shape_cast %90 : vector<16x128xf32> to vector<1x16x128xf32>
    tpu.vector_store %arg19[%c3_89, %c0_90, %c0_91], %93 {strides = array<i32>} : memref<8x16x128xf32, #tpu.memory_space<vmem>>, vector<1x16x128xf32>,
    %c7_92 = arith.constant 7 : index
    %c0_93 = arith.constant 0 : index
    %c0_94 = arith.constant 0 : index
    %94 = vector.load %arg1[%c7_92, %c0_93, %c0_94] : memref<16x16x16xf32, #tpu.memory_space<vmem>>, vector<1x16x16xf32>
    %95 = vector.shape_cast %94 : vector<1x16x16xf32> to vector<16x16xf32>
    %c0_95 = arith.constant 0 : index
    %c0_96 = arith.constant 0 : index
    %c0_97 = arith.constant 0 : index
    %96 = vector.load %arg2[%c0_95, %c0_96, %c0_97] : memref<3x16x128xf32, #tpu.memory_space<vmem>>, vector<1x16x128xf32>
    %97 = vector.shape_cast %96 : vector<1x16x128xf32> to vector<16x128xf32>
    %cst_98 = arith.constant dense<0.000000e+00> : vector<16x128xf32>
    %98 = tpu.matmul %95, %97, %cst_98 {dimension_numbers = #tpu.dot_dimension_numbers<[1], [0], [0], [1], [0, 0, 1, 1], [], []>} : vector<16x16xf32>, vector<16x128xf32>, vector<16x128xf32> -> vector<16x128xf32>
    %c8 = arith.constant 8 : index
    %c0_99 = arith.constant 0 : index
    %c0_100 = arith.constant 0 : index
    %99 = vector.load %arg1[%c8, %c0_99, %c0_100] : memref<16x16x16xf32, #tpu.memory_space<vmem>>, vector<1x16x16xf32>
    %100 = vector.shape_cast %99 : vector<1x16x16xf32> to vector<16x16xf32>
    %c1_101 = arith.constant 1 : index
    %c0_102 = arith.constant 0 : index
    %c0_103 = arith.constant 0 : index
    %101 = vector.load %arg2[%c1_101, %c0_102, %c0_103] : memref<3x16x128xf32, #tpu.memory_space<vmem>>, vector<1x16x128xf32>
    %102 = vector.shape_cast %101 : vector<1x16x128xf32> to vector<16x128xf32>
    %cst_104 = arith.constant dense<0.000000e+00> : vector<16x128xf32>
    %103 = tpu.matmul %100, %102, %cst_104 {dimension_numbers = #tpu.dot_dimension_numbers<[1], [0], [0], [1], [0, 0, 1, 1], [], []>} : vector<16x16xf32>, vector<16x128xf32>, vector<16x128xf32> -> vector<16x128xf32>
    %104 = arith.addf %98, %103 : vector<16x128xf32>
    %c9 = arith.constant 9 : index
    %c0_105 = arith.constant 0 : index
    %c0_106 = arith.constant 0 : index
    %105 = vector.load %arg1[%c9, %c0_105, %c0_106] : memref<16x16x16xf32, #tpu.memory_space<vmem>>, vector<1x16x16xf32>
    %106 = vector.shape_cast %105 : vector<1x16x16xf32> to vector<16x16xf32>
    %c2_107 = arith.constant 2 : index
    %c0_108 = arith.constant 0 : index
    %c0_109 = arith.constant 0 : index
    %107 = vector.load %arg2[%c2_107, %c0_108, %c0_109] : memref<3x16x128xf32, #tpu.memory_space<vmem>>, vector<1x16x128xf32>
    %108 = vector.shape_cast %107 : vector<1x16x128xf32> to vector<16x128xf32>
    %cst_110 = arith.constant dense<0.000000e+00> : vector<16x128xf32>
    %109 = tpu.matmul %106, %108, %cst_110 {dimension_numbers = #tpu.dot_dimension_numbers<[1], [0], [0], [1], [0, 0, 1, 1], [], []>} : vector<16x16xf32>, vector<16x128xf32>, vector<16x128xf32> -> vector<16x128xf32>
    %110 = arith.addf %104, %109 : vector<16x128xf32>
    %c0_111 = arith.constant 0 : index
    %c0_112 = arith.constant 0 : index
    %111 = vector.load %arg10[%c0_111, %c0_112] : memref<1x128xf32, #tpu.memory_space<vmem>>, vector<1x128xf32>
    %112 = vector.broadcast %111 : vector<1x128xf32> to vector<16x128xf32>
    %113 = arith.addf %110, %112 : vector<16x128xf32>
    %cst_113 = arith.constant 0.000000e+00 : f32
    %114 = vector.broadcast %cst_113 : f32 to vector<16x128xf32>
    %115 = arith.maximumf %113, %114 : vector<16x128xf32>
    %c4_114 = arith.constant 4 : index
    %c0_115 = arith.constant 0 : index
    %c0_116 = arith.constant 0 : index
    %116 = vector.load %arg19[%c4_114, %c0_115, %c0_116] : memref<8x16x128xf32, #tpu.memory_space<vmem>>, vector<1x16x128xf32>
    %117 = vector.shape_cast %116 : vector<1x16x128xf32> to vector<16x128xf32>
    %118 = vector.shape_cast %115 : vector<16x128xf32> to vector<1x16x128xf32>
    tpu.vector_store %arg19[%c4_114, %c0_115, %c0_116], %118 {strides = array<i32>} : memref<8x16x128xf32, #tpu.memory_space<vmem>>, vector<1x16x128xf32>,
    %c9_117 = arith.constant 9 : index
    %c0_118 = arith.constant 0 : index
    %c0_119 = arith.constant 0 : index
    %119 = vector.load %arg1[%c9_117, %c0_118, %c0_119] : memref<16x16x16xf32, #tpu.memory_space<vmem>>, vector<1x16x16xf32>
    %120 = vector.shape_cast %119 : vector<1x16x16xf32> to vector<16x16xf32>
    %c0_120 = arith.constant 0 : index
    %c0_121 = arith.constant 0 : index
    %c0_122 = arith.constant 0 : index
    %121 = vector.load %arg2[%c0_120, %c0_121, %c0_122] : memref<3x16x128xf32, #tpu.memory_space<vmem>>, vector<1x16x128xf32>
    %122 = vector.shape_cast %121 : vector<1x16x128xf32> to vector<16x128xf32>
    %cst_123 = arith.constant dense<0.000000e+00> : vector<16x128xf32>
    %123 = tpu.matmul %120, %122, %cst_123 {dimension_numbers = #tpu.dot_dimension_numbers<[1], [0], [0], [1], [0, 0, 1, 1], [], []>} : vector<16x16xf32>, vector<16x128xf32>, vector<16x128xf32> -> vector<16x128xf32>
    %c10 = arith.constant 10 : index
    %c0_124 = arith.constant 0 : index
    %c0_125 = arith.constant 0 : index
    %124 = vector.load %arg1[%c10, %c0_124, %c0_125] : memref<16x16x16xf32, #tpu.memory_space<vmem>>, vector<1x16x16xf32>
    %125 = vector.shape_cast %124 : vector<1x16x16xf32> to vector<16x16xf32>
    %c1_126 = arith.constant 1 : index
    %c0_127 = arith.constant 0 : index
    %c0_128 = arith.constant 0 : index
    %126 = vector.load %arg2[%c1_126, %c0_127, %c0_128] : memref<3x16x128xf32, #tpu.memory_space<vmem>>, vector<1x16x128xf32>
    %127 = vector.shape_cast %126 : vector<1x16x128xf32> to vector<16x128xf32>
    %cst_129 = arith.constant dense<0.000000e+00> : vector<16x128xf32>
    %128 = tpu.matmul %125, %127, %cst_129 {dimension_numbers = #tpu.dot_dimension_numbers<[1], [0], [0], [1], [0, 0, 1, 1], [], []>} : vector<16x16xf32>, vector<16x128xf32>, vector<16x128xf32> -> vector<16x128xf32>
    %129 = arith.addf %123, %128 : vector<16x128xf32>
    %c11 = arith.constant 11 : index
    %c0_130 = arith.constant 0 : index
    %c0_131 = arith.constant 0 : index
    %130 = vector.load %arg1[%c11, %c0_130, %c0_131] : memref<16x16x16xf32, #tpu.memory_space<vmem>>, vector<1x16x16xf32>
    %131 = vector.shape_cast %130 : vector<1x16x16xf32> to vector<16x16xf32>
    %c2_132 = arith.constant 2 : index
    %c0_133 = arith.constant 0 : index
    %c0_134 = arith.constant 0 : index
    %132 = vector.load %arg2[%c2_132, %c0_133, %c0_134] : memref<3x16x128xf32, #tpu.memory_space<vmem>>, vector<1x16x128xf32>
    %133 = vector.shape_cast %132 : vector<1x16x128xf32> to vector<16x128xf32>
    %cst_135 = arith.constant dense<0.000000e+00> : vector<16x128xf32>
    %134 = tpu.matmul %131, %133, %cst_135 {dimension_numbers = #tpu.dot_dimension_numbers<[1], [0], [0], [1], [0, 0, 1, 1], [], []>} : vector<16x16xf32>, vector<16x128xf32>, vector<16x128xf32> -> vector<16x128xf32>
    %135 = arith.addf %129, %134 : vector<16x128xf32>
    %c0_136 = arith.constant 0 : index
    %c0_137 = arith.constant 0 : index
    %136 = vector.load %arg10[%c0_136, %c0_137] : memref<1x128xf32, #tpu.memory_space<vmem>>, vector<1x128xf32>
    %137 = vector.broadcast %136 : vector<1x128xf32> to vector<16x128xf32>
    %138 = arith.addf %135, %137 : vector<16x128xf32>
    %cst_138 = arith.constant 0.000000e+00 : f32
    %139 = vector.broadcast %cst_138 : f32 to vector<16x128xf32>
    %140 = arith.maximumf %138, %139 : vector<16x128xf32>
    %c5_139 = arith.constant 5 : index
    %c0_140 = arith.constant 0 : index
    %c0_141 = arith.constant 0 : index
    %141 = vector.load %arg19[%c5_139, %c0_140, %c0_141] : memref<8x16x128xf32, #tpu.memory_space<vmem>>, vector<1x16x128xf32>
    %142 = vector.shape_cast %141 : vector<1x16x128xf32> to vector<16x128xf32>
    %143 = vector.shape_cast %140 : vector<16x128xf32> to vector<1x16x128xf32>
    tpu.vector_store %arg19[%c5_139, %c0_140, %c0_141], %143 {strides = array<i32>} : memref<8x16x128xf32, #tpu.memory_space<vmem>>, vector<1x16x128xf32>,
    %c11_142 = arith.constant 11 : index
    %c0_143 = arith.constant 0 : index
    %c0_144 = arith.constant 0 : index
    %144 = vector.load %arg1[%c11_142, %c0_143, %c0_144] : memref<16x16x16xf32, #tpu.memory_space<vmem>>, vector<1x16x16xf32>
    %145 = vector.shape_cast %144 : vector<1x16x16xf32> to vector<16x16xf32>
    %c0_145 = arith.constant 0 : index
    %c0_146 = arith.constant 0 : index
    %c0_147 = arith.constant 0 : index
    %146 = vector.load %arg2[%c0_145, %c0_146, %c0_147] : memref<3x16x128xf32, #tpu.memory_space<vmem>>, vector<1x16x128xf32>
    %147 = vector.shape_cast %146 : vector<1x16x128xf32> to vector<16x128xf32>
    %cst_148 = arith.constant dense<0.000000e+00> : vector<16x128xf32>
    %148 = tpu.matmul %145, %147, %cst_148 {dimension_numbers = #tpu.dot_dimension_numbers<[1], [0], [0], [1], [0, 0, 1, 1], [], []>} : vector<16x16xf32>, vector<16x128xf32>, vector<16x128xf32> -> vector<16x128xf32>
    %c12 = arith.constant 12 : index
    %c0_149 = arith.constant 0 : index
    %c0_150 = arith.constant 0 : index
    %149 = vector.load %arg1[%c12, %c0_149, %c0_150] : memref<16x16x16xf32, #tpu.memory_space<vmem>>, vector<1x16x16xf32>
    %150 = vector.shape_cast %149 : vector<1x16x16xf32> to vector<16x16xf32>
    %c1_151 = arith.constant 1 : index
    %c0_152 = arith.constant 0 : index
    %c0_153 = arith.constant 0 : index
    %151 = vector.load %arg2[%c1_151, %c0_152, %c0_153] : memref<3x16x128xf32, #tpu.memory_space<vmem>>, vector<1x16x128xf32>
    %152 = vector.shape_cast %151 : vector<1x16x128xf32> to vector<16x128xf32>
    %cst_154 = arith.constant dense<0.000000e+00> : vector<16x128xf32>
    %153 = tpu.matmul %150, %152, %cst_154 {dimension_numbers = #tpu.dot_dimension_numbers<[1], [0], [0], [1], [0, 0, 1, 1], [], []>} : vector<16x16xf32>, vector<16x128xf32>, vector<16x128xf32> -> vector<16x128xf32>
    %154 = arith.addf %148, %153 : vector<16x128xf32>
    %c13 = arith.constant 13 : index
    %c0_155 = arith.constant 0 : index
    %c0_156 = arith.constant 0 : index
    %155 = vector.load %arg1[%c13, %c0_155, %c0_156] : memref<16x16x16xf32, #tpu.memory_space<vmem>>, vector<1x16x16xf32>
    %156 = vector.shape_cast %155 : vector<1x16x16xf32> to vector<16x16xf32>
    %c2_157 = arith.constant 2 : index
    %c0_158 = arith.constant 0 : index
    %c0_159 = arith.constant 0 : index
    %157 = vector.load %arg2[%c2_157, %c0_158, %c0_159] : memref<3x16x128xf32, #tpu.memory_space<vmem>>, vector<1x16x128xf32>
    %158 = vector.shape_cast %157 : vector<1x16x128xf32> to vector<16x128xf32>
    %cst_160 = arith.constant dense<0.000000e+00> : vector<16x128xf32>
    %159 = tpu.matmul %156, %158, %cst_160 {dimension_numbers = #tpu.dot_dimension_numbers<[1], [0], [0], [1], [0, 0, 1, 1], [], []>} : vector<16x16xf32>, vector<16x128xf32>, vector<16x128xf32> -> vector<16x128xf32>
    %160 = arith.addf %154, %159 : vector<16x128xf32>
    %c0_161 = arith.constant 0 : index
    %c0_162 = arith.constant 0 : index
    %161 = vector.load %arg10[%c0_161, %c0_162] : memref<1x128xf32, #tpu.memory_space<vmem>>, vector<1x128xf32>
    %162 = vector.broadcast %161 : vector<1x128xf32> to vector<16x128xf32>
    %163 = arith.addf %160, %162 : vector<16x128xf32>
    %cst_163 = arith.constant 0.000000e+00 : f32
    %164 = vector.broadcast %cst_163 : f32 to vector<16x128xf32>
    %165 = arith.maximumf %163, %164 : vector<16x128xf32>
    %c6_164 = arith.constant 6 : index
    %c0_165 = arith.constant 0 : index
    %c0_166 = arith.constant 0 : index
    %166 = vector.load %arg19[%c6_164, %c0_165, %c0_166] : memref<8x16x128xf32, #tpu.memory_space<vmem>>, vector<1x16x128xf32>
    %167 = vector.shape_cast %166 : vector<1x16x128xf32> to vector<16x128xf32>
    %168 = vector.shape_cast %165 : vector<16x128xf32> to vector<1x16x128xf32>
    tpu.vector_store %arg19[%c6_164, %c0_165, %c0_166], %168 {strides = array<i32>} : memref<8x16x128xf32, #tpu.memory_space<vmem>>, vector<1x16x128xf32>,
    %c13_167 = arith.constant 13 : index
    %c0_168 = arith.constant 0 : index
    %c0_169 = arith.constant 0 : index
    %169 = vector.load %arg1[%c13_167, %c0_168, %c0_169] : memref<16x16x16xf32, #tpu.memory_space<vmem>>, vector<1x16x16xf32>
    %170 = vector.shape_cast %169 : vector<1x16x16xf32> to vector<16x16xf32>
    %c0_170 = arith.constant 0 : index
    %c0_171 = arith.constant 0 : index
    %c0_172 = arith.constant 0 : index
    %171 = vector.load %arg2[%c0_170, %c0_171, %c0_172] : memref<3x16x128xf32, #tpu.memory_space<vmem>>, vector<1x16x128xf32>
    %172 = vector.shape_cast %171 : vector<1x16x128xf32> to vector<16x128xf32>
    %cst_173 = arith.constant dense<0.000000e+00> : vector<16x128xf32>
    %173 = tpu.matmul %170, %172, %cst_173 {dimension_numbers = #tpu.dot_dimension_numbers<[1], [0], [0], [1], [0, 0, 1, 1], [], []>} : vector<16x16xf32>, vector<16x128xf32>, vector<16x128xf32> -> vector<16x128xf32>
    %c14 = arith.constant 14 : index
    %c0_174 = arith.constant 0 : index
    %c0_175 = arith.constant 0 : index
    %174 = vector.load %arg1[%c14, %c0_174, %c0_175] : memref<16x16x16xf32, #tpu.memory_space<vmem>>, vector<1x16x16xf32>
    %175 = vector.shape_cast %174 : vector<1x16x16xf32> to vector<16x16xf32>
    %c1_176 = arith.constant 1 : index
    %c0_177 = arith.constant 0 : index
    %c0_178 = arith.constant 0 : index
    %176 = vector.load %arg2[%c1_176, %c0_177, %c0_178] : memref<3x16x128xf32, #tpu.memory_space<vmem>>, vector<1x16x128xf32>
    %177 = vector.shape_cast %176 : vector<1x16x128xf32> to vector<16x128xf32>
    %cst_179 = arith.constant dense<0.000000e+00> : vector<16x128xf32>
    %178 = tpu.matmul %175, %177, %cst_179 {dimension_numbers = #tpu.dot_dimension_numbers<[1], [0], [0], [1], [0, 0, 1, 1], [], []>} : vector<16x16xf32>, vector<16x128xf32>, vector<16x128xf32> -> vector<16x128xf32>
    %179 = arith.addf %173, %178 : vector<16x128xf32>
    %c15 = arith.constant 15 : index
    %c0_180 = arith.constant 0 : index
    %c0_181 = arith.constant 0 : index
    %180 = vector.load %arg1[%c15, %c0_180, %c0_181] : memref<16x16x16xf32, #tpu.memory_space<vmem>>, vector<1x16x16xf32>
    %181 = vector.shape_cast %180 : vector<1x16x16xf32> to vector<16x16xf32>
    %c2_182 = arith.constant 2 : index
    %c0_183 = arith.constant 0 : index
    %c0_184 = arith.constant 0 : index
    %182 = vector.load %arg2[%c2_182, %c0_183, %c0_184] : memref<3x16x128xf32, #tpu.memory_space<vmem>>, vector<1x16x128xf32>
    %183 = vector.shape_cast %182 : vector<1x16x128xf32> to vector<16x128xf32>
    %cst_185 = arith.constant dense<0.000000e+00> : vector<16x128xf32>
    %184 = tpu.matmul %181, %183, %cst_185 {dimension_numbers = #tpu.dot_dimension_numbers<[1], [0], [0], [1], [0, 0, 1, 1], [], []>} : vector<16x16xf32>, vector<16x128xf32>, vector<16x128xf32> -> vector<16x128xf32>
    %185 = arith.addf %179, %184 : vector<16x128xf32>
    %c0_186 = arith.constant 0 : index
    %c0_187 = arith.constant 0 : index
    %186 = vector.load %arg10[%c0_186, %c0_187] : memref<1x128xf32, #tpu.memory_space<vmem>>, vector<1x128xf32>
    %187 = vector.broadcast %186 : vector<1x128xf32> to vector<16x128xf32>
    %188 = arith.addf %185, %187 : vector<16x128xf32>
    %cst_188 = arith.constant 0.000000e+00 : f32
    %189 = vector.broadcast %cst_188 : f32 to vector<16x128xf32>
    %190 = arith.maximumf %188, %189 : vector<16x128xf32>
    %c7_189 = arith.constant 7 : index
    %c0_190 = arith.constant 0 : index
    %c0_191 = arith.constant 0 : index
    %191 = vector.load %arg19[%c7_189, %c0_190, %c0_191] : memref<8x16x128xf32, #tpu.memory_space<vmem>>, vector<1x16x128xf32>
    %192 = vector.shape_cast %191 : vector<1x16x128xf32> to vector<16x128xf32>
    %193 = vector.shape_cast %190 : vector<16x128xf32> to vector<1x16x128xf32>
    tpu.vector_store %arg19[%c7_189, %c0_190, %c0_191], %193 {strides = array<i32>} : memref<8x16x128xf32, #tpu.memory_space<vmem>>, vector<1x16x128xf32>,
    %c0_192 = arith.constant 0 : index
    %c0_193 = arith.constant 0 : index
    %c0_194 = arith.constant 0 : index
    %194 = vector.load %arg19[%c0_192, %c0_193, %c0_194] : memref<8x16x128xf32, #tpu.memory_space<vmem>>, vector<1x16x128xf32>
    %195 = vector.shape_cast %194 : vector<1x16x128xf32> to vector<16x128xf32>
    %c1_195 = arith.constant 1 : index
    %c0_196 = arith.constant 0 : index
    %c0_197 = arith.constant 0 : index
    %196 = vector.load %arg3[%c1_195, %c0_196, %c0_197] : memref<3x128x128xf32, #tpu.memory_space<vmem>>, vector<1x128x128xf32>
    %197 = vector.shape_cast %196 : vector<1x128x128xf32> to vector<128x128xf32>
    %cst_198 = arith.constant dense<0.000000e+00> : vector<16x128xf32>
    %198 = tpu.matmul %195, %197, %cst_198 {dimension_numbers = #tpu.dot_dimension_numbers<[1], [0], [0], [1], [0, 0, 1, 1], [], []>} : vector<16x128xf32>, vector<128x128xf32>, vector<16x128xf32> -> vector<16x128xf32>
    %c1_199 = arith.constant 1 : index
    %c0_200 = arith.constant 0 : index
    %c0_201 = arith.constant 0 : index
    %199 = vector.load %arg19[%c1_199, %c0_200, %c0_201] : memref<8x16x128xf32, #tpu.memory_space<vmem>>, vector<1x16x128xf32>
    %200 = vector.shape_cast %199 : vector<1x16x128xf32> to vector<16x128xf32>
    %c2_202 = arith.constant 2 : index
    %c0_203 = arith.constant 0 : index
    %c0_204 = arith.constant 0 : index
    %201 = vector.load %arg3[%c2_202, %c0_203, %c0_204] : memref<3x128x128xf32, #tpu.memory_space<vmem>>, vector<1x128x128xf32>
    %202 = vector.shape_cast %201 : vector<1x128x128xf32> to vector<128x128xf32>
    %cst_205 = arith.constant dense<0.000000e+00> : vector<16x128xf32>
    %203 = tpu.matmul %200, %202, %cst_205 {dimension_numbers = #tpu.dot_dimension_numbers<[1], [0], [0], [1], [0, 0, 1, 1], [], []>} : vector<16x128xf32>, vector<128x128xf32>, vector<16x128xf32> -> vector<16x128xf32>
    %204 = arith.addf %198, %203 : vector<16x128xf32>
    %c0_206 = arith.constant 0 : index
    %c0_207 = arith.constant 0 : index
    %205 = vector.load %arg11[%c0_206, %c0_207] : memref<1x128xf32, #tpu.memory_space<vmem>>, vector<1x128xf32>
    %206 = vector.broadcast %205 : vector<1x128xf32> to vector<16x128xf32>
    %207 = arith.addf %204, %206 : vector<16x128xf32>
    %cst_208 = arith.constant 0.000000e+00 : f32
    %208 = vector.broadcast %cst_208 : f32 to vector<16x128xf32>
    %209 = arith.maximumf %207, %208 : vector<16x128xf32>
    %c0_209 = arith.constant 0 : index
    %c0_210 = arith.constant 0 : index
    %c0_211 = arith.constant 0 : index
    %210 = vector.load %arg20[%c0_209, %c0_210, %c0_211] : memref<8x16x128xf32, #tpu.memory_space<vmem>>, vector<1x16x128xf32>
    %211 = vector.shape_cast %210 : vector<1x16x128xf32> to vector<16x128xf32>
    %212 = vector.shape_cast %209 : vector<16x128xf32> to vector<1x16x128xf32>
    tpu.vector_store %arg20[%c0_209, %c0_210, %c0_211], %212 {strides = array<i32>} : memref<8x16x128xf32, #tpu.memory_space<vmem>>, vector<1x16x128xf32>,
    %c0_212 = arith.constant 0 : index
    %c0_213 = arith.constant 0 : index
    %c0_214 = arith.constant 0 : index
    %213 = vector.load %arg19[%c0_212, %c0_213, %c0_214] : memref<8x16x128xf32, #tpu.memory_space<vmem>>, vector<1x16x128xf32>
    %214 = vector.shape_cast %213 : vector<1x16x128xf32> to vector<16x128xf32>
    %c0_215 = arith.constant 0 : index
    %c0_216 = arith.constant 0 : index
    %c0_217 = arith.constant 0 : index
    %215 = vector.load %arg3[%c0_215, %c0_216, %c0_217] : memref<3x128x128xf32, #tpu.memory_space<vmem>>, vector<1x128x128xf32>
    %216 = vector.shape_cast %215 : vector<1x128x128xf32> to vector<128x128xf32>
    %cst_218 = arith.constant dense<0.000000e+00> : vector<16x128xf32>
    %217 = tpu.matmul %214, %216, %cst_218 {dimension_numbers = #tpu.dot_dimension_numbers<[1], [0], [0], [1], [0, 0, 1, 1], [], []>} : vector<16x128xf32>, vector<128x128xf32>, vector<16x128xf32> -> vector<16x128xf32>
    %c1_219 = arith.constant 1 : index
    %c0_220 = arith.constant 0 : index
    %c0_221 = arith.constant 0 : index
    %218 = vector.load %arg19[%c1_219, %c0_220, %c0_221] : memref<8x16x128xf32, #tpu.memory_space<vmem>>, vector<1x16x128xf32>
    %219 = vector.shape_cast %218 : vector<1x16x128xf32> to vector<16x128xf32>
    %c1_222 = arith.constant 1 : index
    %c0_223 = arith.constant 0 : index
    %c0_224 = arith.constant 0 : index
    %220 = vector.load %arg3[%c1_222, %c0_223, %c0_224] : memref<3x128x128xf32, #tpu.memory_space<vmem>>, vector<1x128x128xf32>
    %221 = vector.shape_cast %220 : vector<1x128x128xf32> to vector<128x128xf32>
    %cst_225 = arith.constant dense<0.000000e+00> : vector<16x128xf32>
    %222 = tpu.matmul %219, %221, %cst_225 {dimension_numbers = #tpu.dot_dimension_numbers<[1], [0], [0], [1], [0, 0, 1, 1], [], []>} : vector<16x128xf32>, vector<128x128xf32>, vector<16x128xf32> -> vector<16x128xf32>
    %223 = arith.addf %217, %222 : vector<16x128xf32>
    %c2_226 = arith.constant 2 : index
    %c0_227 = arith.constant 0 : index
    %c0_228 = arith.constant 0 : index
    %224 = vector.load %arg19[%c2_226, %c0_227, %c0_228] : memref<8x16x128xf32, #tpu.memory_space<vmem>>, vector<1x16x128xf32>
    %225 = vector.shape_cast %224 : vector<1x16x128xf32> to vector<16x128xf32>
    %c2_229 = arith.constant 2 : index
    %c0_230 = arith.constant 0 : index
    %c0_231 = arith.constant 0 : index
    %226 = vector.load %arg3[%c2_229, %c0_230, %c0_231] : memref<3x128x128xf32, #tpu.memory_space<vmem>>, vector<1x128x128xf32>
    %227 = vector.shape_cast %226 : vector<1x128x128xf32> to vector<128x128xf32>
    %cst_232 = arith.constant dense<0.000000e+00> : vector<16x128xf32>
    %228 = tpu.matmul %225, %227, %cst_232 {dimension_numbers = #tpu.dot_dimension_numbers<[1], [0], [0], [1], [0, 0, 1, 1], [], []>} : vector<16x128xf32>, vector<128x128xf32>, vector<16x128xf32> -> vector<16x128xf32>
    %229 = arith.addf %223, %228 : vector<16x128xf32>
    %c0_233 = arith.constant 0 : index
    %c0_234 = arith.constant 0 : index
    %230 = vector.load %arg11[%c0_233, %c0_234] : memref<1x128xf32, #tpu.memory_space<vmem>>, vector<1x128xf32>
    %231 = vector.broadcast %230 : vector<1x128xf32> to vector<16x128xf32>
    %232 = arith.addf %229, %231 : vector<16x128xf32>
    %cst_235 = arith.constant 0.000000e+00 : f32
    %233 = vector.broadcast %cst_235 : f32 to vector<16x128xf32>
    %234 = arith.maximumf %232, %233 : vector<16x128xf32>
    %c1_236 = arith.constant 1 : index
    %c0_237 = arith.constant 0 : index
    %c0_238 = arith.constant 0 : index
    %235 = vector.load %arg20[%c1_236, %c0_237, %c0_238] : memref<8x16x128xf32, #tpu.memory_space<vmem>>, vector<1x16x128xf32>
    %236 = vector.shape_cast %235 : vector<1x16x128xf32> to vector<16x128xf32>
    %237 = vector.shape_cast %234 : vector<16x128xf32> to vector<1x16x128xf32>
    tpu.vector_store %arg20[%c1_236, %c0_237, %c0_238], %237 {strides = array<i32>} : memref<8x16x128xf32, #tpu.memory_space<vmem>>, vector<1x16x128xf32>,
    %c1_239 = arith.constant 1 : index
    %c0_240 = arith.constant 0 : index
    %c0_241 = arith.constant 0 : index
    %238 = vector.load %arg19[%c1_239, %c0_240, %c0_241] : memref<8x16x128xf32, #tpu.memory_space<vmem>>, vector<1x16x128xf32>
    %239 = vector.shape_cast %238 : vector<1x16x128xf32> to vector<16x128xf32>
    %c0_242 = arith.constant 0 : index
    %c0_243 = arith.constant 0 : index
    %c0_244 = arith.constant 0 : index
    %240 = vector.load %arg3[%c0_242, %c0_243, %c0_244] : memref<3x128x128xf32, #tpu.memory_space<vmem>>, vector<1x128x128xf32>
    %241 = vector.shape_cast %240 : vector<1x128x128xf32> to vector<128x128xf32>
    %cst_245 = arith.constant dense<0.000000e+00> : vector<16x128xf32>
    %242 = tpu.matmul %239, %241, %cst_245 {dimension_numbers = #tpu.dot_dimension_numbers<[1], [0], [0], [1], [0, 0, 1, 1], [], []>} : vector<16x128xf32>, vector<128x128xf32>, vector<16x128xf32> -> vector<16x128xf32>
    %c2_246 = arith.constant 2 : index
    %c0_247 = arith.constant 0 : index
    %c0_248 = arith.constant 0 : index
    %243 = vector.load %arg19[%c2_246, %c0_247, %c0_248] : memref<8x16x128xf32, #tpu.memory_space<vmem>>, vector<1x16x128xf32>
    %244 = vector.shape_cast %243 : vector<1x16x128xf32> to vector<16x128xf32>
    %c1_249 = arith.constant 1 : index
    %c0_250 = arith.constant 0 : index
    %c0_251 = arith.constant 0 : index
    %245 = vector.load %arg3[%c1_249, %c0_250, %c0_251] : memref<3x128x128xf32, #tpu.memory_space<vmem>>, vector<1x128x128xf32>
    %246 = vector.shape_cast %245 : vector<1x128x128xf32> to vector<128x128xf32>
    %cst_252 = arith.constant dense<0.000000e+00> : vector<16x128xf32>
    %247 = tpu.matmul %244, %246, %cst_252 {dimension_numbers = #tpu.dot_dimension_numbers<[1], [0], [0], [1], [0, 0, 1, 1], [], []>} : vector<16x128xf32>, vector<128x128xf32>, vector<16x128xf32> -> vector<16x128xf32>
    %248 = arith.addf %242, %247 : vector<16x128xf32>
    %c3_253 = arith.constant 3 : index
    %c0_254 = arith.constant 0 : index
    %c0_255 = arith.constant 0 : index
    %249 = vector.load %arg19[%c3_253, %c0_254, %c0_255] : memref<8x16x128xf32, #tpu.memory_space<vmem>>, vector<1x16x128xf32>
    %250 = vector.shape_cast %249 : vector<1x16x128xf32> to vector<16x128xf32>
    %c2_256 = arith.constant 2 : index
    %c0_257 = arith.constant 0 : index
    %c0_258 = arith.constant 0 : index
    %251 = vector.load %arg3[%c2_256, %c0_257, %c0_258] : memref<3x128x128xf32, #tpu.memory_space<vmem>>, vector<1x128x128xf32>
    %252 = vector.shape_cast %251 : vector<1x128x128xf32> to vector<128x128xf32>
    %cst_259 = arith.constant dense<0.000000e+00> : vector<16x128xf32>
    %253 = tpu.matmul %250, %252, %cst_259 {dimension_numbers = #tpu.dot_dimension_numbers<[1], [0], [0], [1], [0, 0, 1, 1], [], []>} : vector<16x128xf32>, vector<128x128xf32>, vector<16x128xf32> -> vector<16x128xf32>
    %254 = arith.addf %248, %253 : vector<16x128xf32>
    %c0_260 = arith.constant 0 : index
    %c0_261 = arith.constant 0 : index
    %255 = vector.load %arg11[%c0_260, %c0_261] : memref<1x128xf32, #tpu.memory_space<vmem>>, vector<1x128xf32>
    %256 = vector.broadcast %255 : vector<1x128xf32> to vector<16x128xf32>
    %257 = arith.addf %254, %256 : vector<16x128xf32>
    %cst_262 = arith.constant 0.000000e+00 : f32
    %258 = vector.broadcast %cst_262 : f32 to vector<16x128xf32>
    %259 = arith.maximumf %257, %258 : vector<16x128xf32>
    %c2_263 = arith.constant 2 : index
    %c0_264 = arith.constant 0 : index
    %c0_265 = arith.constant 0 : index
    %260 = vector.load %arg20[%c2_263, %c0_264, %c0_265] : memref<8x16x128xf32, #tpu.memory_space<vmem>>, vector<1x16x128xf32>
    %261 = vector.shape_cast %260 : vector<1x16x128xf32> to vector<16x128xf32>
    %262 = vector.shape_cast %259 : vector<16x128xf32> to vector<1x16x128xf32>
    tpu.vector_store %arg20[%c2_263, %c0_264, %c0_265], %262 {strides = array<i32>} : memref<8x16x128xf32, #tpu.memory_space<vmem>>, vector<1x16x128xf32>,
    %c2_266 = arith.constant 2 : index
    %c0_267 = arith.constant 0 : index
    %c0_268 = arith.constant 0 : index
    %263 = vector.load %arg19[%c2_266, %c0_267, %c0_268] : memref<8x16x128xf32, #tpu.memory_space<vmem>>, vector<1x16x128xf32>
    %264 = vector.shape_cast %263 : vector<1x16x128xf32> to vector<16x128xf32>
    %c0_269 = arith.constant 0 : index
    %c0_270 = arith.constant 0 : index
    %c0_271 = arith.constant 0 : index
    %265 = vector.load %arg3[%c0_269, %c0_270, %c0_271] : memref<3x128x128xf32, #tpu.memory_space<vmem>>, vector<1x128x128xf32>
    %266 = vector.shape_cast %265 : vector<1x128x128xf32> to vector<128x128xf32>
    %cst_272 = arith.constant dense<0.000000e+00> : vector<16x128xf32>
    %267 = tpu.matmul %264, %266, %cst_272 {dimension_numbers = #tpu.dot_dimension_numbers<[1], [0], [0], [1], [0, 0, 1, 1], [], []>} : vector<16x128xf32>, vector<128x128xf32>, vector<16x128xf32> -> vector<16x128xf32>
    %c3_273 = arith.constant 3 : index
    %c0_274 = arith.constant 0 : index
    %c0_275 = arith.constant 0 : index
    %268 = vector.load %arg19[%c3_273, %c0_274, %c0_275] : memref<8x16x128xf32, #tpu.memory_space<vmem>>, vector<1x16x128xf32>
    %269 = vector.shape_cast %268 : vector<1x16x128xf32> to vector<16x128xf32>
    %c1_276 = arith.constant 1 : index
    %c0_277 = arith.constant 0 : index
    %c0_278 = arith.constant 0 : index
    %270 = vector.load %arg3[%c1_276, %c0_277, %c0_278] : memref<3x128x128xf32, #tpu.memory_space<vmem>>, vector<1x128x128xf32>
    %271 = vector.shape_cast %270 : vector<1x128x128xf32> to vector<128x128xf32>
    %cst_279 = arith.constant dense<0.000000e+00> : vector<16x128xf32>
    %272 = tpu.matmul %269, %271, %cst_279 {dimension_numbers = #tpu.dot_dimension_numbers<[1], [0], [0], [1], [0, 0, 1, 1], [], []>} : vector<16x128xf32>, vector<128x128xf32>, vector<16x128xf32> -> vector<16x128xf32>
    %273 = arith.addf %267, %272 : vector<16x128xf32>
    %c4_280 = arith.constant 4 : index
    %c0_281 = arith.constant 0 : index
    %c0_282 = arith.constant 0 : index
    %274 = vector.load %arg19[%c4_280, %c0_281, %c0_282] : memref<8x16x128xf32, #tpu.memory_space<vmem>>, vector<1x16x128xf32>
    %275 = vector.shape_cast %274 : vector<1x16x128xf32> to vector<16x128xf32>
    %c2_283 = arith.constant 2 : index
    %c0_284 = arith.constant 0 : index
    %c0_285 = arith.constant 0 : index
    %276 = vector.load %arg3[%c2_283, %c0_284, %c0_285] : memref<3x128x128xf32, #tpu.memory_space<vmem>>, vector<1x128x128xf32>
    %277 = vector.shape_cast %276 : vector<1x128x128xf32> to vector<128x128xf32>
    %cst_286 = arith.constant dense<0.000000e+00> : vector<16x128xf32>
    %278 = tpu.matmul %275, %277, %cst_286 {dimension_numbers = #tpu.dot_dimension_numbers<[1], [0], [0], [1], [0, 0, 1, 1], [], []>} : vector<16x128xf32>, vector<128x128xf32>, vector<16x128xf32> -> vector<16x128xf32>
    %279 = arith.addf %273, %278 : vector<16x128xf32>
    %c0_287 = arith.constant 0 : index
    %c0_288 = arith.constant 0 : index
    %280 = vector.load %arg11[%c0_287, %c0_288] : memref<1x128xf32, #tpu.memory_space<vmem>>, vector<1x128xf32>
    %281 = vector.broadcast %280 : vector<1x128xf32> to vector<16x128xf32>
    %282 = arith.addf %279, %281 : vector<16x128xf32>
    %cst_289 = arith.constant 0.000000e+00 : f32
    %283 = vector.broadcast %cst_289 : f32 to vector<16x128xf32>
    %284 = arith.maximumf %282, %283 : vector<16x128xf32>
    %c3_290 = arith.constant 3 : index
    %c0_291 = arith.constant 0 : index
    %c0_292 = arith.constant 0 : index
    %285 = vector.load %arg20[%c3_290, %c0_291, %c0_292] : memref<8x16x128xf32, #tpu.memory_space<vmem>>, vector<1x16x128xf32>
    %286 = vector.shape_cast %285 : vector<1x16x128xf32> to vector<16x128xf32>
    %287 = vector.shape_cast %284 : vector<16x128xf32> to vector<1x16x128xf32>
    tpu.vector_store %arg20[%c3_290, %c0_291, %c0_292], %287 {strides = array<i32>} : memref<8x16x128xf32, #tpu.memory_space<vmem>>, vector<1x16x128xf32>,
    %c3_293 = arith.constant 3 : index
    %c0_294 = arith.constant 0 : index
    %c0_295 = arith.constant 0 : index
    %288 = vector.load %arg19[%c3_293, %c0_294, %c0_295] : memref<8x16x128xf32, #tpu.memory_space<vmem>>, vector<1x16x128xf32>
    %289 = vector.shape_cast %288 : vector<1x16x128xf32> to vector<16x128xf32>
    %c0_296 = arith.constant 0 : index
    %c0_297 = arith.constant 0 : index
    %c0_298 = arith.constant 0 : index
    %290 = vector.load %arg3[%c0_296, %c0_297, %c0_298] : memref<3x128x128xf32, #tpu.memory_space<vmem>>, vector<1x128x128xf32>
    %291 = vector.shape_cast %290 : vector<1x128x128xf32> to vector<128x128xf32>
    %cst_299 = arith.constant dense<0.000000e+00> : vector<16x128xf32>
    %292 = tpu.matmul %289, %291, %cst_299 {dimension_numbers = #tpu.dot_dimension_numbers<[1], [0], [0], [1], [0, 0, 1, 1], [], []>} : vector<16x128xf32>, vector<128x128xf32>, vector<16x128xf32> -> vector<16x128xf32>
    %c4_300 = arith.constant 4 : index
    %c0_301 = arith.constant 0 : index
    %c0_302 = arith.constant 0 : index
    %293 = vector.load %arg19[%c4_300, %c0_301, %c0_302] : memref<8x16x128xf32, #tpu.memory_space<vmem>>, vector<1x16x128xf32>
    %294 = vector.shape_cast %293 : vector<1x16x128xf32> to vector<16x128xf32>
    %c1_303 = arith.constant 1 : index
    %c0_304 = arith.constant 0 : index
    %c0_305 = arith.constant 0 : index
    %295 = vector.load %arg3[%c1_303, %c0_304, %c0_305] : memref<3x128x128xf32, #tpu.memory_space<vmem>>, vector<1x128x128xf32>
    %296 = vector.shape_cast %295 : vector<1x128x128xf32> to vector<128x128xf32>
    %cst_306 = arith.constant dense<0.000000e+00> : vector<16x128xf32>
    %297 = tpu.matmul %294, %296, %cst_306 {dimension_numbers = #tpu.dot_dimension_numbers<[1], [0], [0], [1], [0, 0, 1, 1], [], []>} : vector<16x128xf32>, vector<128x128xf32>, vector<16x128xf32> -> vector<16x128xf32>
    %298 = arith.addf %292, %297 : vector<16x128xf32>
    %c5_307 = arith.constant 5 : index
    %c0_308 = arith.constant 0 : index
    %c0_309 = arith.constant 0 : index
    %299 = vector.load %arg19[%c5_307, %c0_308, %c0_309] : memref<8x16x128xf32, #tpu.memory_space<vmem>>, vector<1x16x128xf32>
    %300 = vector.shape_cast %299 : vector<1x16x128xf32> to vector<16x128xf32>
    %c2_310 = arith.constant 2 : index
    %c0_311 = arith.constant 0 : index
    %c0_312 = arith.constant 0 : index
    %301 = vector.load %arg3[%c2_310, %c0_311, %c0_312] : memref<3x128x128xf32, #tpu.memory_space<vmem>>, vector<1x128x128xf32>
    %302 = vector.shape_cast %301 : vector<1x128x128xf32> to vector<128x128xf32>
    %cst_313 = arith.constant dense<0.000000e+00> : vector<16x128xf32>
    %303 = tpu.matmul %300, %302, %cst_313 {dimension_numbers = #tpu.dot_dimension_numbers<[1], [0], [0], [1], [0, 0, 1, 1], [], []>} : vector<16x128xf32>, vector<128x128xf32>, vector<16x128xf32> -> vector<16x128xf32>
    %304 = arith.addf %298, %303 : vector<16x128xf32>
    %c0_314 = arith.constant 0 : index
    %c0_315 = arith.constant 0 : index
    %305 = vector.load %arg11[%c0_314, %c0_315] : memref<1x128xf32, #tpu.memory_space<vmem>>, vector<1x128xf32>
    %306 = vector.broadcast %305 : vector<1x128xf32> to vector<16x128xf32>
    %307 = arith.addf %304, %306 : vector<16x128xf32>
    %cst_316 = arith.constant 0.000000e+00 : f32
    %308 = vector.broadcast %cst_316 : f32 to vector<16x128xf32>
    %309 = arith.maximumf %307, %308 : vector<16x128xf32>
    %c4_317 = arith.constant 4 : index
    %c0_318 = arith.constant 0 : index
    %c0_319 = arith.constant 0 : index
    %310 = vector.load %arg20[%c4_317, %c0_318, %c0_319] : memref<8x16x128xf32, #tpu.memory_space<vmem>>, vector<1x16x128xf32>
    %311 = vector.shape_cast %310 : vector<1x16x128xf32> to vector<16x128xf32>
    %312 = vector.shape_cast %309 : vector<16x128xf32> to vector<1x16x128xf32>
    tpu.vector_store %arg20[%c4_317, %c0_318, %c0_319], %312 {strides = array<i32>} : memref<8x16x128xf32, #tpu.memory_space<vmem>>, vector<1x16x128xf32>,
    %c4_320 = arith.constant 4 : index
    %c0_321 = arith.constant 0 : index
    %c0_322 = arith.constant 0 : index
    %313 = vector.load %arg19[%c4_320, %c0_321, %c0_322] : memref<8x16x128xf32, #tpu.memory_space<vmem>>, vector<1x16x128xf32>
    %314 = vector.shape_cast %313 : vector<1x16x128xf32> to vector<16x128xf32>
    %c0_323 = arith.constant 0 : index
    %c0_324 = arith.constant 0 : index
    %c0_325 = arith.constant 0 : index
    %315 = vector.load %arg3[%c0_323, %c0_324, %c0_325] : memref<3x128x128xf32, #tpu.memory_space<vmem>>, vector<1x128x128xf32>
    %316 = vector.shape_cast %315 : vector<1x128x128xf32> to vector<128x128xf32>
    %cst_326 = arith.constant dense<0.000000e+00> : vector<16x128xf32>
    %317 = tpu.matmul %314, %316, %cst_326 {dimension_numbers = #tpu.dot_dimension_numbers<[1], [0], [0], [1], [0, 0, 1, 1], [], []>} : vector<16x128xf32>, vector<128x128xf32>, vector<16x128xf32> -> vector<16x128xf32>
    %c5_327 = arith.constant 5 : index
    %c0_328 = arith.constant 0 : index
    %c0_329 = arith.constant 0 : index
    %318 = vector.load %arg19[%c5_327, %c0_328, %c0_329] : memref<8x16x128xf32, #tpu.memory_space<vmem>>, vector<1x16x128xf32>
    %319 = vector.shape_cast %318 : vector<1x16x128xf32> to vector<16x128xf32>
    %c1_330 = arith.constant 1 : index
    %c0_331 = arith.constant 0 : index
    %c0_332 = arith.constant 0 : index
    %320 = vector.load %arg3[%c1_330, %c0_331, %c0_332] : memref<3x128x128xf32, #tpu.memory_space<vmem>>, vector<1x128x128xf32>
    %321 = vector.shape_cast %320 : vector<1x128x128xf32> to vector<128x128xf32>
    %cst_333 = arith.constant dense<0.000000e+00> : vector<16x128xf32>
    %322 = tpu.matmul %319, %321, %cst_333 {dimension_numbers = #tpu.dot_dimension_numbers<[1], [0], [0], [1], [0, 0, 1, 1], [], []>} : vector<16x128xf32>, vector<128x128xf32>, vector<16x128xf32> -> vector<16x128xf32>
    %323 = arith.addf %317, %322 : vector<16x128xf32>
    %c6_334 = arith.constant 6 : index
    %c0_335 = arith.constant 0 : index
    %c0_336 = arith.constant 0 : index
    %324 = vector.load %arg19[%c6_334, %c0_335, %c0_336] : memref<8x16x128xf32, #tpu.memory_space<vmem>>, vector<1x16x128xf32>
    %325 = vector.shape_cast %324 : vector<1x16x128xf32> to vector<16x128xf32>
    %c2_337 = arith.constant 2 : index
    %c0_338 = arith.constant 0 : index
    %c0_339 = arith.constant 0 : index
    %326 = vector.load %arg3[%c2_337, %c0_338, %c0_339] : memref<3x128x128xf32, #tpu.memory_space<vmem>>, vector<1x128x128xf32>
    %327 = vector.shape_cast %326 : vector<1x128x128xf32> to vector<128x128xf32>
    %cst_340 = arith.constant dense<0.000000e+00> : vector<16x128xf32>
    %328 = tpu.matmul %325, %327, %cst_340 {dimension_numbers = #tpu.dot_dimension_numbers<[1], [0], [0], [1], [0, 0, 1, 1], [], []>} : vector<16x128xf32>, vector<128x128xf32>, vector<16x128xf32> -> vector<16x128xf32>
    %329 = arith.addf %323, %328 : vector<16x128xf32>
    %c0_341 = arith.constant 0 : index
    %c0_342 = arith.constant 0 : index
    %330 = vector.load %arg11[%c0_341, %c0_342] : memref<1x128xf32, #tpu.memory_space<vmem>>, vector<1x128xf32>
    %331 = vector.broadcast %330 : vector<1x128xf32> to vector<16x128xf32>
    %332 = arith.addf %329, %331 : vector<16x128xf32>
    %cst_343 = arith.constant 0.000000e+00 : f32
    %333 = vector.broadcast %cst_343 : f32 to vector<16x128xf32>
    %334 = arith.maximumf %332, %333 : vector<16x128xf32>
    %c5_344 = arith.constant 5 : index
    %c0_345 = arith.constant 0 : index
    %c0_346 = arith.constant 0 : index
    %335 = vector.load %arg20[%c5_344, %c0_345, %c0_346] : memref<8x16x128xf32, #tpu.memory_space<vmem>>, vector<1x16x128xf32>
    %336 = vector.shape_cast %335 : vector<1x16x128xf32> to vector<16x128xf32>
    %337 = vector.shape_cast %334 : vector<16x128xf32> to vector<1x16x128xf32>
    tpu.vector_store %arg20[%c5_344, %c0_345, %c0_346], %337 {strides = array<i32>} : memref<8x16x128xf32, #tpu.memory_space<vmem>>, vector<1x16x128xf32>,
    %c5_347 = arith.constant 5 : index
    %c0_348 = arith.constant 0 : index
    %c0_349 = arith.constant 0 : index
    %338 = vector.load %arg19[%c5_347, %c0_348, %c0_349] : memref<8x16x128xf32, #tpu.memory_space<vmem>>, vector<1x16x128xf32>
    %339 = vector.shape_cast %338 : vector<1x16x128xf32> to vector<16x128xf32>
    %c0_350 = arith.constant 0 : index
    %c0_351 = arith.constant 0 : index
    %c0_352 = arith.constant 0 : index
    %340 = vector.load %arg3[%c0_350, %c0_351, %c0_352] : memref<3x128x128xf32, #tpu.memory_space<vmem>>, vector<1x128x128xf32>
    %341 = vector.shape_cast %340 : vector<1x128x128xf32> to vector<128x128xf32>
    %cst_353 = arith.constant dense<0.000000e+00> : vector<16x128xf32>
    %342 = tpu.matmul %339, %341, %cst_353 {dimension_numbers = #tpu.dot_dimension_numbers<[1], [0], [0], [1], [0, 0, 1, 1], [], []>} : vector<16x128xf32>, vector<128x128xf32>, vector<16x128xf32> -> vector<16x128xf32>
    %c6_354 = arith.constant 6 : index
    %c0_355 = arith.constant 0 : index
    %c0_356 = arith.constant 0 : index
    %343 = vector.load %arg19[%c6_354, %c0_355, %c0_356] : memref<8x16x128xf32, #tpu.memory_space<vmem>>, vector<1x16x128xf32>
    %344 = vector.shape_cast %343 : vector<1x16x128xf32> to vector<16x128xf32>
    %c1_357 = arith.constant 1 : index
    %c0_358 = arith.constant 0 : index
    %c0_359 = arith.constant 0 : index
    %345 = vector.load %arg3[%c1_357, %c0_358, %c0_359] : memref<3x128x128xf32, #tpu.memory_space<vmem>>, vector<1x128x128xf32>
    %346 = vector.shape_cast %345 : vector<1x128x128xf32> to vector<128x128xf32>
    %cst_360 = arith.constant dense<0.000000e+00> : vector<16x128xf32>
    %347 = tpu.matmul %344, %346, %cst_360 {dimension_numbers = #tpu.dot_dimension_numbers<[1], [0], [0], [1], [0, 0, 1, 1], [], []>} : vector<16x128xf32>, vector<128x128xf32>, vector<16x128xf32> -> vector<16x128xf32>
    %348 = arith.addf %342, %347 : vector<16x128xf32>
    %c7_361 = arith.constant 7 : index
    %c0_362 = arith.constant 0 : index
    %c0_363 = arith.constant 0 : index
    %349 = vector.load %arg19[%c7_361, %c0_362, %c0_363] : memref<8x16x128xf32, #tpu.memory_space<vmem>>, vector<1x16x128xf32>
    %350 = vector.shape_cast %349 : vector<1x16x128xf32> to vector<16x128xf32>
    %c2_364 = arith.constant 2 : index
    %c0_365 = arith.constant 0 : index
    %c0_366 = arith.constant 0 : index
    %351 = vector.load %arg3[%c2_364, %c0_365, %c0_366] : memref<3x128x128xf32, #tpu.memory_space<vmem>>, vector<1x128x128xf32>
    %352 = vector.shape_cast %351 : vector<1x128x128xf32> to vector<128x128xf32>
    %cst_367 = arith.constant dense<0.000000e+00> : vector<16x128xf32>
    %353 = tpu.matmul %350, %352, %cst_367 {dimension_numbers = #tpu.dot_dimension_numbers<[1], [0], [0], [1], [0, 0, 1, 1], [], []>} : vector<16x128xf32>, vector<128x128xf32>, vector<16x128xf32> -> vector<16x128xf32>
    %354 = arith.addf %348, %353 : vector<16x128xf32>
    %c0_368 = arith.constant 0 : index
    %c0_369 = arith.constant 0 : index
    %355 = vector.load %arg11[%c0_368, %c0_369] : memref<1x128xf32, #tpu.memory_space<vmem>>, vector<1x128xf32>
    %356 = vector.broadcast %355 : vector<1x128xf32> to vector<16x128xf32>
    %357 = arith.addf %354, %356 : vector<16x128xf32>
    %cst_370 = arith.constant 0.000000e+00 : f32
    %358 = vector.broadcast %cst_370 : f32 to vector<16x128xf32>
    %359 = arith.maximumf %357, %358 : vector<16x128xf32>
    %c6_371 = arith.constant 6 : index
    %c0_372 = arith.constant 0 : index
    %c0_373 = arith.constant 0 : index
    %360 = vector.load %arg20[%c6_371, %c0_372, %c0_373] : memref<8x16x128xf32, #tpu.memory_space<vmem>>, vector<1x16x128xf32>
    %361 = vector.shape_cast %360 : vector<1x16x128xf32> to vector<16x128xf32>
    %362 = vector.shape_cast %359 : vector<16x128xf32> to vector<1x16x128xf32>
    tpu.vector_store %arg20[%c6_371, %c0_372, %c0_373], %362 {strides = array<i32>} : memref<8x16x128xf32, #tpu.memory_space<vmem>>, vector<1x16x128xf32>,
    %c6_374 = arith.constant 6 : index
    %c0_375 = arith.constant 0 : index
    %c0_376 = arith.constant 0 : index
    %363 = vector.load %arg19[%c6_374, %c0_375, %c0_376] : memref<8x16x128xf32, #tpu.memory_space<vmem>>, vector<1x16x128xf32>
    %364 = vector.shape_cast %363 : vector<1x16x128xf32> to vector<16x128xf32>
    %c0_377 = arith.constant 0 : index
    %c0_378 = arith.constant 0 : index
    %c0_379 = arith.constant 0 : index
    %365 = vector.load %arg3[%c0_377, %c0_378, %c0_379] : memref<3x128x128xf32, #tpu.memory_space<vmem>>, vector<1x128x128xf32>
    %366 = vector.shape_cast %365 : vector<1x128x128xf32> to vector<128x128xf32>
    %cst_380 = arith.constant dense<0.000000e+00> : vector<16x128xf32>
    %367 = tpu.matmul %364, %366, %cst_380 {dimension_numbers = #tpu.dot_dimension_numbers<[1], [0], [0], [1], [0, 0, 1, 1], [], []>} : vector<16x128xf32>, vector<128x128xf32>, vector<16x128xf32> -> vector<16x128xf32>
    %c7_381 = arith.constant 7 : index
    %c0_382 = arith.constant 0 : index
    %c0_383 = arith.constant 0 : index
    %368 = vector.load %arg19[%c7_381, %c0_382, %c0_383] : memref<8x16x128xf32, #tpu.memory_space<vmem>>, vector<1x16x128xf32>
    %369 = vector.shape_cast %368 : vector<1x16x128xf32> to vector<16x128xf32>
    %c1_384 = arith.constant 1 : index
    %c0_385 = arith.constant 0 : index
    %c0_386 = arith.constant 0 : index
    %370 = vector.load %arg3[%c1_384, %c0_385, %c0_386] : memref<3x128x128xf32, #tpu.memory_space<vmem>>, vector<1x128x128xf32>
    %371 = vector.shape_cast %370 : vector<1x128x128xf32> to vector<128x128xf32>
    %cst_387 = arith.constant dense<0.000000e+00> : vector<16x128xf32>
    %372 = tpu.matmul %369, %371, %cst_387 {dimension_numbers = #tpu.dot_dimension_numbers<[1], [0], [0], [1], [0, 0, 1, 1], [], []>} : vector<16x128xf32>, vector<128x128xf32>, vector<16x128xf32> -> vector<16x128xf32>
    %373 = arith.addf %367, %372 : vector<16x128xf32>
    %c0_388 = arith.constant 0 : index
    %c0_389 = arith.constant 0 : index
    %374 = vector.load %arg11[%c0_388, %c0_389] : memref<1x128xf32, #tpu.memory_space<vmem>>, vector<1x128xf32>
    %375 = vector.broadcast %374 : vector<1x128xf32> to vector<16x128xf32>
    %376 = arith.addf %373, %375 : vector<16x128xf32>
    %cst_390 = arith.constant 0.000000e+00 : f32
    %377 = vector.broadcast %cst_390 : f32 to vector<16x128xf32>
    %378 = arith.maximumf %376, %377 : vector<16x128xf32>
    %c7_391 = arith.constant 7 : index
    %c0_392 = arith.constant 0 : index
    %c0_393 = arith.constant 0 : index
    %379 = vector.load %arg20[%c7_391, %c0_392, %c0_393] : memref<8x16x128xf32, #tpu.memory_space<vmem>>, vector<1x16x128xf32>
    %380 = vector.shape_cast %379 : vector<1x16x128xf32> to vector<16x128xf32>
    %381 = vector.shape_cast %378 : vector<16x128xf32> to vector<1x16x128xf32>
    tpu.vector_store %arg20[%c7_391, %c0_392, %c0_393], %381 {strides = array<i32>} : memref<8x16x128xf32, #tpu.memory_space<vmem>>, vector<1x16x128xf32>,
    %c0_394 = arith.constant 0 : index
    %c0_395 = arith.constant 0 : index
    %c0_396 = arith.constant 0 : index
    %382 = vector.load %arg20[%c0_394, %c0_395, %c0_396] : memref<8x16x128xf32, #tpu.memory_space<vmem>>, vector<1x16x128xf32>
    %383 = vector.shape_cast %382 : vector<1x16x128xf32> to vector<16x128xf32>
    %c1_397 = arith.constant 1 : index
    %c0_398 = arith.constant 0 : index
    %c0_399 = arith.constant 0 : index
    %384 = vector.load %arg4[%c1_397, %c0_398, %c0_399] : memref<3x128x64xf32, #tpu.memory_space<vmem>>, vector<1x128x64xf32>
    %385 = vector.shape_cast %384 : vector<1x128x64xf32> to vector<128x64xf32>
    %cst_400 = arith.constant dense<0.000000e+00> : vector<16x64xf32>
    %386 = tpu.matmul %383, %385, %cst_400 {dimension_numbers = #tpu.dot_dimension_numbers<[1], [0], [0], [1], [0, 0, 1, 1], [], []>} : vector<16x128xf32>, vector<128x64xf32>, vector<16x64xf32> -> vector<16x64xf32>
    %c1_401 = arith.constant 1 : index
    %c0_402 = arith.constant 0 : index
    %c0_403 = arith.constant 0 : index
    %387 = vector.load %arg20[%c1_401, %c0_402, %c0_403] : memref<8x16x128xf32, #tpu.memory_space<vmem>>, vector<1x16x128xf32>
    %388 = vector.shape_cast %387 : vector<1x16x128xf32> to vector<16x128xf32>
    %c2_404 = arith.constant 2 : index
    %c0_405 = arith.constant 0 : index
    %c0_406 = arith.constant 0 : index
    %389 = vector.load %arg4[%c2_404, %c0_405, %c0_406] : memref<3x128x64xf32, #tpu.memory_space<vmem>>, vector<1x128x64xf32>
    %390 = vector.shape_cast %389 : vector<1x128x64xf32> to vector<128x64xf32>
    %cst_407 = arith.constant dense<0.000000e+00> : vector<16x64xf32>
    %391 = tpu.matmul %388, %390, %cst_407 {dimension_numbers = #tpu.dot_dimension_numbers<[1], [0], [0], [1], [0, 0, 1, 1], [], []>} : vector<16x128xf32>, vector<128x64xf32>, vector<16x64xf32> -> vector<16x64xf32>
    %392 = arith.addf %386, %391 : vector<16x64xf32>
    %c0_408 = arith.constant 0 : index
    %c0_409 = arith.constant 0 : index
    %393 = vector.load %arg12[%c0_408, %c0_409] : memref<1x64xf32, #tpu.memory_space<vmem>>, vector<1x64xf32>
    %394 = vector.broadcast %393 : vector<1x64xf32> to vector<16x64xf32>
    %395 = arith.addf %392, %394 : vector<16x64xf32>
    %cst_410 = arith.constant 0.000000e+00 : f32
    %396 = vector.broadcast %cst_410 : f32 to vector<16x64xf32>
    %397 = arith.maximumf %395, %396 : vector<16x64xf32>
    %c0_411 = arith.constant 0 : index
    %c0_412 = arith.constant 0 : index
    %c0_413 = arith.constant 0 : index
    %398 = vector.load %arg21[%c0_411, %c0_412, %c0_413] : memref<4x16x64xf32, #tpu.memory_space<vmem>>, vector<1x16x64xf32>
    %399 = vector.shape_cast %398 : vector<1x16x64xf32> to vector<16x64xf32>
    %400 = vector.shape_cast %397 : vector<16x64xf32> to vector<1x16x64xf32>
    tpu.vector_store %arg21[%c0_411, %c0_412, %c0_413], %400 {strides = array<i32>} : memref<4x16x64xf32, #tpu.memory_space<vmem>>, vector<1x16x64xf32>,
    %c1_414 = arith.constant 1 : index
    %c0_415 = arith.constant 0 : index
    %c0_416 = arith.constant 0 : index
    %401 = vector.load %arg20[%c1_414, %c0_415, %c0_416] : memref<8x16x128xf32, #tpu.memory_space<vmem>>, vector<1x16x128xf32>
    %402 = vector.shape_cast %401 : vector<1x16x128xf32> to vector<16x128xf32>
    %c0_417 = arith.constant 0 : index
    %c0_418 = arith.constant 0 : index
    %c0_419 = arith.constant 0 : index
    %403 = vector.load %arg4[%c0_417, %c0_418, %c0_419] : memref<3x128x64xf32, #tpu.memory_space<vmem>>, vector<1x128x64xf32>
    %404 = vector.shape_cast %403 : vector<1x128x64xf32> to vector<128x64xf32>
    %cst_420 = arith.constant dense<0.000000e+00> : vector<16x64xf32>
    %405 = tpu.matmul %402, %404, %cst_420 {dimension_numbers = #tpu.dot_dimension_numbers<[1], [0], [0], [1], [0, 0, 1, 1], [], []>} : vector<16x128xf32>, vector<128x64xf32>, vector<16x64xf32> -> vector<16x64xf32>
    %c2_421 = arith.constant 2 : index
    %c0_422 = arith.constant 0 : index
    %c0_423 = arith.constant 0 : index
    %406 = vector.load %arg20[%c2_421, %c0_422, %c0_423] : memref<8x16x128xf32, #tpu.memory_space<vmem>>, vector<1x16x128xf32>
    %407 = vector.shape_cast %406 : vector<1x16x128xf32> to vector<16x128xf32>
    %c1_424 = arith.constant 1 : index
    %c0_425 = arith.constant 0 : index
    %c0_426 = arith.constant 0 : index
    %408 = vector.load %arg4[%c1_424, %c0_425, %c0_426] : memref<3x128x64xf32, #tpu.memory_space<vmem>>, vector<1x128x64xf32>
    %409 = vector.shape_cast %408 : vector<1x128x64xf32> to vector<128x64xf32>
    %cst_427 = arith.constant dense<0.000000e+00> : vector<16x64xf32>
    %410 = tpu.matmul %407, %409, %cst_427 {dimension_numbers = #tpu.dot_dimension_numbers<[1], [0], [0], [1], [0, 0, 1, 1], [], []>} : vector<16x128xf32>, vector<128x64xf32>, vector<16x64xf32> -> vector<16x64xf32>
    %411 = arith.addf %405, %410 : vector<16x64xf32>
    %c3_428 = arith.constant 3 : index
    %c0_429 = arith.constant 0 : index
    %c0_430 = arith.constant 0 : index
    %412 = vector.load %arg20[%c3_428, %c0_429, %c0_430] : memref<8x16x128xf32, #tpu.memory_space<vmem>>, vector<1x16x128xf32>
    %413 = vector.shape_cast %412 : vector<1x16x128xf32> to vector<16x128xf32>
    %c2_431 = arith.constant 2 : index
    %c0_432 = arith.constant 0 : index
    %c0_433 = arith.constant 0 : index
    %414 = vector.load %arg4[%c2_431, %c0_432, %c0_433] : memref<3x128x64xf32, #tpu.memory_space<vmem>>, vector<1x128x64xf32>
    %415 = vector.shape_cast %414 : vector<1x128x64xf32> to vector<128x64xf32>
    %cst_434 = arith.constant dense<0.000000e+00> : vector<16x64xf32>
    %416 = tpu.matmul %413, %415, %cst_434 {dimension_numbers = #tpu.dot_dimension_numbers<[1], [0], [0], [1], [0, 0, 1, 1], [], []>} : vector<16x128xf32>, vector<128x64xf32>, vector<16x64xf32> -> vector<16x64xf32>
    %417 = arith.addf %411, %416 : vector<16x64xf32>
    %c0_435 = arith.constant 0 : index
    %c0_436 = arith.constant 0 : index
    %418 = vector.load %arg12[%c0_435, %c0_436] : memref<1x64xf32, #tpu.memory_space<vmem>>, vector<1x64xf32>
    %419 = vector.broadcast %418 : vector<1x64xf32> to vector<16x64xf32>
    %420 = arith.addf %417, %419 : vector<16x64xf32>
    %cst_437 = arith.constant 0.000000e+00 : f32
    %421 = vector.broadcast %cst_437 : f32 to vector<16x64xf32>
    %422 = arith.maximumf %420, %421 : vector<16x64xf32>
    %c1_438 = arith.constant 1 : index
    %c0_439 = arith.constant 0 : index
    %c0_440 = arith.constant 0 : index
    %423 = vector.load %arg21[%c1_438, %c0_439, %c0_440] : memref<4x16x64xf32, #tpu.memory_space<vmem>>, vector<1x16x64xf32>
    %424 = vector.shape_cast %423 : vector<1x16x64xf32> to vector<16x64xf32>
    %425 = vector.shape_cast %422 : vector<16x64xf32> to vector<1x16x64xf32>
    tpu.vector_store %arg21[%c1_438, %c0_439, %c0_440], %425 {strides = array<i32>} : memref<4x16x64xf32, #tpu.memory_space<vmem>>, vector<1x16x64xf32>,
    %c3_441 = arith.constant 3 : index
    %c0_442 = arith.constant 0 : index
    %c0_443 = arith.constant 0 : index
    %426 = vector.load %arg20[%c3_441, %c0_442, %c0_443] : memref<8x16x128xf32, #tpu.memory_space<vmem>>, vector<1x16x128xf32>
    %427 = vector.shape_cast %426 : vector<1x16x128xf32> to vector<16x128xf32>
    %c0_444 = arith.constant 0 : index
    %c0_445 = arith.constant 0 : index
    %c0_446 = arith.constant 0 : index
    %428 = vector.load %arg4[%c0_444, %c0_445, %c0_446] : memref<3x128x64xf32, #tpu.memory_space<vmem>>, vector<1x128x64xf32>
    %429 = vector.shape_cast %428 : vector<1x128x64xf32> to vector<128x64xf32>
    %cst_447 = arith.constant dense<0.000000e+00> : vector<16x64xf32>
    %430 = tpu.matmul %427, %429, %cst_447 {dimension_numbers = #tpu.dot_dimension_numbers<[1], [0], [0], [1], [0, 0, 1, 1], [], []>} : vector<16x128xf32>, vector<128x64xf32>, vector<16x64xf32> -> vector<16x64xf32>
    %c4_448 = arith.constant 4 : index
    %c0_449 = arith.constant 0 : index
    %c0_450 = arith.constant 0 : index
    %431 = vector.load %arg20[%c4_448, %c0_449, %c0_450] : memref<8x16x128xf32, #tpu.memory_space<vmem>>, vector<1x16x128xf32>
    %432 = vector.shape_cast %431 : vector<1x16x128xf32> to vector<16x128xf32>
    %c1_451 = arith.constant 1 : index
    %c0_452 = arith.constant 0 : index
    %c0_453 = arith.constant 0 : index
    %433 = vector.load %arg4[%c1_451, %c0_452, %c0_453] : memref<3x128x64xf32, #tpu.memory_space<vmem>>, vector<1x128x64xf32>
    %434 = vector.shape_cast %433 : vector<1x128x64xf32> to vector<128x64xf32>
    %cst_454 = arith.constant dense<0.000000e+00> : vector<16x64xf32>
    %435 = tpu.matmul %432, %434, %cst_454 {dimension_numbers = #tpu.dot_dimension_numbers<[1], [0], [0], [1], [0, 0, 1, 1], [], []>} : vector<16x128xf32>, vector<128x64xf32>, vector<16x64xf32> -> vector<16x64xf32>
    %436 = arith.addf %430, %435 : vector<16x64xf32>
    %c5_455 = arith.constant 5 : index
    %c0_456 = arith.constant 0 : index
    %c0_457 = arith.constant 0 : index
    %437 = vector.load %arg20[%c5_455, %c0_456, %c0_457] : memref<8x16x128xf32, #tpu.memory_space<vmem>>, vector<1x16x128xf32>
    %438 = vector.shape_cast %437 : vector<1x16x128xf32> to vector<16x128xf32>
    %c2_458 = arith.constant 2 : index
    %c0_459 = arith.constant 0 : index
    %c0_460 = arith.constant 0 : index
    %439 = vector.load %arg4[%c2_458, %c0_459, %c0_460] : memref<3x128x64xf32, #tpu.memory_space<vmem>>, vector<1x128x64xf32>
    %440 = vector.shape_cast %439 : vector<1x128x64xf32> to vector<128x64xf32>
    %cst_461 = arith.constant dense<0.000000e+00> : vector<16x64xf32>
    %441 = tpu.matmul %438, %440, %cst_461 {dimension_numbers = #tpu.dot_dimension_numbers<[1], [0], [0], [1], [0, 0, 1, 1], [], []>} : vector<16x128xf32>, vector<128x64xf32>, vector<16x64xf32> -> vector<16x64xf32>
    %442 = arith.addf %436, %441 : vector<16x64xf32>
    %c0_462 = arith.constant 0 : index
    %c0_463 = arith.constant 0 : index
    %443 = vector.load %arg12[%c0_462, %c0_463] : memref<1x64xf32, #tpu.memory_space<vmem>>, vector<1x64xf32>
    %444 = vector.broadcast %443 : vector<1x64xf32> to vector<16x64xf32>
    %445 = arith.addf %442, %444 : vector<16x64xf32>
    %cst_464 = arith.constant 0.000000e+00 : f32
    %446 = vector.broadcast %cst_464 : f32 to vector<16x64xf32>
    %447 = arith.maximumf %445, %446 : vector<16x64xf32>
    %c2_465 = arith.constant 2 : index
    %c0_466 = arith.constant 0 : index
    %c0_467 = arith.constant 0 : index
    %448 = vector.load %arg21[%c2_465, %c0_466, %c0_467] : memref<4x16x64xf32, #tpu.memory_space<vmem>>, vector<1x16x64xf32>
    %449 = vector.shape_cast %448 : vector<1x16x64xf32> to vector<16x64xf32>
    %450 = vector.shape_cast %447 : vector<16x64xf32> to vector<1x16x64xf32>
    tpu.vector_store %arg21[%c2_465, %c0_466, %c0_467], %450 {strides = array<i32>} : memref<4x16x64xf32, #tpu.memory_space<vmem>>, vector<1x16x64xf32>,
    %c5_468 = arith.constant 5 : index
    %c0_469 = arith.constant 0 : index
    %c0_470 = arith.constant 0 : index
    %451 = vector.load %arg20[%c5_468, %c0_469, %c0_470] : memref<8x16x128xf32, #tpu.memory_space<vmem>>, vector<1x16x128xf32>
    %452 = vector.shape_cast %451 : vector<1x16x128xf32> to vector<16x128xf32>
    %c0_471 = arith.constant 0 : index
    %c0_472 = arith.constant 0 : index
    %c0_473 = arith.constant 0 : index
    %453 = vector.load %arg4[%c0_471, %c0_472, %c0_473] : memref<3x128x64xf32, #tpu.memory_space<vmem>>, vector<1x128x64xf32>
    %454 = vector.shape_cast %453 : vector<1x128x64xf32> to vector<128x64xf32>
    %cst_474 = arith.constant dense<0.000000e+00> : vector<16x64xf32>
    %455 = tpu.matmul %452, %454, %cst_474 {dimension_numbers = #tpu.dot_dimension_numbers<[1], [0], [0], [1], [0, 0, 1, 1], [], []>} : vector<16x128xf32>, vector<128x64xf32>, vector<16x64xf32> -> vector<16x64xf32>
    %c6_475 = arith.constant 6 : index
    %c0_476 = arith.constant 0 : index
    %c0_477 = arith.constant 0 : index
    %456 = vector.load %arg20[%c6_475, %c0_476, %c0_477] : memref<8x16x128xf32, #tpu.memory_space<vmem>>, vector<1x16x128xf32>
    %457 = vector.shape_cast %456 : vector<1x16x128xf32> to vector<16x128xf32>
    %c1_478 = arith.constant 1 : index
    %c0_479 = arith.constant 0 : index
    %c0_480 = arith.constant 0 : index
    %458 = vector.load %arg4[%c1_478, %c0_479, %c0_480] : memref<3x128x64xf32, #tpu.memory_space<vmem>>, vector<1x128x64xf32>
    %459 = vector.shape_cast %458 : vector<1x128x64xf32> to vector<128x64xf32>
    %cst_481 = arith.constant dense<0.000000e+00> : vector<16x64xf32>
    %460 = tpu.matmul %457, %459, %cst_481 {dimension_numbers = #tpu.dot_dimension_numbers<[1], [0], [0], [1], [0, 0, 1, 1], [], []>} : vector<16x128xf32>, vector<128x64xf32>, vector<16x64xf32> -> vector<16x64xf32>
    %461 = arith.addf %455, %460 : vector<16x64xf32>
    %c7_482 = arith.constant 7 : index
    %c0_483 = arith.constant 0 : index
    %c0_484 = arith.constant 0 : index
    %462 = vector.load %arg20[%c7_482, %c0_483, %c0_484] : memref<8x16x128xf32, #tpu.memory_space<vmem>>, vector<1x16x128xf32>
    %463 = vector.shape_cast %462 : vector<1x16x128xf32> to vector<16x128xf32>
    %c2_485 = arith.constant 2 : index
    %c0_486 = arith.constant 0 : index
    %c0_487 = arith.constant 0 : index
    %464 = vector.load %arg4[%c2_485, %c0_486, %c0_487] : memref<3x128x64xf32, #tpu.memory_space<vmem>>, vector<1x128x64xf32>
    %465 = vector.shape_cast %464 : vector<1x128x64xf32> to vector<128x64xf32>
    %cst_488 = arith.constant dense<0.000000e+00> : vector<16x64xf32>
    %466 = tpu.matmul %463, %465, %cst_488 {dimension_numbers = #tpu.dot_dimension_numbers<[1], [0], [0], [1], [0, 0, 1, 1], [], []>} : vector<16x128xf32>, vector<128x64xf32>, vector<16x64xf32> -> vector<16x64xf32>
    %467 = arith.addf %461, %466 : vector<16x64xf32>
    %c0_489 = arith.constant 0 : index
    %c0_490 = arith.constant 0 : index
    %468 = vector.load %arg12[%c0_489, %c0_490] : memref<1x64xf32, #tpu.memory_space<vmem>>, vector<1x64xf32>
    %469 = vector.broadcast %468 : vector<1x64xf32> to vector<16x64xf32>
    %470 = arith.addf %467, %469 : vector<16x64xf32>
    %cst_491 = arith.constant 0.000000e+00 : f32
    %471 = vector.broadcast %cst_491 : f32 to vector<16x64xf32>
    %472 = arith.maximumf %470, %471 : vector<16x64xf32>
    %c3_492 = arith.constant 3 : index
    %c0_493 = arith.constant 0 : index
    %c0_494 = arith.constant 0 : index
    %473 = vector.load %arg21[%c3_492, %c0_493, %c0_494] : memref<4x16x64xf32, #tpu.memory_space<vmem>>, vector<1x16x64xf32>
    %474 = vector.shape_cast %473 : vector<1x16x64xf32> to vector<16x64xf32>
    %475 = vector.shape_cast %472 : vector<16x64xf32> to vector<1x16x64xf32>
    tpu.vector_store %arg21[%c3_492, %c0_493, %c0_494], %475 {strides = array<i32>} : memref<4x16x64xf32, #tpu.memory_space<vmem>>, vector<1x16x64xf32>,
    %c0_495 = arith.constant 0 : index
    %c0_496 = arith.constant 0 : index
    %c0_497 = arith.constant 0 : index
    %476 = vector.load %arg21[%c0_495, %c0_496, %c0_497] : memref<4x16x64xf32, #tpu.memory_space<vmem>>, vector<1x16x64xf32>
    %477 = vector.shape_cast %476 : vector<1x16x64xf32> to vector<16x64xf32>
    %c1_498 = arith.constant 1 : index
    %c0_499 = arith.constant 0 : index
    %c0_500 = arith.constant 0 : index
    %478 = vector.load %arg5[%c1_498, %c0_499, %c0_500] : memref<3x64x64xf32, #tpu.memory_space<vmem>>, vector<1x64x64xf32>
    %479 = vector.shape_cast %478 : vector<1x64x64xf32> to vector<64x64xf32>
    %cst_501 = arith.constant dense<0.000000e+00> : vector<16x64xf32>
    %480 = tpu.matmul %477, %479, %cst_501 {dimension_numbers = #tpu.dot_dimension_numbers<[1], [0], [0], [1], [0, 0, 1, 1], [], []>} : vector<16x64xf32>, vector<64x64xf32>, vector<16x64xf32> -> vector<16x64xf32>
    %c1_502 = arith.constant 1 : index
    %c0_503 = arith.constant 0 : index
    %c0_504 = arith.constant 0 : index
    %481 = vector.load %arg21[%c1_502, %c0_503, %c0_504] : memref<4x16x64xf32, #tpu.memory_space<vmem>>, vector<1x16x64xf32>
    %482 = vector.shape_cast %481 : vector<1x16x64xf32> to vector<16x64xf32>
    %c2_505 = arith.constant 2 : index
    %c0_506 = arith.constant 0 : index
    %c0_507 = arith.constant 0 : index
    %483 = vector.load %arg5[%c2_505, %c0_506, %c0_507] : memref<3x64x64xf32, #tpu.memory_space<vmem>>, vector<1x64x64xf32>
    %484 = vector.shape_cast %483 : vector<1x64x64xf32> to vector<64x64xf32>
    %cst_508 = arith.constant dense<0.000000e+00> : vector<16x64xf32>
    %485 = tpu.matmul %482, %484, %cst_508 {dimension_numbers = #tpu.dot_dimension_numbers<[1], [0], [0], [1], [0, 0, 1, 1], [], []>} : vector<16x64xf32>, vector<64x64xf32>, vector<16x64xf32> -> vector<16x64xf32>
    %486 = arith.addf %480, %485 : vector<16x64xf32>
    %c0_509 = arith.constant 0 : index
    %c0_510 = arith.constant 0 : index
    %487 = vector.load %arg13[%c0_509, %c0_510] : memref<1x64xf32, #tpu.memory_space<vmem>>, vector<1x64xf32>
    %488 = vector.broadcast %487 : vector<1x64xf32> to vector<16x64xf32>
    %489 = arith.addf %486, %488 : vector<16x64xf32>
    %cst_511 = arith.constant 0.000000e+00 : f32
    %490 = vector.broadcast %cst_511 : f32 to vector<16x64xf32>
    %491 = arith.maximumf %489, %490 : vector<16x64xf32>
    %c0_512 = arith.constant 0 : index
    %c0_513 = arith.constant 0 : index
    %c0_514 = arith.constant 0 : index
    %492 = vector.load %arg22[%c0_512, %c0_513, %c0_514] : memref<4x16x64xf32, #tpu.memory_space<vmem>>, vector<1x16x64xf32>
    %493 = vector.shape_cast %492 : vector<1x16x64xf32> to vector<16x64xf32>
    %494 = vector.shape_cast %491 : vector<16x64xf32> to vector<1x16x64xf32>
    tpu.vector_store %arg22[%c0_512, %c0_513, %c0_514], %494 {strides = array<i32>} : memref<4x16x64xf32, #tpu.memory_space<vmem>>, vector<1x16x64xf32>,
    %c0_515 = arith.constant 0 : index
    %c0_516 = arith.constant 0 : index
    %c0_517 = arith.constant 0 : index
    %495 = vector.load %arg21[%c0_515, %c0_516, %c0_517] : memref<4x16x64xf32, #tpu.memory_space<vmem>>, vector<1x16x64xf32>
    %496 = vector.shape_cast %495 : vector<1x16x64xf32> to vector<16x64xf32>
    %c0_518 = arith.constant 0 : index
    %c0_519 = arith.constant 0 : index
    %c0_520 = arith.constant 0 : index
    %497 = vector.load %arg5[%c0_518, %c0_519, %c0_520] : memref<3x64x64xf32, #tpu.memory_space<vmem>>, vector<1x64x64xf32>
    %498 = vector.shape_cast %497 : vector<1x64x64xf32> to vector<64x64xf32>
    %cst_521 = arith.constant dense<0.000000e+00> : vector<16x64xf32>
    %499 = tpu.matmul %496, %498, %cst_521 {dimension_numbers = #tpu.dot_dimension_numbers<[1], [0], [0], [1], [0, 0, 1, 1], [], []>} : vector<16x64xf32>, vector<64x64xf32>, vector<16x64xf32> -> vector<16x64xf32>
    %c1_522 = arith.constant 1 : index
    %c0_523 = arith.constant 0 : index
    %c0_524 = arith.constant 0 : index
    %500 = vector.load %arg21[%c1_522, %c0_523, %c0_524] : memref<4x16x64xf32, #tpu.memory_space<vmem>>, vector<1x16x64xf32>
    %501 = vector.shape_cast %500 : vector<1x16x64xf32> to vector<16x64xf32>
    %c1_525 = arith.constant 1 : index
    %c0_526 = arith.constant 0 : index
    %c0_527 = arith.constant 0 : index
    %502 = vector.load %arg5[%c1_525, %c0_526, %c0_527] : memref<3x64x64xf32, #tpu.memory_space<vmem>>, vector<1x64x64xf32>
    %503 = vector.shape_cast %502 : vector<1x64x64xf32> to vector<64x64xf32>
    %cst_528 = arith.constant dense<0.000000e+00> : vector<16x64xf32>
    %504 = tpu.matmul %501, %503, %cst_528 {dimension_numbers = #tpu.dot_dimension_numbers<[1], [0], [0], [1], [0, 0, 1, 1], [], []>} : vector<16x64xf32>, vector<64x64xf32>, vector<16x64xf32> -> vector<16x64xf32>
    %505 = arith.addf %499, %504 : vector<16x64xf32>
    %c2_529 = arith.constant 2 : index
    %c0_530 = arith.constant 0 : index
    %c0_531 = arith.constant 0 : index
    %506 = vector.load %arg21[%c2_529, %c0_530, %c0_531] : memref<4x16x64xf32, #tpu.memory_space<vmem>>, vector<1x16x64xf32>
    %507 = vector.shape_cast %506 : vector<1x16x64xf32> to vector<16x64xf32>
    %c2_532 = arith.constant 2 : index
    %c0_533 = arith.constant 0 : index
    %c0_534 = arith.constant 0 : index
    %508 = vector.load %arg5[%c2_532, %c0_533, %c0_534] : memref<3x64x64xf32, #tpu.memory_space<vmem>>, vector<1x64x64xf32>
    %509 = vector.shape_cast %508 : vector<1x64x64xf32> to vector<64x64xf32>
    %cst_535 = arith.constant dense<0.000000e+00> : vector<16x64xf32>
    %510 = tpu.matmul %507, %509, %cst_535 {dimension_numbers = #tpu.dot_dimension_numbers<[1], [0], [0], [1], [0, 0, 1, 1], [], []>} : vector<16x64xf32>, vector<64x64xf32>, vector<16x64xf32> -> vector<16x64xf32>
    %511 = arith.addf %505, %510 : vector<16x64xf32>
    %c0_536 = arith.constant 0 : index
    %c0_537 = arith.constant 0 : index
    %512 = vector.load %arg13[%c0_536, %c0_537] : memref<1x64xf32, #tpu.memory_space<vmem>>, vector<1x64xf32>
    %513 = vector.broadcast %512 : vector<1x64xf32> to vector<16x64xf32>
    %514 = arith.addf %511, %513 : vector<16x64xf32>
    %cst_538 = arith.constant 0.000000e+00 : f32
    %515 = vector.broadcast %cst_538 : f32 to vector<16x64xf32>
    %516 = arith.maximumf %514, %515 : vector<16x64xf32>
    %c1_539 = arith.constant 1 : index
    %c0_540 = arith.constant 0 : index
    %c0_541 = arith.constant 0 : index
    %517 = vector.load %arg22[%c1_539, %c0_540, %c0_541] : memref<4x16x64xf32, #tpu.memory_space<vmem>>, vector<1x16x64xf32>
    %518 = vector.shape_cast %517 : vector<1x16x64xf32> to vector<16x64xf32>
    %519 = vector.shape_cast %516 : vector<16x64xf32> to vector<1x16x64xf32>
    tpu.vector_store %arg22[%c1_539, %c0_540, %c0_541], %519 {strides = array<i32>} : memref<4x16x64xf32, #tpu.memory_space<vmem>>, vector<1x16x64xf32>,
    %c1_542 = arith.constant 1 : index
    %c0_543 = arith.constant 0 : index
    %c0_544 = arith.constant 0 : index
    %520 = vector.load %arg21[%c1_542, %c0_543, %c0_544] : memref<4x16x64xf32, #tpu.memory_space<vmem>>, vector<1x16x64xf32>
    %521 = vector.shape_cast %520 : vector<1x16x64xf32> to vector<16x64xf32>
    %c0_545 = arith.constant 0 : index
    %c0_546 = arith.constant 0 : index
    %c0_547 = arith.constant 0 : index
    %522 = vector.load %arg5[%c0_545, %c0_546, %c0_547] : memref<3x64x64xf32, #tpu.memory_space<vmem>>, vector<1x64x64xf32>
    %523 = vector.shape_cast %522 : vector<1x64x64xf32> to vector<64x64xf32>
    %cst_548 = arith.constant dense<0.000000e+00> : vector<16x64xf32>
    %524 = tpu.matmul %521, %523, %cst_548 {dimension_numbers = #tpu.dot_dimension_numbers<[1], [0], [0], [1], [0, 0, 1, 1], [], []>} : vector<16x64xf32>, vector<64x64xf32>, vector<16x64xf32> -> vector<16x64xf32>
    %c2_549 = arith.constant 2 : index
    %c0_550 = arith.constant 0 : index
    %c0_551 = arith.constant 0 : index
    %525 = vector.load %arg21[%c2_549, %c0_550, %c0_551] : memref<4x16x64xf32, #tpu.memory_space<vmem>>, vector<1x16x64xf32>
    %526 = vector.shape_cast %525 : vector<1x16x64xf32> to vector<16x64xf32>
    %c1_552 = arith.constant 1 : index
    %c0_553 = arith.constant 0 : index
    %c0_554 = arith.constant 0 : index
    %527 = vector.load %arg5[%c1_552, %c0_553, %c0_554] : memref<3x64x64xf32, #tpu.memory_space<vmem>>, vector<1x64x64xf32>
    %528 = vector.shape_cast %527 : vector<1x64x64xf32> to vector<64x64xf32>
    %cst_555 = arith.constant dense<0.000000e+00> : vector<16x64xf32>
    %529 = tpu.matmul %526, %528, %cst_555 {dimension_numbers = #tpu.dot_dimension_numbers<[1], [0], [0], [1], [0, 0, 1, 1], [], []>} : vector<16x64xf32>, vector<64x64xf32>, vector<16x64xf32> -> vector<16x64xf32>
    %530 = arith.addf %524, %529 : vector<16x64xf32>
    %c3_556 = arith.constant 3 : index
    %c0_557 = arith.constant 0 : index
    %c0_558 = arith.constant 0 : index
    %531 = vector.load %arg21[%c3_556, %c0_557, %c0_558] : memref<4x16x64xf32, #tpu.memory_space<vmem>>, vector<1x16x64xf32>
    %532 = vector.shape_cast %531 : vector<1x16x64xf32> to vector<16x64xf32>
    %c2_559 = arith.constant 2 : index
    %c0_560 = arith.constant 0 : index
    %c0_561 = arith.constant 0 : index
    %533 = vector.load %arg5[%c2_559, %c0_560, %c0_561] : memref<3x64x64xf32, #tpu.memory_space<vmem>>, vector<1x64x64xf32>
    %534 = vector.shape_cast %533 : vector<1x64x64xf32> to vector<64x64xf32>
    %cst_562 = arith.constant dense<0.000000e+00> : vector<16x64xf32>
    %535 = tpu.matmul %532, %534, %cst_562 {dimension_numbers = #tpu.dot_dimension_numbers<[1], [0], [0], [1], [0, 0, 1, 1], [], []>} : vector<16x64xf32>, vector<64x64xf32>, vector<16x64xf32> -> vector<16x64xf32>
    %536 = arith.addf %530, %535 : vector<16x64xf32>
    %c0_563 = arith.constant 0 : index
    %c0_564 = arith.constant 0 : index
    %537 = vector.load %arg13[%c0_563, %c0_564] : memref<1x64xf32, #tpu.memory_space<vmem>>, vector<1x64xf32>
    %538 = vector.broadcast %537 : vector<1x64xf32> to vector<16x64xf32>
    %539 = arith.addf %536, %538 : vector<16x64xf32>
    %cst_565 = arith.constant 0.000000e+00 : f32
    %540 = vector.broadcast %cst_565 : f32 to vector<16x64xf32>
    %541 = arith.maximumf %539, %540 : vector<16x64xf32>
    %c2_566 = arith.constant 2 : index
    %c0_567 = arith.constant 0 : index
    %c0_568 = arith.constant 0 : index
    %542 = vector.load %arg22[%c2_566, %c0_567, %c0_568] : memref<4x16x64xf32, #tpu.memory_space<vmem>>, vector<1x16x64xf32>
    %543 = vector.shape_cast %542 : vector<1x16x64xf32> to vector<16x64xf32>
    %544 = vector.shape_cast %541 : vector<16x64xf32> to vector<1x16x64xf32>
    tpu.vector_store %arg22[%c2_566, %c0_567, %c0_568], %544 {strides = array<i32>} : memref<4x16x64xf32, #tpu.memory_space<vmem>>, vector<1x16x64xf32>,
    %c2_569 = arith.constant 2 : index
    %c0_570 = arith.constant 0 : index
    %c0_571 = arith.constant 0 : index
    %545 = vector.load %arg21[%c2_569, %c0_570, %c0_571] : memref<4x16x64xf32, #tpu.memory_space<vmem>>, vector<1x16x64xf32>
    %546 = vector.shape_cast %545 : vector<1x16x64xf32> to vector<16x64xf32>
    %c0_572 = arith.constant 0 : index
    %c0_573 = arith.constant 0 : index
    %c0_574 = arith.constant 0 : index
    %547 = vector.load %arg5[%c0_572, %c0_573, %c0_574] : memref<3x64x64xf32, #tpu.memory_space<vmem>>, vector<1x64x64xf32>
    %548 = vector.shape_cast %547 : vector<1x64x64xf32> to vector<64x64xf32>
    %cst_575 = arith.constant dense<0.000000e+00> : vector<16x64xf32>
    %549 = tpu.matmul %546, %548, %cst_575 {dimension_numbers = #tpu.dot_dimension_numbers<[1], [0], [0], [1], [0, 0, 1, 1], [], []>} : vector<16x64xf32>, vector<64x64xf32>, vector<16x64xf32> -> vector<16x64xf32>
    %c3_576 = arith.constant 3 : index
    %c0_577 = arith.constant 0 : index
    %c0_578 = arith.constant 0 : index
    %550 = vector.load %arg21[%c3_576, %c0_577, %c0_578] : memref<4x16x64xf32, #tpu.memory_space<vmem>>, vector<1x16x64xf32>
    %551 = vector.shape_cast %550 : vector<1x16x64xf32> to vector<16x64xf32>
    %c1_579 = arith.constant 1 : index
    %c0_580 = arith.constant 0 : index
    %c0_581 = arith.constant 0 : index
    %552 = vector.load %arg5[%c1_579, %c0_580, %c0_581] : memref<3x64x64xf32, #tpu.memory_space<vmem>>, vector<1x64x64xf32>
    %553 = vector.shape_cast %552 : vector<1x64x64xf32> to vector<64x64xf32>
    %cst_582 = arith.constant dense<0.000000e+00> : vector<16x64xf32>
    %554 = tpu.matmul %551, %553, %cst_582 {dimension_numbers = #tpu.dot_dimension_numbers<[1], [0], [0], [1], [0, 0, 1, 1], [], []>} : vector<16x64xf32>, vector<64x64xf32>, vector<16x64xf32> -> vector<16x64xf32>
    %555 = arith.addf %549, %554 : vector<16x64xf32>
    %c0_583 = arith.constant 0 : index
    %c0_584 = arith.constant 0 : index
    %556 = vector.load %arg13[%c0_583, %c0_584] : memref<1x64xf32, #tpu.memory_space<vmem>>, vector<1x64xf32>
    %557 = vector.broadcast %556 : vector<1x64xf32> to vector<16x64xf32>
    %558 = arith.addf %555, %557 : vector<16x64xf32>
    %cst_585 = arith.constant 0.000000e+00 : f32
    %559 = vector.broadcast %cst_585 : f32 to vector<16x64xf32>
    %560 = arith.maximumf %558, %559 : vector<16x64xf32>
    %c3_586 = arith.constant 3 : index
    %c0_587 = arith.constant 0 : index
    %c0_588 = arith.constant 0 : index
    %561 = vector.load %arg22[%c3_586, %c0_587, %c0_588] : memref<4x16x64xf32, #tpu.memory_space<vmem>>, vector<1x16x64xf32>
    %562 = vector.shape_cast %561 : vector<1x16x64xf32> to vector<16x64xf32>
    %563 = vector.shape_cast %560 : vector<16x64xf32> to vector<1x16x64xf32>
    tpu.vector_store %arg22[%c3_586, %c0_587, %c0_588], %563 {strides = array<i32>} : memref<4x16x64xf32, #tpu.memory_space<vmem>>, vector<1x16x64xf32>,
    %c0_589 = arith.constant 0 : index
    %c0_590 = arith.constant 0 : index
    %c0_591 = arith.constant 0 : index
    %564 = vector.load %arg22[%c0_589, %c0_590, %c0_591] : memref<4x16x64xf32, #tpu.memory_space<vmem>>, vector<1x16x64xf32>
    %565 = vector.shape_cast %564 : vector<1x16x64xf32> to vector<16x64xf32>
    %c1_592 = arith.constant 1 : index
    %c0_593 = arith.constant 0 : index
    %c0_594 = arith.constant 0 : index
    %566 = vector.load %arg6[%c1_592, %c0_593, %c0_594] : memref<3x64x64xf32, #tpu.memory_space<vmem>>, vector<1x64x64xf32>
    %567 = vector.shape_cast %566 : vector<1x64x64xf32> to vector<64x64xf32>
    %cst_595 = arith.constant dense<0.000000e+00> : vector<16x64xf32>
    %568 = tpu.matmul %565, %567, %cst_595 {dimension_numbers = #tpu.dot_dimension_numbers<[1], [0], [0], [1], [0, 0, 1, 1], [], []>} : vector<16x64xf32>, vector<64x64xf32>, vector<16x64xf32> -> vector<16x64xf32>
    %c1_596 = arith.constant 1 : index
    %c0_597 = arith.constant 0 : index
    %c0_598 = arith.constant 0 : index
    %569 = vector.load %arg22[%c1_596, %c0_597, %c0_598] : memref<4x16x64xf32, #tpu.memory_space<vmem>>, vector<1x16x64xf32>
    %570 = vector.shape_cast %569 : vector<1x16x64xf32> to vector<16x64xf32>
    %c2_599 = arith.constant 2 : index
    %c0_600 = arith.constant 0 : index
    %c0_601 = arith.constant 0 : index
    %571 = vector.load %arg6[%c2_599, %c0_600, %c0_601] : memref<3x64x64xf32, #tpu.memory_space<vmem>>, vector<1x64x64xf32>
    %572 = vector.shape_cast %571 : vector<1x64x64xf32> to vector<64x64xf32>
    %cst_602 = arith.constant dense<0.000000e+00> : vector<16x64xf32>
    %573 = tpu.matmul %570, %572, %cst_602 {dimension_numbers = #tpu.dot_dimension_numbers<[1], [0], [0], [1], [0, 0, 1, 1], [], []>} : vector<16x64xf32>, vector<64x64xf32>, vector<16x64xf32> -> vector<16x64xf32>
    %574 = arith.addf %568, %573 : vector<16x64xf32>
    %c0_603 = arith.constant 0 : index
    %c0_604 = arith.constant 0 : index
    %575 = vector.load %arg14[%c0_603, %c0_604] : memref<1x64xf32, #tpu.memory_space<vmem>>, vector<1x64xf32>
    %576 = vector.broadcast %575 : vector<1x64xf32> to vector<16x64xf32>
    %577 = arith.addf %574, %576 : vector<16x64xf32>
    %cst_605 = arith.constant 0.000000e+00 : f32
    %578 = vector.broadcast %cst_605 : f32 to vector<16x64xf32>
    %579 = arith.maximumf %577, %578 : vector<16x64xf32>
    %c0_606 = arith.constant 0 : index
    %c0_607 = arith.constant 0 : index
    %c0_608 = arith.constant 0 : index
    %580 = vector.load %arg23[%c0_606, %c0_607, %c0_608] : memref<2x16x64xf32, #tpu.memory_space<vmem>>, vector<1x16x64xf32>
    %581 = vector.shape_cast %580 : vector<1x16x64xf32> to vector<16x64xf32>
    %582 = vector.shape_cast %579 : vector<16x64xf32> to vector<1x16x64xf32>
    tpu.vector_store %arg23[%c0_606, %c0_607, %c0_608], %582 {strides = array<i32>} : memref<2x16x64xf32, #tpu.memory_space<vmem>>, vector<1x16x64xf32>,
    %c1_609 = arith.constant 1 : index
    %c0_610 = arith.constant 0 : index
    %c0_611 = arith.constant 0 : index
    %583 = vector.load %arg22[%c1_609, %c0_610, %c0_611] : memref<4x16x64xf32, #tpu.memory_space<vmem>>, vector<1x16x64xf32>
    %584 = vector.shape_cast %583 : vector<1x16x64xf32> to vector<16x64xf32>
    %c0_612 = arith.constant 0 : index
    %c0_613 = arith.constant 0 : index
    %c0_614 = arith.constant 0 : index
    %585 = vector.load %arg6[%c0_612, %c0_613, %c0_614] : memref<3x64x64xf32, #tpu.memory_space<vmem>>, vector<1x64x64xf32>
    %586 = vector.shape_cast %585 : vector<1x64x64xf32> to vector<64x64xf32>
    %cst_615 = arith.constant dense<0.000000e+00> : vector<16x64xf32>
    %587 = tpu.matmul %584, %586, %cst_615 {dimension_numbers = #tpu.dot_dimension_numbers<[1], [0], [0], [1], [0, 0, 1, 1], [], []>} : vector<16x64xf32>, vector<64x64xf32>, vector<16x64xf32> -> vector<16x64xf32>
    %c2_616 = arith.constant 2 : index
    %c0_617 = arith.constant 0 : index
    %c0_618 = arith.constant 0 : index
    %588 = vector.load %arg22[%c2_616, %c0_617, %c0_618] : memref<4x16x64xf32, #tpu.memory_space<vmem>>, vector<1x16x64xf32>
    %589 = vector.shape_cast %588 : vector<1x16x64xf32> to vector<16x64xf32>
    %c1_619 = arith.constant 1 : index
    %c0_620 = arith.constant 0 : index
    %c0_621 = arith.constant 0 : index
    %590 = vector.load %arg6[%c1_619, %c0_620, %c0_621] : memref<3x64x64xf32, #tpu.memory_space<vmem>>, vector<1x64x64xf32>
    %591 = vector.shape_cast %590 : vector<1x64x64xf32> to vector<64x64xf32>
    %cst_622 = arith.constant dense<0.000000e+00> : vector<16x64xf32>
    %592 = tpu.matmul %589, %591, %cst_622 {dimension_numbers = #tpu.dot_dimension_numbers<[1], [0], [0], [1], [0, 0, 1, 1], [], []>} : vector<16x64xf32>, vector<64x64xf32>, vector<16x64xf32> -> vector<16x64xf32>
    %593 = arith.addf %587, %592 : vector<16x64xf32>
    %c3_623 = arith.constant 3 : index
    %c0_624 = arith.constant 0 : index
    %c0_625 = arith.constant 0 : index
    %594 = vector.load %arg22[%c3_623, %c0_624, %c0_625] : memref<4x16x64xf32, #tpu.memory_space<vmem>>, vector<1x16x64xf32>
    %595 = vector.shape_cast %594 : vector<1x16x64xf32> to vector<16x64xf32>
    %c2_626 = arith.constant 2 : index
    %c0_627 = arith.constant 0 : index
    %c0_628 = arith.constant 0 : index
    %596 = vector.load %arg6[%c2_626, %c0_627, %c0_628] : memref<3x64x64xf32, #tpu.memory_space<vmem>>, vector<1x64x64xf32>
    %597 = vector.shape_cast %596 : vector<1x64x64xf32> to vector<64x64xf32>
    %cst_629 = arith.constant dense<0.000000e+00> : vector<16x64xf32>
    %598 = tpu.matmul %595, %597, %cst_629 {dimension_numbers = #tpu.dot_dimension_numbers<[1], [0], [0], [1], [0, 0, 1, 1], [], []>} : vector<16x64xf32>, vector<64x64xf32>, vector<16x64xf32> -> vector<16x64xf32>
    %599 = arith.addf %593, %598 : vector<16x64xf32>
    %c0_630 = arith.constant 0 : index
    %c0_631 = arith.constant 0 : index
    %600 = vector.load %arg14[%c0_630, %c0_631] : memref<1x64xf32, #tpu.memory_space<vmem>>, vector<1x64xf32>
    %601 = vector.broadcast %600 : vector<1x64xf32> to vector<16x64xf32>
    %602 = arith.addf %599, %601 : vector<16x64xf32>
    %cst_632 = arith.constant 0.000000e+00 : f32
    %603 = vector.broadcast %cst_632 : f32 to vector<16x64xf32>
    %604 = arith.maximumf %602, %603 : vector<16x64xf32>
    %c1_633 = arith.constant 1 : index
    %c0_634 = arith.constant 0 : index
    %c0_635 = arith.constant 0 : index
    %605 = vector.load %arg23[%c1_633, %c0_634, %c0_635] : memref<2x16x64xf32, #tpu.memory_space<vmem>>, vector<1x16x64xf32>
    %606 = vector.shape_cast %605 : vector<1x16x64xf32> to vector<16x64xf32>
    %607 = vector.shape_cast %604 : vector<16x64xf32> to vector<1x16x64xf32>
    tpu.vector_store %arg23[%c1_633, %c0_634, %c0_635], %607 {strides = array<i32>} : memref<2x16x64xf32, #tpu.memory_space<vmem>>, vector<1x16x64xf32>,
    %c0_636 = arith.constant 0 : index
    %c0_637 = arith.constant 0 : index
    %c0_638 = arith.constant 0 : index
    %608 = vector.load %arg23[%c0_636, %c0_637, %c0_638] : memref<2x16x64xf32, #tpu.memory_space<vmem>>, vector<1x16x64xf32>
    %609 = vector.shape_cast %608 : vector<1x16x64xf32> to vector<16x64xf32>
    %c1_639 = arith.constant 1 : index
    %c0_640 = arith.constant 0 : index
    %c0_641 = arith.constant 0 : index
    %610 = vector.load %arg7[%c1_639, %c0_640, %c0_641] : memref<3x64x64xf32, #tpu.memory_space<vmem>>, vector<1x64x64xf32>
    %611 = vector.shape_cast %610 : vector<1x64x64xf32> to vector<64x64xf32>
    %cst_642 = arith.constant dense<0.000000e+00> : vector<16x64xf32>
    %612 = tpu.matmul %609, %611, %cst_642 {dimension_numbers = #tpu.dot_dimension_numbers<[1], [0], [0], [1], [0, 0, 1, 1], [], []>} : vector<16x64xf32>, vector<64x64xf32>, vector<16x64xf32> -> vector<16x64xf32>
    %c1_643 = arith.constant 1 : index
    %c0_644 = arith.constant 0 : index
    %c0_645 = arith.constant 0 : index
    %613 = vector.load %arg23[%c1_643, %c0_644, %c0_645] : memref<2x16x64xf32, #tpu.memory_space<vmem>>, vector<1x16x64xf32>
    %614 = vector.shape_cast %613 : vector<1x16x64xf32> to vector<16x64xf32>
    %c2_646 = arith.constant 2 : index
    %c0_647 = arith.constant 0 : index
    %c0_648 = arith.constant 0 : index
    %615 = vector.load %arg7[%c2_646, %c0_647, %c0_648] : memref<3x64x64xf32, #tpu.memory_space<vmem>>, vector<1x64x64xf32>
    %616 = vector.shape_cast %615 : vector<1x64x64xf32> to vector<64x64xf32>
    %cst_649 = arith.constant dense<0.000000e+00> : vector<16x64xf32>
    %617 = tpu.matmul %614, %616, %cst_649 {dimension_numbers = #tpu.dot_dimension_numbers<[1], [0], [0], [1], [0, 0, 1, 1], [], []>} : vector<16x64xf32>, vector<64x64xf32>, vector<16x64xf32> -> vector<16x64xf32>
    %618 = arith.addf %612, %617 : vector<16x64xf32>
    %c0_650 = arith.constant 0 : index
    %c0_651 = arith.constant 0 : index
    %619 = vector.load %arg15[%c0_650, %c0_651] : memref<1x64xf32, #tpu.memory_space<vmem>>, vector<1x64xf32>
    %620 = vector.broadcast %619 : vector<1x64xf32> to vector<16x64xf32>
    %621 = arith.addf %618, %620 : vector<16x64xf32>
    %cst_652 = arith.constant 0.000000e+00 : f32
    %622 = vector.broadcast %cst_652 : f32 to vector<16x64xf32>
    %623 = arith.maximumf %621, %622 : vector<16x64xf32>
    %c0_653 = arith.constant 0 : index
    %c0_654 = arith.constant 0 : index
    %c0_655 = arith.constant 0 : index
    %624 = vector.load %arg24[%c0_653, %c0_654, %c0_655] : memref<2x16x64xf32, #tpu.memory_space<vmem>>, vector<1x16x64xf32>
    %625 = vector.shape_cast %624 : vector<1x16x64xf32> to vector<16x64xf32>
    %626 = vector.shape_cast %623 : vector<16x64xf32> to vector<1x16x64xf32>
    tpu.vector_store %arg24[%c0_653, %c0_654, %c0_655], %626 {strides = array<i32>} : memref<2x16x64xf32, #tpu.memory_space<vmem>>, vector<1x16x64xf32>,
    %c0_656 = arith.constant 0 : index
    %c0_657 = arith.constant 0 : index
    %c0_658 = arith.constant 0 : index
    %627 = vector.load %arg23[%c0_656, %c0_657, %c0_658] : memref<2x16x64xf32, #tpu.memory_space<vmem>>, vector<1x16x64xf32>
    %628 = vector.shape_cast %627 : vector<1x16x64xf32> to vector<16x64xf32>
    %c0_659 = arith.constant 0 : index
    %c0_660 = arith.constant 0 : index
    %c0_661 = arith.constant 0 : index
    %629 = vector.load %arg7[%c0_659, %c0_660, %c0_661] : memref<3x64x64xf32, #tpu.memory_space<vmem>>, vector<1x64x64xf32>
    %630 = vector.shape_cast %629 : vector<1x64x64xf32> to vector<64x64xf32>
    %cst_662 = arith.constant dense<0.000000e+00> : vector<16x64xf32>
    %631 = tpu.matmul %628, %630, %cst_662 {dimension_numbers = #tpu.dot_dimension_numbers<[1], [0], [0], [1], [0, 0, 1, 1], [], []>} : vector<16x64xf32>, vector<64x64xf32>, vector<16x64xf32> -> vector<16x64xf32>
    %c1_663 = arith.constant 1 : index
    %c0_664 = arith.constant 0 : index
    %c0_665 = arith.constant 0 : index
    %632 = vector.load %arg23[%c1_663, %c0_664, %c0_665] : memref<2x16x64xf32, #tpu.memory_space<vmem>>, vector<1x16x64xf32>
    %633 = vector.shape_cast %632 : vector<1x16x64xf32> to vector<16x64xf32>
    %c1_666 = arith.constant 1 : index
    %c0_667 = arith.constant 0 : index
    %c0_668 = arith.constant 0 : index
    %634 = vector.load %arg7[%c1_666, %c0_667, %c0_668] : memref<3x64x64xf32, #tpu.memory_space<vmem>>, vector<1x64x64xf32>
    %635 = vector.shape_cast %634 : vector<1x64x64xf32> to vector<64x64xf32>
    %cst_669 = arith.constant dense<0.000000e+00> : vector<16x64xf32>
    %636 = tpu.matmul %633, %635, %cst_669 {dimension_numbers = #tpu.dot_dimension_numbers<[1], [0], [0], [1], [0, 0, 1, 1], [], []>} : vector<16x64xf32>, vector<64x64xf32>, vector<16x64xf32> -> vector<16x64xf32>
    %637 = arith.addf %631, %636 : vector<16x64xf32>
    %c0_670 = arith.constant 0 : index
    %c0_671 = arith.constant 0 : index
    %638 = vector.load %arg15[%c0_670, %c0_671] : memref<1x64xf32, #tpu.memory_space<vmem>>, vector<1x64xf32>
    %639 = vector.broadcast %638 : vector<1x64xf32> to vector<16x64xf32>
    %640 = arith.addf %637, %639 : vector<16x64xf32>
    %cst_672 = arith.constant 0.000000e+00 : f32
    %641 = vector.broadcast %cst_672 : f32 to vector<16x64xf32>
    %642 = arith.maximumf %640, %641 : vector<16x64xf32>
    %c1_673 = arith.constant 1 : index
    %c0_674 = arith.constant 0 : index
    %c0_675 = arith.constant 0 : index
    %643 = vector.load %arg24[%c1_673, %c0_674, %c0_675] : memref<2x16x64xf32, #tpu.memory_space<vmem>>, vector<1x16x64xf32>
    %644 = vector.shape_cast %643 : vector<1x16x64xf32> to vector<16x64xf32>
    %645 = vector.shape_cast %642 : vector<16x64xf32> to vector<1x16x64xf32>
    tpu.vector_store %arg24[%c1_673, %c0_674, %c0_675], %645 {strides = array<i32>} : memref<2x16x64xf32, #tpu.memory_space<vmem>>, vector<1x16x64xf32>,
    %c0_676 = arith.constant 0 : index
    %c0_677 = arith.constant 0 : index
    %c0_678 = arith.constant 0 : index
    %646 = vector.load %arg24[%c0_676, %c0_677, %c0_678] : memref<2x16x64xf32, #tpu.memory_space<vmem>>, vector<1x16x64xf32>
    %647 = vector.shape_cast %646 : vector<1x16x64xf32> to vector<16x64xf32>
    %c1_679 = arith.constant 1 : index
    %c0_680 = arith.constant 0 : index
    %c0_681 = arith.constant 0 : index
    %648 = vector.load %arg8[%c1_679, %c0_680, %c0_681] : memref<3x64x32xf32, #tpu.memory_space<vmem>>, vector<1x64x32xf32>
    %649 = vector.shape_cast %648 : vector<1x64x32xf32> to vector<64x32xf32>
    %cst_682 = arith.constant dense<0.000000e+00> : vector<16x32xf32>
    %650 = tpu.matmul %647, %649, %cst_682 {dimension_numbers = #tpu.dot_dimension_numbers<[1], [0], [0], [1], [0, 0, 1, 1], [], []>} : vector<16x64xf32>, vector<64x32xf32>, vector<16x32xf32> -> vector<16x32xf32>
    %c1_683 = arith.constant 1 : index
    %c0_684 = arith.constant 0 : index
    %c0_685 = arith.constant 0 : index
    %651 = vector.load %arg24[%c1_683, %c0_684, %c0_685] : memref<2x16x64xf32, #tpu.memory_space<vmem>>, vector<1x16x64xf32>
    %652 = vector.shape_cast %651 : vector<1x16x64xf32> to vector<16x64xf32>
    %c2_686 = arith.constant 2 : index
    %c0_687 = arith.constant 0 : index
    %c0_688 = arith.constant 0 : index
    %653 = vector.load %arg8[%c2_686, %c0_687, %c0_688] : memref<3x64x32xf32, #tpu.memory_space<vmem>>, vector<1x64x32xf32>
    %654 = vector.shape_cast %653 : vector<1x64x32xf32> to vector<64x32xf32>
    %cst_689 = arith.constant dense<0.000000e+00> : vector<16x32xf32>
    %655 = tpu.matmul %652, %654, %cst_689 {dimension_numbers = #tpu.dot_dimension_numbers<[1], [0], [0], [1], [0, 0, 1, 1], [], []>} : vector<16x64xf32>, vector<64x32xf32>, vector<16x32xf32> -> vector<16x32xf32>
    %656 = arith.addf %650, %655 : vector<16x32xf32>
    %c0_690 = arith.constant 0 : index
    %c0_691 = arith.constant 0 : index
    %657 = vector.load %arg16[%c0_690, %c0_691] : memref<1x32xf32, #tpu.memory_space<vmem>>, vector<1x32xf32>
    %658 = vector.broadcast %657 : vector<1x32xf32> to vector<16x32xf32>
    %659 = arith.addf %656, %658 : vector<16x32xf32>
    %cst_692 = arith.constant 0.000000e+00 : f32
    %660 = vector.broadcast %cst_692 : f32 to vector<16x32xf32>
    %661 = arith.maximumf %659, %660 : vector<16x32xf32>
    %c0_693 = arith.constant 0 : index
    %c0_694 = arith.constant 0 : index
    %c0_695 = arith.constant 0 : index
    %662 = vector.load %arg25[%c0_693, %c0_694, %c0_695] : memref<1x16x32xf32, #tpu.memory_space<vmem>>, vector<1x16x32xf32>
    %663 = vector.shape_cast %662 : vector<1x16x32xf32> to vector<16x32xf32>
    %664 = vector.shape_cast %661 : vector<16x32xf32> to vector<1x16x32xf32>
    tpu.vector_store %arg25[%c0_693, %c0_694, %c0_695], %664 {strides = array<i32>} : memref<1x16x32xf32, #tpu.memory_space<vmem>>, vector<1x16x32xf32>,
    %c0_696 = arith.constant 0 : index
    %c0_697 = arith.constant 0 : index
    %c0_698 = arith.constant 0 : index
    %665 = vector.load %arg25[%c0_696, %c0_697, %c0_698] : memref<1x16x32xf32, #tpu.memory_space<vmem>>, vector<1x16x32xf32>
    %666 = vector.shape_cast %665 : vector<1x16x32xf32> to vector<16x32xf32>
    %c1_699 = arith.constant 1 : index
    %c0_700 = arith.constant 0 : index
    %c0_701 = arith.constant 0 : index
    %667 = vector.load %arg9[%c1_699, %c0_700, %c0_701] : memref<3x32x32xf32, #tpu.memory_space<vmem>>, vector<1x32x32xf32>
    %668 = vector.shape_cast %667 : vector<1x32x32xf32> to vector<32x32xf32>
    %cst_702 = arith.constant dense<0.000000e+00> : vector<16x32xf32>
    %669 = tpu.matmul %666, %668, %cst_702 {dimension_numbers = #tpu.dot_dimension_numbers<[1], [0], [0], [1], [0, 0, 1, 1], [], []>} : vector<16x32xf32>, vector<32x32xf32>, vector<16x32xf32> -> vector<16x32xf32>
    %c0_703 = arith.constant 0 : index
    %c0_704 = arith.constant 0 : index
    %670 = vector.load %arg17[%c0_703, %c0_704] : memref<1x32xf32, #tpu.memory_space<vmem>>, vector<1x32xf32>
    %671 = vector.broadcast %670 : vector<1x32xf32> to vector<16x32xf32>
    %672 = arith.addf %669, %671 : vector<16x32xf32>
    %cst_705 = arith.constant 0.000000e+00 : f32
    %673 = vector.broadcast %cst_705 : f32 to vector<16x32xf32>
    %674 = arith.maximumf %672, %673 : vector<16x32xf32>
    %c0_706 = arith.constant 0 : index
    %c0_707 = arith.constant 0 : index
    %c0_708 = arith.constant 0 : index
    %675 = vector.load %arg18[%c0_706, %c0_707, %c0_708] : memref<1x16x32xf32, #tpu.memory_space<vmem>>, vector<1x16x32xf32>
    %676 = vector.shape_cast %675 : vector<1x16x32xf32> to vector<16x32xf32>
    %677 = vector.shape_cast %674 : vector<16x32xf32> to vector<1x16x32xf32>
    tpu.vector_store %arg18[%c0_706, %c0_707, %c0_708], %677 {strides = array<i32>} : memref<1x16x32xf32, #tpu.memory_space<vmem>>, vector<1x16x32xf32>,
    return
  }
  func.func @transform_0(%arg0: i32) -> (i32, i32, i32) {
    %c0_i32 = arith.constant 0 : i32
    %c0_i32_0 = arith.constant 0 : i32
    %c0_i32_1 = arith.constant 0 : i32
    return %c0_i32, %arg0, %c0_i32_0 : i32, i32, i32
  }
  func.func @transform_1(%arg0: i32) -> (i32, i32, i32) {
    %c0_i32 = arith.constant 0 : i32
    %c0_i32_0 = arith.constant 0 : i32
    %c0_i32_1 = arith.constant 0 : i32
    %c0_i32_2 = arith.constant 0 : i32
    return %c0_i32, %c0_i32_0, %c0_i32_1 : i32, i32, i32
  }
  func.func @transform_2(%arg0: i32) -> (i32, i32, i32) {
    %c0_i32 = arith.constant 0 : i32
    %c0_i32_0 = arith.constant 0 : i32
    %c0_i32_1 = arith.constant 0 : i32
    %c0_i32_2 = arith.constant 0 : i32
    return %c0_i32, %c0_i32_0, %c0_i32_1 : i32, i32, i32
  }
  func.func @transform_3(%arg0: i32) -> (i32, i32, i32) {
    %c0_i32 = arith.constant 0 : i32
    %c0_i32_0 = arith.constant 0 : i32
    %c0_i32_1 = arith.constant 0 : i32
    %c0_i32_2 = arith.constant 0 : i32
    return %c0_i32, %c0_i32_0, %c0_i32_1 : i32, i32, i32
  }
  func.func @transform_4(%arg0: i32) -> (i32, i32, i32) {
    %c0_i32 = arith.constant 0 : i32
    %c0_i32_0 = arith.constant 0 : i32
    %c0_i32_1 = arith.constant 0 : i32
    %c0_i32_2 = arith.constant 0 : i32
    return %c0_i32, %c0_i32_0, %c0_i32_1 : i32, i32, i32
  }
  func.func @transform_5(%arg0: i32) -> (i32, i32, i32) {
    %c0_i32 = arith.constant 0 : i32
    %c0_i32_0 = arith.constant 0 : i32
    %c0_i32_1 = arith.constant 0 : i32
    %c0_i32_2 = arith.constant 0 : i32
    return %c0_i32, %c0_i32_0, %c0_i32_1 : i32, i32, i32
  }
  func.func @transform_6(%arg0: i32) -> (i32, i32, i32) {
    %c0_i32 = arith.constant 0 : i32
    %c0_i32_0 = arith.constant 0 : i32
    %c0_i32_1 = arith.constant 0 : i32
    %c0_i32_2 = arith.constant 0 : i32
    return %c0_i32, %c0_i32_0, %c0_i32_1 : i32, i32, i32
  }
  func.func @transform_7(%arg0: i32) -> (i32, i32, i32) {
    %c0_i32 = arith.constant 0 : i32
    %c0_i32_0 = arith.constant 0 : i32
    %c0_i32_1 = arith.constant 0 : i32
    %c0_i32_2 = arith.constant 0 : i32
    return %c0_i32, %c0_i32_0, %c0_i32_1 : i32, i32, i32
  }
  func.func @transform_8(%arg0: i32) -> (i32, i32, i32) {
    %c0_i32 = arith.constant 0 : i32
    %c0_i32_0 = arith.constant 0 : i32
    %c0_i32_1 = arith.constant 0 : i32
    %c0_i32_2 = arith.constant 0 : i32
    return %c0_i32, %c0_i32_0, %c0_i32_1 : i32, i32, i32
  }
  func.func @transform_9(%arg0: i32) -> (i32, i32) {
    %c0_i32 = arith.constant 0 : i32
    %c0_i32_0 = arith.constant 0 : i32
    %c0_i32_1 = arith.constant 0 : i32
    return %c0_i32, %c0_i32_0 : i32, i32
  }
  func.func @transform_10(%arg0: i32) -> (i32, i32) {
    %c0_i32 = arith.constant 0 : i32
    %c0_i32_0 = arith.constant 0 : i32
    %c0_i32_1 = arith.constant 0 : i32
    return %c0_i32, %c0_i32_0 : i32, i32
  }
  func.func @transform_11(%arg0: i32) -> (i32, i32) {
    %c0_i32 = arith.constant 0 : i32
    %c0_i32_0 = arith.constant 0 : i32
    %c0_i32_1 = arith.constant 0 : i32
    return %c0_i32, %c0_i32_0 : i32, i32
  }
  func.func @transform_12(%arg0: i32) -> (i32, i32) {
    %c0_i32 = arith.constant 0 : i32
    %c0_i32_0 = arith.constant 0 : i32
    %c0_i32_1 = arith.constant 0 : i32
    return %c0_i32, %c0_i32_0 : i32, i32
  }
  func.func @transform_13(%arg0: i32) -> (i32, i32) {
    %c0_i32 = arith.constant 0 : i32
    %c0_i32_0 = arith.constant 0 : i32
    %c0_i32_1 = arith.constant 0 : i32
    return %c0_i32, %c0_i32_0 : i32, i32
  }
  func.func @transform_14(%arg0: i32) -> (i32, i32) {
    %c0_i32 = arith.constant 0 : i32
    %c0_i32_0 = arith.constant 0 : i32
    %c0_i32_1 = arith.constant 0 : i32
    return %c0_i32, %c0_i32_0 : i32, i32
  }
  func.func @transform_15(%arg0: i32) -> (i32, i32) {
    %c0_i32 = arith.constant 0 : i32
    %c0_i32_0 = arith.constant 0 : i32
    %c0_i32_1 = arith.constant 0 : i32
    return %c0_i32, %c0_i32_0 : i32, i32
  }
  func.func @transform_16(%arg0: i32) -> (i32, i32) {
    %c0_i32 = arith.constant 0 : i32
    %c0_i32_0 = arith.constant 0 : i32
    %c0_i32_1 = arith.constant 0 : i32
    return %c0_i32, %c0_i32_0 : i32, i32
  }
  func.func @transform_17(%arg0: i32) -> (i32, i32, i32) {
    %c0_i32 = arith.constant 0 : i32
    %c0_i32_0 = arith.constant 0 : i32
    %c0_i32_1 = arith.constant 0 : i32
    return %c0_i32, %arg0, %c0_i32_0 : i32, i32, i32
  }
}

module attributes {stable_mosaic.version = 11 : i64} {
  func.func @_mm_bias_kernel(%arg0: i32, %arg1: memref<16x32xf32, #tpu.memory_space<vmem>>, %arg2: memref<32x1024xf32, #tpu.memory_space<vmem>>, %arg3: memref<1x1024xf32, #tpu.memory_space<vmem>>, %arg4: memref<16x1024xf32, #tpu.memory_space<vmem>>) attributes {dimension_semantics = [#tpu.dimension_semantics<parallel>], iteration_bounds = array<i64: 1>, scalar_prefetch = 0 : i64, scratch_operands = 0 : i64, tpu.core_type = #tpu.core_type<tc>, window_params = [{transform_indices = @transform_0, window_bounds = array<i64: 16, 32>}, {pipeline_mode = #tpu.pipeline_mode<synchronous>, transform_indices = @transform_1, window_bounds = array<i64: 32, 1024>}, {pipeline_mode = #tpu.pipeline_mode<synchronous>, transform_indices = @transform_2, window_bounds = array<i64: 1, 1024>}, {transform_indices = @transform_3, window_bounds = array<i64: 16, 1024>}]} {
    %c0 = arith.constant 0 : index
    %c0_0 = arith.constant 0 : index
    %0 = vector.load %arg1[%c0, %c0_0] : memref<16x32xf32, #tpu.memory_space<vmem>>, vector<16x32xf32>
    %c0_1 = arith.constant 0 : index
    %c0_2 = arith.constant 0 : index
    %1 = vector.load %arg2[%c0_1, %c0_2] : memref<32x1024xf32, #tpu.memory_space<vmem>>, vector<32x1024xf32>
    %cst = arith.constant dense<0.000000e+00> : vector<16x1024xf32>
    %2 = tpu.matmul %0, %1, %cst {dimension_numbers = #tpu.dot_dimension_numbers<[1], [0], [0], [1], [0, 0, 1, 1], [], []>} : vector<16x32xf32>, vector<32x1024xf32>, vector<16x1024xf32> -> vector<16x1024xf32>
    %c0_3 = arith.constant 0 : index
    %c0_4 = arith.constant 0 : index
    %3 = vector.load %arg3[%c0_3, %c0_4] : memref<1x1024xf32, #tpu.memory_space<vmem>>, vector<1x1024xf32>
    %4 = vector.broadcast %3 : vector<1x1024xf32> to vector<16x1024xf32>
    %5 = arith.addf %2, %4 : vector<16x1024xf32>
    %c0_5 = arith.constant 0 : index
    %c0_6 = arith.constant 0 : index
    %6 = vector.load %arg4[%c0_5, %c0_6] : memref<16x1024xf32, #tpu.memory_space<vmem>>, vector<16x1024xf32>
    tpu.vector_store %arg4[%c0_5, %c0_6], %5 {strides = array<i32>} : memref<16x1024xf32, #tpu.memory_space<vmem>>, vector<16x1024xf32>,
    return
  }
  func.func @transform_0(%arg0: i32) -> (i32, i32) {
    %c0_i32 = arith.constant 0 : i32
    %c0_i32_0 = arith.constant 0 : i32
    return %arg0, %c0_i32 : i32, i32
  }
  func.func @transform_1(%arg0: i32) -> (i32, i32) {
    %c0_i32 = arith.constant 0 : i32
    %c0_i32_0 = arith.constant 0 : i32
    %c0_i32_1 = arith.constant 0 : i32
    return %c0_i32, %c0_i32_0 : i32, i32
  }
  func.func @transform_2(%arg0: i32) -> (i32, i32) {
    %c0_i32 = arith.constant 0 : i32
    %c0_i32_0 = arith.constant 0 : i32
    %c0_i32_1 = arith.constant 0 : i32
    return %c0_i32, %c0_i32_0 : i32, i32
  }
  func.func @transform_3(%arg0: i32) -> (i32, i32) {
    %c0_i32 = arith.constant 0 : i32
    %c0_i32_0 = arith.constant 0 : i32
    return %arg0, %c0_i32 : i32, i32
  }
}

module attributes {stable_mosaic.version = 11 : i64} {
  func.func @_lstm_kernel(%arg0: i32, %arg1: i32, %arg2: memref<1x4x4x512xf32, #tpu.memory_space<vmem>>, %arg3: memref<1x128x512xf32, #tpu.memory_space<vmem>>, %arg4: memref<1x4x4x40xf32, #tpu.memory_space<vmem>>, %arg5: memref<4x128xf32, #tpu.memory_space<vmem>>, %arg6: memref<4x128xf32, #tpu.memory_space<vmem>>) attributes {dimension_semantics = [#tpu.dimension_semantics<parallel>, #tpu.dimension_semantics<arbitrary>], iteration_bounds = array<i64: 2, 1>, scalar_prefetch = 0 : i64, scratch_operands = 2 : i64, tpu.core_type = #tpu.core_type<tc>, window_params = [{transform_indices = @transform_0, window_bounds = array<i64: 1, 4, 4, 512>}, {transform_indices = @transform_1, window_bounds = array<i64: 1, 128, 512>}, {transform_indices = @transform_2, window_bounds = array<i64: 1, 4, 4, 40>}]} {
    %c0_i32 = arith.constant 0 : i32
    %0 = arith.cmpi eq, %arg1, %c0_i32 : i32
    %1 = arith.extui %0 : i1 to i32
    %c0_i32_0 = arith.constant 0 : i32
    %2 = arith.cmpi ne, %1, %c0_i32_0 : i32
    scf.if %2 {
      %cst = arith.constant 0.000000e+00 : f32
      %5 = vector.broadcast %cst : f32 to vector<4x128xf32>
      %c0 = arith.constant 0 : index
      %c0_4 = arith.constant 0 : index
      %6 = vector.load %arg5[%c0, %c0_4] : memref<4x128xf32, #tpu.memory_space<vmem>>, vector<4x128xf32>
      tpu.vector_store %arg5[%c0, %c0_4], %5 {strides = array<i32>} : memref<4x128xf32, #tpu.memory_space<vmem>>, vector<4x128xf32>,
      %cst_5 = arith.constant 0.000000e+00 : f32
      %7 = vector.broadcast %cst_5 : f32 to vector<4x128xf32>
      %c0_6 = arith.constant 0 : index
      %c0_7 = arith.constant 0 : index
      %8 = vector.load %arg6[%c0_6, %c0_7] : memref<4x128xf32, #tpu.memory_space<vmem>>, vector<4x128xf32>
      tpu.vector_store %arg6[%c0_6, %c0_7], %7 {strides = array<i32>} : memref<4x128xf32, #tpu.memory_space<vmem>>, vector<4x128xf32>,
    } else {
    }
    %c1_i32 = arith.constant 1 : i32
    %3 = arith.cmpi eq, %arg0, %c1_i32 : i32
    %c0_i32_1 = arith.constant 0 : i32
    %c4_i32 = arith.constant 4 : i32
    %4 = arith.addi %c0_i32_1, %c4_i32 : i32
    %c1_i32_2 = arith.constant 1 : i32
    scf.for %arg7 = %c0_i32_1 to %4 step %c1_i32_2  : i32 {
      %c3_i32 = arith.constant 3 : i32
      %5 = arith.subi %c3_i32, %arg7 : i32
      %6 = arith.select %3, %5, %arg7 : i32
      %c0 = arith.constant 0 : index
      %7 = arith.index_cast %6 : i32 to index
      %c0_4 = arith.constant 0 : index
      %c0_5 = arith.constant 0 : index
      %8 = vector.load %arg2[%c0, %7, %c0_4, %c0_5] : memref<1x4x4x512xf32, #tpu.memory_space<vmem>>, vector<1x1x4x512xf32>
      %9 = vector.shape_cast %8 : vector<1x1x4x512xf32> to vector<4x512xf32>
      %c0_6 = arith.constant 0 : index
      %c0_7 = arith.constant 0 : index
      %10 = vector.load %arg5[%c0_6, %c0_7] : memref<4x128xf32, #tpu.memory_space<vmem>>, vector<4x128xf32>
      %c0_8 = arith.constant 0 : index
      %c0_9 = arith.constant 0 : index
      %c0_10 = arith.constant 0 : index
      %11 = vector.load %arg3[%c0_8, %c0_9, %c0_10] : memref<1x128x512xf32, #tpu.memory_space<vmem>>, vector<1x128x512xf32>
      %12 = vector.shape_cast %11 : vector<1x128x512xf32> to vector<128x512xf32>
      %cst = arith.constant dense<0.000000e+00> : vector<4x512xf32>
      %13 = tpu.matmul %10, %12, %cst {dimension_numbers = #tpu.dot_dimension_numbers<[1], [0], [0], [1], [0, 0, 1, 1], [], []>} : vector<4x128xf32>, vector<128x512xf32>, vector<4x512xf32> -> vector<4x512xf32>
      %14 = arith.addf %9, %13 : vector<4x512xf32>
      %15 = vector.extract_strided_slice %14 {offsets = [0, 0], sizes = [4, 128], strides = [1, 1]} : vector<4x512xf32> to vector<4x128xf32>
      %16 = arith.negf %15 : vector<4x128xf32>
      %17 = math.exp %16 : vector<4x128xf32>
      %cst_11 = arith.constant 1.000000e+00 : f32
      %18 = vector.broadcast %cst_11 : f32 to vector<4x128xf32>
      %19 = arith.addf %18, %17 : vector<4x128xf32>
      %20 = arith.divf %18, %19 : vector<4x128xf32>
      %21 = vector.extract_strided_slice %14 {offsets = [0, 128], sizes = [4, 128], strides = [1, 1]} : vector<4x512xf32> to vector<4x128xf32>
      %22 = arith.negf %21 : vector<4x128xf32>
      %23 = math.exp %22 : vector<4x128xf32>
      %cst_12 = arith.constant 1.000000e+00 : f32
      %24 = vector.broadcast %cst_12 : f32 to vector<4x128xf32>
      %25 = arith.addf %24, %23 : vector<4x128xf32>
      %26 = arith.divf %24, %25 : vector<4x128xf32>
      %27 = vector.extract_strided_slice %14 {offsets = [0, 256], sizes = [4, 128], strides = [1, 1]} : vector<4x512xf32> to vector<4x128xf32>
      %28 = math.tanh %27 : vector<4x128xf32>
      %29 = vector.extract_strided_slice %14 {offsets = [0, 384], sizes = [4, 128], strides = [1, 1]} : vector<4x512xf32> to vector<4x128xf32>
      %30 = arith.negf %29 : vector<4x128xf32>
      %31 = math.exp %30 : vector<4x128xf32>
      %cst_13 = arith.constant 1.000000e+00 : f32
      %32 = vector.broadcast %cst_13 : f32 to vector<4x128xf32>
      %33 = arith.addf %32, %31 : vector<4x128xf32>
      %34 = arith.divf %32, %33 : vector<4x128xf32>
      %c0_14 = arith.constant 0 : index
      %c0_15 = arith.constant 0 : index
      %35 = vector.load %arg6[%c0_14, %c0_15] : memref<4x128xf32, #tpu.memory_space<vmem>>, vector<4x128xf32>
      %36 = arith.mulf %26, %35 : vector<4x128xf32>
      %37 = arith.mulf %20, %28 : vector<4x128xf32>
      %38 = arith.addf %36, %37 : vector<4x128xf32>
      %39 = math.tanh %38 : vector<4x128xf32>
      %40 = arith.mulf %34, %39 : vector<4x128xf32>
      %c0_16 = arith.constant 0 : index
      %c0_17 = arith.constant 0 : index
      %41 = vector.load %arg6[%c0_16, %c0_17] : memref<4x128xf32, #tpu.memory_space<vmem>>, vector<4x128xf32>
      tpu.vector_store %arg6[%c0_16, %c0_17], %38 {strides = array<i32>} : memref<4x128xf32, #tpu.memory_space<vmem>>, vector<4x128xf32>,
      %c0_18 = arith.constant 0 : index
      %c0_19 = arith.constant 0 : index
      %42 = vector.load %arg5[%c0_18, %c0_19] : memref<4x128xf32, #tpu.memory_space<vmem>>, vector<4x128xf32>
      tpu.vector_store %arg5[%c0_18, %c0_19], %40 {strides = array<i32>} : memref<4x128xf32, #tpu.memory_space<vmem>>, vector<4x128xf32>,
      %43 = vector.extract_strided_slice %40 {offsets = [0, 0], sizes = [4, 40], strides = [1, 1]} : vector<4x128xf32> to vector<4x40xf32>
      %c0_20 = arith.constant 0 : index
      %44 = arith.index_cast %6 : i32 to index
      %c0_21 = arith.constant 0 : index
      %c0_22 = arith.constant 0 : index
      %45 = vector.load %arg4[%c0_20, %44, %c0_21, %c0_22] : memref<1x4x4x40xf32, #tpu.memory_space<vmem>>, vector<1x1x4x40xf32>
      %46 = vector.shape_cast %45 : vector<1x1x4x40xf32> to vector<4x40xf32>
      %47 = vector.shape_cast %43 : vector<4x40xf32> to vector<1x1x4x40xf32>
      tpu.vector_store %arg4[%c0_20, %44, %c0_21, %c0_22], %47 {strides = array<i32>} : memref<1x4x4x40xf32, #tpu.memory_space<vmem>>, vector<1x1x4x40xf32>,
    }
    %c4_i32_3 = arith.constant 4 : i32
    return
  }
  func.func @transform_0(%arg0: i32, %arg1: i32) -> (i32, i32, i32, i32) {
    %c0_i32 = arith.constant 0 : i32
    %0 = arith.cmpi eq, %arg0, %c0_i32 : i32
    %c0_i32_0 = arith.constant 0 : i32
    %1 = arith.subi %c0_i32_0, %arg1 : i32
    %2 = arith.select %0, %arg1, %1 : i32
    %c0_i32_1 = arith.constant 0 : i32
    %c0_i32_2 = arith.constant 0 : i32
    %c0_i32_3 = arith.constant 0 : i32
    return %arg0, %2, %c0_i32_1, %c0_i32_2 : i32, i32, i32, i32
  }
  func.func @transform_1(%arg0: i32, %arg1: i32) -> (i32, i32, i32) {
    %c0_i32 = arith.constant 0 : i32
    %c0_i32_0 = arith.constant 0 : i32
    %c0_i32_1 = arith.constant 0 : i32
    return %arg0, %c0_i32, %c0_i32_0 : i32, i32, i32
  }
  func.func @transform_2(%arg0: i32, %arg1: i32) -> (i32, i32, i32, i32) {
    %c0_i32 = arith.constant 0 : i32
    %0 = arith.cmpi eq, %arg0, %c0_i32 : i32
    %c0_i32_0 = arith.constant 0 : i32
    %1 = arith.subi %c0_i32_0, %arg1 : i32
    %2 = arith.select %0, %arg1, %1 : i32
    %c0_i32_1 = arith.constant 0 : i32
    %c0_i32_2 = arith.constant 0 : i32
    %c0_i32_3 = arith.constant 0 : i32
    return %arg0, %2, %c0_i32_1, %c0_i32_2 : i32, i32, i32, i32
  }
}

</mosaic_0001>

<bundles_post_ra>
// kernel: tile.36
= control target key start
LH: loop header
LB: loop body
LE: loop exit
PB: predicated region body
PF: predicated region fallthrough
CT: control target
= control target key end

     0   :  { %s67_s10 = smov 112   ;;  %s68_s11 = smov 80   ;;  %vm3_vm0 = vcmask 130048   ;;  %vm9_vm1 = vcmask 1048448   ;;  %vm15_vm2 = vcmask 917248   ;;  %vm21_vm3 = vcmask 786048   ;;  %s111_s0 = inlined_call_operand.vmem [shape: f32[8,16], index: 0, kind: input, shape index: {}]   ;;  %s112_s1 = inlined_call_operand.vmem [shape: f32[1,128], index: 1, kind: output, shape index: {}]  }
   0x1   :  { %v53_v0 = vld [vmem:[%s111_s0 + $0x7] sm:$0x1]   ;;  %v55_v1 = vld [vmem:[%s111_s0 + $0x5] sm:$0x1]   ;;  %v54_v2 = vld [vmem:[%s111_s0 + $0x6] sm:$0x1]  }
   0x2   :  { %7 = vrot.lane.b32.xlu0 %v53_v0, %s67_s10  ;;  %19 = vrot.lane.b32.xlu1 %v55_v1, %s68_s11  ;;  %v56_v3 = vld [vmem:[%s111_s0 + $0x4] sm:$0x1]   ;;  %v2_v4 = vld [vmem:[%s111_s0] sm:$0x1]   ;;  %s69_s18 = smov 96   ;;  %s70_s19 = smov 64  }
   0x3   :  { %4 = vst.msk [vmem:[#allocation0] sm:$0x1] %vm3_vm0, %v2_v4   ;;  %v57_v5 = vld [vmem:[%s111_s0 + $0x3] sm:$0x1]   ;;  %v58_v6 = vld [vmem:[%s111_s0 + $0x2] sm:$0x1]  }
   0x4   :  { %s71_s24 = smov 48   ;;  %s72_s25 = smov 32   ;;  %v59_v7 = vld [vmem:[%s111_s0 + $0x1] sm:$0x1]   ;;  %vm27_vm4 = vcmask 654848   ;;  %vm33_vm5 = vcmask 523648  }
   0x5   :  { %s73_s0 = smov 16   ;;  %vm39_vm6 = vcmask 392448   ;;  %vm45_vm7 = vcmask 261248  }
   0x6   :  { %13 = vrot.lane.b32.xlu0 %v54_v2, %s69_s18  ;;  %25 = vrot.lane.b32.xlu1 %v56_v3, %s70_s19 }
   0xa   :  { %31 = vrot.lane.b32.xlu0 %v57_v5, %s71_s24  ;;  %37 = vrot.lane.b32.xlu1 %v58_v6, %s72_s25 }
   0xe   :  { %43 = vrot.lane.b32.xlu0 %v59_v7, %s73_s0 }
  0x74   :  { %v8_v8 = vpop.permute.xlu0 %7   ;;  %v20_v9 = vpop.permute.xlu1 %19  }
  0x75   :  { %10 = vst.msk [vmem:[#allocation0] sm:$0x1] %vm9_vm1, %v8_v8  }
  0x78   :  { %v14_v10 = vpop.permute.xlu0 %13   ;;  %v26_v11 = vpop.permute.xlu1 %25  }
  0x79   :  { %16 = vst.msk [vmem:[#allocation0] sm:$0x1] %vm15_vm2, %v14_v10  }
  0x7a   :  { %22 = vst.msk [vmem:[#allocation0] sm:$0x1] %vm21_vm3, %v20_v9  }
  0x7b   :  { %28 = vst.msk [vmem:[#allocation0] sm:$0x1] %vm27_vm4, %v26_v11  }
  0x7c   :  { %v32_v12 = vpop.permute.xlu0 %31   ;;  %v38_v13 = vpop.permute.xlu1 %37  }
  0x7d   :  { %34 = vst.msk [vmem:[#allocation0] sm:$0x1] %vm33_vm5, %v32_v12  }
  0x7e   :  { %40 = vst.msk [vmem:[#allocation0] sm:$0x1] %vm39_vm6, %v38_v13  }
  0x80   :  { %v44_v14 = vpop.permute.xlu0 %43  }
  0x81   :  { %46 = vst.msk [vmem:[#allocation0] sm:$0x1] %vm45_vm7, %v44_v14  }
  0x88   :  { %v50_v15 = vld [vmem:[#allocation0] sm:$0x1] }
  0x89   :  { %52 = vst [vmem:[%s112_s1] sm:$0x1] %v50_v15 }

// kernel: tile.45
= control target key start
LH: loop header
LB: loop body
LE: loop exit
PB: predicated region body
PF: predicated region fallthrough
CT: control target
= control target key end

     0   :  { %s22_s0 = inlined_call_operand.vmem [shape: f32[16], index: 0, kind: input, shape index: {}]   ;;  %s23_s1 = inlined_call_operand.vmem [shape: f32[4,16], index: 1, kind: output, shape index: {}]  }
   0x1   :  { %v4_v0 = vld [vmem:[%s22_s0] ss:$0 sm:$0xff] }
   0x2   :  { %5 = vst [vmem:[%s23_s1] sm:$0xf] %v4_v0 }

// kernel: tile.46
= control target key start
LH: loop header
LB: loop body
LE: loop exit
PB: predicated region body
PF: predicated region fallthrough
CT: control target
= control target key end

     0   :  { %vm7_vm0 = vcmask 130048   ;;  %s37_s8 = smov 16   ;;  %s38_s9 = smov 32   ;;  %vm13_vm1 = vcmask 523648   ;;  %vm19_vm2 = vcmask 392448   ;;  %vm25_vm3 = vcmask 261248   ;;  %s55_s0 = inlined_call_operand.vmem [shape: f32[4,16], index: 0, kind: input, shape index: {}]   ;;  %s56_s1 = inlined_call_operand.vmem [shape: f32[1,64], index: 1, kind: output, shape index: {}]  }
   0x1   :  { %v4_v0 = vld [vmem:[%s55_s0] sm:$0xf]  ;;  %s36_s0 = smov 48  }
   0x2   :  { %5 = vst [vmem:[#allocation1] sm:$0xf] %v4_v0 }
   0x9   :  { %v10_v1 = vld [vmem:[#allocation1 + $0x3] sm:$0x1]   ;;  %v22_v2 = vld [vmem:[#allocation1 + $0x1] sm:$0x1]   ;;  %v6_v3 = vld [vmem:[#allocation1] sm:$0x1]  }
   0xa   :  { %11 = vrot.lane.b32.xlu0 %v10_v1, %s36_s0  ;;  %23 = vrot.lane.b32.xlu1 %v22_v2, %s37_s8  ;;  %v16_v4 = vld [vmem:[#allocation1 + $0x2] sm:$0x1]   ;;  %8 = vst.msk [vmem:[#allocation0] sm:$0x1] %vm7_vm0, %v6_v3  }
   0xe   :  { %17 = vrot.lane.b32.xlu0 %v16_v4, %s38_s9 }
  0x7c   :  { %v12_v5 = vpop.permute.xlu0 %11   ;;  %v24_v6 = vpop.permute.xlu1 %23  }
  0x7d   :  { %14 = vst.msk [vmem:[#allocation0] sm:$0x1] %vm13_vm1, %v12_v5  }
  0x80   :  { %v18_v7 = vpop.permute.xlu0 %17  }
  0x81   :  { %20 = vst.msk [vmem:[#allocation0] sm:$0x1] %vm19_vm2, %v18_v7  }
  0x82   :  { %26 = vst.msk [vmem:[#allocation0] sm:$0x1] %vm25_vm3, %v24_v6  }
  0x89   :  { %v30_v8 = vld [vmem:[#allocation0] sm:$0x1] }
  0x8a   :  { %32 = vst [vmem:[%s56_s1] sm:$0x1] %v30_v8 }

// kernel: tile.55
= control target key start
LH: loop header
LB: loop body
LE: loop exit
PB: predicated region body
PF: predicated region fallthrough
CT: control target
= control target key end

     0   :  { %s22_s0 = inlined_call_operand.vmem [shape: f32[32], index: 0, kind: input, shape index: {}]   ;;  %s23_s1 = inlined_call_operand.vmem [shape: f32[2,32], index: 1, kind: output, shape index: {}]  }
   0x1   :  { %v4_v0 = vld [vmem:[%s22_s0] ss:$0 sm:$0xff] }
   0x2   :  { %5 = vst [vmem:[%s23_s1] sm:$0x3] %v4_v0 }

// kernel: tile.56
= control target key start
LH: loop header
LB: loop body
LE: loop exit
PB: predicated region body
PF: predicated region fallthrough
CT: control target
= control target key end

     0   :  { %vm7_vm0 = vcmask 261120   ;;  %vm13_vm1 = vcmask 523520   ;;  %s39_s0 = inlined_call_operand.vmem [shape: f32[2,32], index: 0, kind: input, shape index: {}]   ;;  %s40_s1 = inlined_call_operand.vmem [shape: f32[1,64], index: 1, kind: output, shape index: {}]  }
   0x1   :  { %v4_v0 = vld [vmem:[%s39_s0] sm:$0x3]  ;;  %s22_s0 = smov 32  }
   0x2   :  { %5 = vst [vmem:[#allocation1] sm:$0x3] %v4_v0 }
   0x9   :  { %v10_v1 = vld [vmem:[#allocation1 + $0x1] sm:$0x1]   ;;  %v6_v2 = vld [vmem:[#allocation1] sm:$0x1]  }
   0xa   :  { %11 = vrot.lane.b32.xlu0 %v10_v1, %s22_s0  ;;  %8 = vst.msk [vmem:[#allocation0] sm:$0x1] %vm7_vm0, %v6_v2  }
  0x7c   :  { %v12_v3 = vpop.permute.xlu0 %11  }
  0x7d   :  { %14 = vst.msk [vmem:[#allocation0] sm:$0x1] %vm13_vm1, %v12_v3  }
  0x84   :  { %v18_v4 = vld [vmem:[#allocation0] sm:$0x1] }
  0x85   :  { %20 = vst [vmem:[%s40_s1] sm:$0x1] %v18_v4 }

// kernel: deeplight_forward.4
= control target key start
LH: loop header
LB: loop body
LE: loop exit
PB: predicated region body
PF: predicated region fallthrough
CT: control target
= control target key end

     0   :  { %v466_v3 = vmov 0.0   ;;  %vm90_vm0 = vcmask 261120   ;;  %v50_v51 = vlaneseq  ;;  %s656_s1 = inlined_call_operand.vmem [shape: f32[32,1024], index: 1, kind: input, shape index: {}]   ;;  %s657_s0 = inlined_call_operand.vmem [shape: f32[16,32], index: 0, kind: input, shape index: {}]   ;;  %s658_s2 = inlined_call_operand.vmem [shape: f32[1,1024], index: 2, kind: input, shape index: {}]   ;;  %s659_s3 = inlined_call_operand.vmem [shape: f32[16,1024], index: 3, kind: output, shape index: {}]  }
   0x1   :  { %v17_v0 = vld [vmem:[%s656_s1 + $0x8] sm:$0xff]  ;;  %v19_v2 = vld [vmem:[%s656_s1 + $0x18] sm:$0xff]  ;;  %161 = vmatprep.mubr.f32.mxu0 %v466_v3  ;;  %238 = vmatprep.mubr.f32.mxu1 %v466_v3  ;;  %v16_v6 = vld [vmem:[%s656_s1] sm:$0xff] }
   0x2   :  { %v25_v1 = vld [vmem:[%s656_s1 + $0x48] sm:$0xff]  ;;  %v27_v5 = vld [vmem:[%s656_s1 + $0x58] sm:$0xff]  ;;  %v24_v7 = vld [vmem:[%s656_s1 + $0x40] sm:$0xff]  ;;  %v51_v52 = vshrl.u32 %v50_v51, 7 }
   0x3   :  { %v433_v4 = vpack.c.bf16 %v25_v1, %v17_v0  ;;  %v441_v8 = vpack.c.bf16 %v27_v5, %v19_v2  ;;  %v435_v9 = vpack.c.bf16 %v24_v7, %v16_v6  ;;  %v18_v10 = vld [vmem:[%s656_s1 + $0x10] sm:$0xff]  ;;  %v33_v12 = vld [vmem:[%s656_s1 + $0x88] sm:$0xff]  ;;  %v35_v15 = vld [vmem:[%s656_s1 + $0x98] sm:$0xff] }
   0x4   :  { %v26_v11 = vld [vmem:[%s656_s1 + $0x50] sm:$0xff]  ;;  %v41_v14 = vld [vmem:[%s656_s1 + $0xc8] sm:$0xff]  ;;  %v43_v16 = vld [vmem:[%s656_s1 + $0xd8] sm:$0xff]  ;;  %v52_v53 = vsub.s32 0, %v51_v52  ;;  %v60_v55 = vsub.s32 2, %v51_v52  ;;  %v56_v56 = vsub.s32 1, %v51_v52 }
   0x5   :  { %434 = vmatprep.subr.bf16.mxu0 %v433_v4  ;;  %v443_v13 = vpack.c.bf16 %v26_v11, %v18_v10  ;;  %442 = vmatprep.subr.bf16.mxu1 %v441_v8  ;;  %v437_v17 = vpack.c.bf16 %v41_v14, %v33_v12  ;;  %v445_v18 = vpack.c.bf16 %v43_v16, %v35_v15  ;;  %v32_v19 = vld [vmem:[%s656_s1 + $0x80] sm:$0xff]  ;;  %v34_v21 = vld [vmem:[%s656_s1 + $0x90] sm:$0xff]  ;;  %v21_v24 = vld [vmem:[%s656_s1 + $0x28] sm:$0xff]  ;;  %v64_v57 = vsub.s32 3, %v51_v52 }
   0x6   :  { %436 = vmatpush1.bf16.msra.mxu0 %v435_v9  ;;  %v40_v20 = vld [vmem:[%s656_s1 + $0xc0] sm:$0xff]  ;;  %v42_v23 = vld [vmem:[%s656_s1 + $0xd0] sm:$0xff]  ;;  %v29_v26 = vld [vmem:[%s656_s1 + $0x68] sm:$0xff]  ;;  %v68_v2 = vsub.s32 4, %v51_v52  ;;  %v76_v6 = vsub.s32 6, %v51_v52  ;;  %v72_v7 = vsub.s32 5, %v51_v52 }
   0x7   :  { %444 = vmatpush1.bf16.msra.mxu1 %v443_v13  ;;  %v439_v22 = vpack.c.bf16 %v40_v20, %v32_v19  ;;  %438 = vmatprep.subr.bf16.mxu0 %v437_v17  ;;  %v447_v25 = vpack.c.bf16 %v42_v23, %v34_v21  ;;  %v23_v27 = vld [vmem:[%s656_s1 + $0x38] sm:$0xff]  ;;  %v449_v29 = vpack.c.bf16 %v29_v26, %v21_v24  ;;  %v20_v31 = vld [vmem:[%s656_s1 + $0x20] sm:$0xff]  ;;  %v22_v33 = vld [vmem:[%s656_s1 + $0x30] sm:$0xff]  ;;  %v80_v9 = vsub.s32 7, %v51_v52 }
   0x8   :  { %446 = vmatprep.subr.bf16.mxu1 %v445_v18  ;;  %v31_v28 = vld [vmem:[%s656_s1 + $0x78] sm:$0xff]  ;;  %v28_v32 = vld [vmem:[%s656_s1 + $0x60] sm:$0xff]  ;;  %v30_v36 = vld [vmem:[%s656_s1 + $0x70] sm:$0xff] }
   0x9   :  { %v457_v30 = vpack.c.bf16 %v31_v28, %v23_v27  ;;  %v14_v34 = vld [vmem:[%s657_s0] sm:$0xff]  ;;  %v451_v35 = vpack.c.bf16 %v28_v32, %v20_v31  ;;  %v37_v37 = vld [vmem:[%s656_s1 + $0xa8] sm:$0xff]  ;;  %v459_v38 = vpack.c.bf16 %v30_v36, %v22_v33  ;;  %v39_v40 = vld [vmem:[%s656_s1 + $0xb8] sm:$0xff] }
   0xa   :  { %440 = vmatpush1.bf16.msra.mxu0 %v439_v22  ;;  %v45_v39 = vld [vmem:[%s656_s1 + $0xe8] sm:$0xff]  ;;  %v47_v41 = vld [vmem:[%s656_s1 + $0xf8] sm:$0xff]  ;;  %v36_v43 = vld [vmem:[%s656_s1 + $0xa0] sm:$0xff] }
   0xb   :  { %448 = vmatpush1.bf16.msra.mxu1 %v447_v25  ;;  %450 = vmatprep.subr.bf16.mxu0 %v449_v29  ;;  %v453_v42 = vpack.c.bf16 %v45_v39, %v37_v37  ;;  %v44_v44 = vld [vmem:[%s656_s1 + $0xe0] sm:$0xff]  ;;  %v38_v45 = vld [vmem:[%s656_s1 + $0xb0] sm:$0xff]  ;;  %v461_v46 = vpack.c.bf16 %v47_v41, %v39_v40  ;;  %v15_v48 = vld [vmem:[%s657_s0 + $0x8] sm:$0xff] }
   0xc   :  { %458 = vmatprep.subr.bf16.mxu1 %v457_v30  ;;  %v46_v47 = vld [vmem:[%s656_s1 + $0xf0] sm:$0xff]  ;;  %v455_v49 = vpack.c.bf16 %v44_v44, %v36_v43  ;;  %v48_v54 = vld [vmem:[%s658_s2] sm:$0xff] }
   0xd   :  { %425 = vmatmul.mubr.msk.f32.vlgmr.msra.gmra.mrb[0].mxu0 %vm90_vm0, %v14_v34  ;;  %v463_v50 = vpack.c.bf16 %v46_v47, %v38_v45  ;;  %v53_v58 = vrot.slane %v48_v54, %v52_v53  ;;  %v61_v59 = vrot.slane %v48_v54, %v60_v55  ;;  %v57_v60 = vrot.slane %v48_v54, %v56_v56 }
   0xe   :  { %427 = vmatmul.mubr.msk.f32.vlgmr.msra.gmra.mrb[0].mxu1 %vm90_vm0, %v14_v34  ;;  %452 = vmatpush1.bf16.msra.mxu0 %v451_v35  ;;  %v65_v61 = vrot.slane %v48_v54, %v64_v57  ;;  %v69_v14 = vrot.slane %v48_v54, %v68_v2  ;;  %v77_v18 = vrot.slane %v48_v54, %v76_v6 }
   0xf   :  { %460 = vmatpush1.bf16.msra.mxu1 %v459_v38  ;;  %167 = vmatprep.mubr.f32.mxu0 %v466_v3  ;;  %v73_v19 = vrot.slane %v48_v54, %v72_v7  ;;  %v81_v21 = vrot.slane %v48_v54, %v80_v9 }
  0x10   :  { %244 = vmatprep.mubr.f32.mxu1 %v466_v3  ;;  %454 = vmatprep.subr.bf16.mxu0 %v453_v42 }
  0x11   :  { %426 = vmatmul.mubr.msk.f32.gmra.mrb[2].mxu0 %vm90_vm0, %v15_v48  ;;  %462 = vmatprep.subr.bf16.mxu1 %v461_v46 }
  0x12   :  { %428 = vmatmul.mubr.msk.f32.gmra.mrb[2].mxu1 %vm90_vm0, %v15_v48  ;;  %456 = vmatpush1.bf16.msra.mxu0 %v455_v49 }
  0x13   :  { %464 = vmatpush1.bf16.msra.mxu1 %v463_v50  ;;  %315 = vmatprep.mubr.f32.mxu0 %v466_v3 }
  0x14   :  { %392 = vmatprep.mubr.f32.mxu1 %v466_v3 }
  0x15   :  { %429 = vmatmul.mubr.msk.f32.vlgmr.msra.gmra.mrb[4].mxu0 %vm90_vm0, %v14_v34 }
  0x16   :  { %431 = vmatmul.mubr.msk.f32.vlgmr.msra.gmra.mrb[4].mxu1 %vm90_vm0, %v14_v34  ;;  %321 = vmatprep.mubr.f32.mxu0 %v466_v3 }
  0x17   :  { %398 = vmatprep.mubr.f32.mxu1 %v466_v3 }
  0x19   :  { %430 = vmatmul.mubr.msk.f32.gmra.mrb[6].mxu0 %vm90_vm0, %v15_v48 }
  0x1a   :  { %432 = vmatmul.mubr.msk.f32.gmra.mrb[6].mxu1 %vm90_vm0, %v15_v48 }
  0xe0   :  { %v163_v62 = vpop.f32.mrb[0].mxu0 }
  0xe1   :  { %v164_v63 = vadd.f32 %v163_v62, %v53_v58  ;;  %v240_v0 = vpop.f32.mrb[0].mxu1  ;;  %v165_v1 = vpop.f32.mrb[1].mxu0 }
  0xe2   :  { %v241_v3 = vadd.f32 %v240_v0, %v61_v59  ;;  %v166_v4 = vadd.f32 %v165_v1, %v57_v60  ;;  %v242_v5 = vpop.f32.mrb[1].mxu1 }
  0xe3   :  { %405 = vst [vmem:[%s659_s3] sm:$0xff] %v164_v63  ;;  %v243_v8 = vadd.f32 %v242_v5, %v65_v61 }
  0xe4   :  { %407 = vst [vmem:[%s659_s3 + $0x10] sm:$0xff] %v241_v3  ;;  %406 = vst [vmem:[%s659_s3 + $0x8] sm:$0xff] %v166_v4  ;;  %v169_v10 = vpop.f32.mrb[2].mxu0 }
  0xe5   :  { %408 = vst [vmem:[%s659_s3 + $0x18] sm:$0xff] %v243_v8  ;;  %v170_v11 = vadd.f32 %v169_v10, %v53_v58  ;;  %v246_v12 = vpop.f32.mrb[2].mxu1  ;;  %v171_v13 = vpop.f32.mrb[3].mxu0 }
  0xe6   :  { %v247_v15 = vadd.f32 %v246_v12, %v61_v59  ;;  %v172_v16 = vadd.f32 %v171_v13, %v57_v60  ;;  %v248_v17 = vpop.f32.mrb[3].mxu1 }
  0xe7   :  { %413 = vst [vmem:[%s659_s3 + $0x40] sm:$0xff] %v170_v11  ;;  %v249_v20 = vadd.f32 %v248_v17, %v65_v61 }
  0xe8   :  { %415 = vst [vmem:[%s659_s3 + $0x50] sm:$0xff] %v247_v15  ;;  %414 = vst [vmem:[%s659_s3 + $0x48] sm:$0xff] %v172_v16  ;;  %v317_v22 = vpop.f32.mrb[4].mxu0 }
  0xe9   :  { %416 = vst [vmem:[%s659_s3 + $0x58] sm:$0xff] %v249_v20  ;;  %v318_v23 = vadd.f32 %v317_v22, %v69_v14  ;;  %v394_v24 = vpop.f32.mrb[4].mxu1  ;;  %v319_v25 = vpop.f32.mrb[5].mxu0 }
  0xea   :  { %v395_v26 = vadd.f32 %v394_v24, %v77_v18  ;;  %v320_v27 = vadd.f32 %v319_v25, %v73_v19  ;;  %v396_v28 = vpop.f32.mrb[5].mxu1 }
  0xeb   :  { %409 = vst [vmem:[%s659_s3 + $0x20] sm:$0xff] %v318_v23  ;;  %v397_v29 = vadd.f32 %v396_v28, %v81_v21 }
  0xec   :  { %411 = vst [vmem:[%s659_s3 + $0x30] sm:$0xff] %v395_v26  ;;  %410 = vst [vmem:[%s659_s3 + $0x28] sm:$0xff] %v320_v27  ;;  %v323_v30 = vpop.f32.mrb[6].mxu0 }
  0xed   :  { %412 = vst [vmem:[%s659_s3 + $0x38] sm:$0xff] %v397_v29  ;;  %v324_v31 = vadd.f32 %v323_v30, %v69_v14  ;;  %v400_v32 = vpop.f32.mrb[6].mxu1  ;;  %v325_v33 = vpop.f32.mrb[7].mxu0 }
  0xee   :  { %v401_v34 = vadd.f32 %v400_v32, %v77_v18  ;;  %v326_v35 = vadd.f32 %v325_v33, %v73_v19  ;;  %v402_v36 = vpop.f32.mrb[7].mxu1 }
  0xef   :  { %417 = vst [vmem:[%s659_s3 + $0x60] sm:$0xff] %v324_v31  ;;  %v403_v37 = vadd.f32 %v402_v36, %v81_v21 }
  0xf0   :  { %419 = vst [vmem:[%s659_s3 + $0x70] sm:$0xff] %v401_v34  ;;  %418 = vst [vmem:[%s659_s3 + $0x68] sm:$0xff] %v326_v35 }
  0xf1   :  { %420 = vst [vmem:[%s659_s3 + $0x78] sm:$0xff] %v403_v37 }

// kernel: deeplight_forward.5
= control target key start
LH: loop header
LB: loop body
LE: loop exit
PB: predicated region body
PF: predicated region fallthrough
CT: control target
= control target key end

     0   :  { %s820_s9 = smov 0   ;;  %s822_s10 = smov 0   ;;  %s949_s0 = inlined_call_operand.vmem [shape: f32[2,4,4,512], index: 0, kind: input, shape index: {}]   ;;  %s950_s1 = inlined_call_operand.vmem [shape: f32[2,128,512], index: 1, kind: input, shape index: {}]   ;;  %s951_s2 = inlined_call_operand.vmem [shape: f32[2,4,4,40], index: 2, kind: output, shape index: {}]  }
   0x1   :  { %s824_s11 = smov 0  }
   0x2 LB: > { %s24_s12 = sadd.s32 1, %s793_s10  ;;  %p639_p0 = scmp.ge.s32.totalorder %s797_s11, 1  ;;  %s797_s11 = sphi %s824_s11, %s12_s11   ;;  %s793_s10 = sphi %s822_s10, %s953_s10   ;;  %s789_s9 = sphi %s820_s9, %s952_s9  }
   0x3   : > { %p26_p1 = scmp.ge.s32.totalorder %s24_s12, 2  ;;  %p162_p2 = scmp.lt.s32.totalorder %s797_s11, 3 }
   0x5   : > { %s955_s12 = smov (%p26_p1, %s24_s12), 0  ;;  %p163_p3 = pnand %p639_p0, %p162_p2 }
   0x6   : > { %p208_p4 = scmp.lt.s32.totalorder (!%p163_p3), %s789_s9, 1  ;;  %p248_p5 = scmp.eq.s32.totalorder (!%p163_p3), %s789_s9, 1  ;;  %v803_v0 = vmov (!%p163_p3), 0.0  }
   0x7   : > { %166 = sbr.rel (%p163_p3) target bundleno = 319 (0x13f), region = 28  ;;  %246 = vst [vmem:[#allocation2] sm:$0xf] (!%p163_p3), %v803_v0  ;;  %247 = vst [vmem:[#allocation3] sm:$0xf] (!%p163_p3), %v803_v0  ;;  %s858_s26 = smov (!%p163_p3), 0  }
   0xe   : > { %s209_s13 = scalar_select %p208_p4, %s789_s9, 1 }
  0x10   : > { %s653_s14 = sshll.u32 %s209_s13, 6  ;;  %s654_s15 = sshll.u32 %s209_s13, 9 }
  0x11   : > { %s846_s18 = scalar_lea.vmem %s949_s0, %s653_s14  ;;  %s851_s21 = scalar_lea.vmem %s950_s1, %s654_s15 }
  0x12   : > { %s655_s22 = sshll.u32 %s209_s13, 4 }
  0x13   : > { %s856_s25 = scalar_lea.vmem %s951_s2, %s655_s22 }
  0x14 LB: >> { %v264_v1 = vld [vmem:[%s851_s21 + $0x8] sm:$0xff]  ;;  %v263_v3 = vld [vmem:[%s851_s21] sm:$0xff]  ;;  %v804_v8 = vmov 0.0   ;;  %v266_v20 = vld [vmem:[%s851_s21 + $0x18] sm:$0xff]  ;;  %s255_s27 = ssub.s32 3, %s801_s26  ;;  %vm513_vm0 = vcmask 322560   ;;  %s801_s26 = sphi %s858_s26, %s254_s26  }
  0x15   : >> { %v268_v2 = vld [vmem:[%s851_s21 + $0x28] sm:$0xff]  ;;  %v267_v5 = vld [vmem:[%s851_s21 + $0x20] sm:$0xff]  ;;  %391 = vmatprep.mubr.f32.mxu0 %v804_v8  ;;  %462 = vmatprep.mubr.f32.mxu1 %v804_v8  ;;  %v270_v21 = vld [vmem:[%s851_s21 + $0x38] sm:$0xff]  ;;  %s957_s27 = smov (!%p248_p5, %s255_s27), %s801_s26  ;;  %s254_s26 = sadd.s32 1, %s801_s26  }
  0x16   : >> { %v657_v4 = vpack.c.bf16 %v268_v2, %v264_v1  ;;  %v272_v6 = vld [vmem:[%s851_s21 + $0x48] sm:$0xff]  ;;  %v659_v9 = vpack.c.bf16 %v267_v5, %v263_v3  ;;  %v271_v11 = vld [vmem:[%s851_s21 + $0x40] sm:$0xff]  ;;  %v689_v23 = vpack.c.bf16 %v270_v21, %v266_v20  ;;  %v265_v24 = vld [vmem:[%s851_s21 + $0x10] sm:$0xff]  ;;  %s656_s28 = sshll.u32 %s957_s27, 4  ;;  %s646_s30 = sshll.u32 %s957_s27, 2 }
  0x17   : >> { %v276_v7 = vld [vmem:[%s851_s21 + $0x68] sm:$0xff]  ;;  %v275_v12 = vld [vmem:[%s851_s21 + $0x60] sm:$0xff]  ;;  %v269_v25 = vld [vmem:[%s851_s21 + $0x30] sm:$0xff]  ;;  %s259_s29 = scalar_lea.vmem %s846_s18, %s656_s28  ;;  %s512_s3 = scalar_lea.vmem %s856_s25, %s646_s30 }
  0x18   : >> { %v661_v10 = vpack.c.bf16 %v276_v7, %v272_v6  ;;  %v280_v13 = vld [vmem:[%s851_s21 + $0x88] sm:$0xff]  ;;  %658 = vmatprep.subr.bf16.mxu0 %v657_v4  ;;  %v663_v15 = vpack.c.bf16 %v275_v12, %v271_v11  ;;  %v279_v16 = vld [vmem:[%s851_s21 + $0x80] sm:$0xff]  ;;  %v691_v26 = vpack.c.bf16 %v269_v25, %v265_v24  ;;  %690 = vmatprep.subr.bf16.mxu1 %v689_v23  ;;  %v274_v28 = vld [vmem:[%s851_s21 + $0x58] sm:$0xff]  ;;  %p251_p6 = scmp.ge.s32.totalorder %s254_s26, 4  }
  0x19   : >> { %v284_v14 = vld [vmem:[%s851_s21 + $0xa8] sm:$0xff]  ;;  %660 = vmatpush1.bf16.msra.mxu0 %v659_v9  ;;  %v283_v17 = vld [vmem:[%s851_s21 + $0xa0] sm:$0xff]  ;;  %v278_v29 = vld [vmem:[%s851_s21 + $0x78] sm:$0xff] }
  0x1a   : >> { %662 = vmatprep.subr.bf16.mxu0 %v661_v10  ;;  %v665_v18 = vpack.c.bf16 %v284_v14, %v280_v13  ;;  %v288_v19 = vld [vmem:[%s851_s21 + $0xc8] sm:$0xff]  ;;  %v667_v27 = vpack.c.bf16 %v283_v17, %v279_v16  ;;  %v273_v30 = vld [vmem:[%s851_s21 + $0x50] sm:$0xff]  ;;  %v287_v32 = vld [vmem:[%s851_s21 + $0xc0] sm:$0xff]  ;;  %692 = vmatpush1.bf16.msra.mxu1 %v691_v26  ;;  %v693_v34 = vpack.c.bf16 %v278_v29, %v274_v28 }
  0x1b   : >> { %v292_v22 = vld [vmem:[%s851_s21 + $0xe8] sm:$0xff]  ;;  %v291_v33 = vld [vmem:[%s851_s21 + $0xe0] sm:$0xff]  ;;  %v277_v35 = vld [vmem:[%s851_s21 + $0x70] sm:$0xff] }
  0x1c   : >> { %v669_v31 = vpack.c.bf16 %v292_v22, %v288_v19  ;;  %v296_v36 = vld [vmem:[%s851_s21 + $0x108] sm:$0xff]  ;;  %v695_v38 = vpack.c.bf16 %v277_v35, %v273_v30  ;;  %v282_v39 = vld [vmem:[%s851_s21 + $0x98] sm:$0xff]  ;;  %694 = vmatprep.subr.bf16.mxu1 %v693_v34  ;;  %v281_v41 = vld [vmem:[%s851_s21 + $0x90] sm:$0xff]  ;;  %v671_v43 = vpack.c.bf16 %v291_v33, %v287_v32 }
  0x1d   : >> { %664 = vmatpush1.bf16.msra.mxu0 %v663_v15  ;;  %v300_v37 = vld [vmem:[%s851_s21 + $0x128] sm:$0xff]  ;;  %v286_v40 = vld [vmem:[%s851_s21 + $0xb8] sm:$0xff]  ;;  %v285_v42 = vld [vmem:[%s851_s21 + $0xb0] sm:$0xff] }
  0x1e   : >> { %666 = vmatprep.subr.bf16.mxu0 %v665_v18  ;;  %v295_v44 = vld [vmem:[%s851_s21 + $0x100] sm:$0xff]  ;;  %v697_v46 = vpack.c.bf16 %v286_v40, %v282_v39  ;;  %v673_v47 = vpack.c.bf16 %v300_v37, %v296_v36  ;;  %696 = vmatpush1.bf16.msra.mxu1 %v695_v38  ;;  %v304_v48 = vld [vmem:[%s851_s21 + $0x148] sm:$0xff]  ;;  %v699_v49 = vpack.c.bf16 %v285_v42, %v281_v41  ;;  %v290_v50 = vld [vmem:[%s851_s21 + $0xd8] sm:$0xff] }
  0x1f   : >> { %v299_v45 = vld [vmem:[%s851_s21 + $0x120] sm:$0xff]  ;;  %v294_v51 = vld [vmem:[%s851_s21 + $0xf8] sm:$0xff]  ;;  %v308_v52 = vld [vmem:[%s851_s21 + $0x168] sm:$0xff] }
  0x20   : >> { %698 = vmatprep.subr.bf16.mxu1 %v697_v46  ;;  %v701_v53 = vpack.c.bf16 %v294_v51, %v290_v50  ;;  %v289_v54 = vld [vmem:[%s851_s21 + $0xd0] sm:$0xff]  ;;  %v675_v56 = vpack.c.bf16 %v299_v45, %v295_v44  ;;  %v298_v57 = vld [vmem:[%s851_s21 + $0x118] sm:$0xff]  ;;  %v677_v59 = vpack.c.bf16 %v308_v52, %v304_v48  ;;  %v303_v60 = vld [vmem:[%s851_s21 + $0x140] sm:$0xff] }
  0x21   : >> { %668 = vmatpush1.bf16.msra.mxu0 %v667_v27  ;;  %v293_v55 = vld [vmem:[%s851_s21 + $0xf0] sm:$0xff]  ;;  %v302_v58 = vld [vmem:[%s851_s21 + $0x138] sm:$0xff]  ;;  %v307_v61 = vld [vmem:[%s851_s21 + $0x160] sm:$0xff] }
  0x22   : >> { %670 = vmatprep.subr.bf16.mxu0 %v669_v31  ;;  %700 = vmatpush1.bf16.msra.mxu1 %v699_v49  ;;  %v312_v62 = vld [vmem:[%s851_s21 + $0x188] sm:$0xff]  ;;  %v703_v63 = vpack.c.bf16 %v293_v55, %v289_v54  ;;  %v705_v1 = vpack.c.bf16 %v302_v58, %v298_v57  ;;  %v297_v2 = vld [vmem:[%s851_s21 + $0x110] sm:$0xff]  ;;  %v306_v4 = vld [vmem:[%s851_s21 + $0x158] sm:$0xff]  ;;  %v679_v6 = vpack.c.bf16 %v307_v61, %v303_v60 }
  0x23   : >> { %v316_v0 = vld [vmem:[%s851_s21 + $0x1a8] sm:$0xff]  ;;  %702 = vmatprep.subr.bf16.mxu1 %v701_v53  ;;  %v301_v3 = vld [vmem:[%s851_s21 + $0x130] sm:$0xff]  ;;  %v310_v5 = vld [vmem:[%s851_s21 + $0x178] sm:$0xff] }
  0x24   : >> { %v681_v7 = vpack.c.bf16 %v316_v0, %v312_v62  ;;  %v311_v8 = vld [vmem:[%s851_s21 + $0x180] sm:$0xff]  ;;  %v320_v10 = vld [vmem:[%s851_s21 + $0x1c8] sm:$0xff]  ;;  %v707_v11 = vpack.c.bf16 %v301_v3, %v297_v2  ;;  %v709_v13 = vpack.c.bf16 %v310_v5, %v306_v4  ;;  %v305_v14 = vld [vmem:[%s851_s21 + $0x150] sm:$0xff] }
  0x25   : >> { %672 = vmatpush1.bf16.msra.mxu0 %v671_v43  ;;  %v315_v9 = vld [vmem:[%s851_s21 + $0x1a0] sm:$0xff]  ;;  %v324_v12 = vld [vmem:[%s851_s21 + $0x1e8] sm:$0xff]  ;;  %v309_v15 = vld [vmem:[%s851_s21 + $0x170] sm:$0xff] }
  0x26   : >> { %674 = vmatprep.subr.bf16.mxu0 %v673_v47  ;;  %704 = vmatpush1.bf16.msra.mxu1 %v703_v63  ;;  %v314_v16 = vld [vmem:[%s851_s21 + $0x198] sm:$0xff]  ;;  %v683_v18 = vpack.c.bf16 %v315_v9, %v311_v8  ;;  %v685_v19 = vpack.c.bf16 %v324_v12, %v320_v10  ;;  %v319_v20 = vld [vmem:[%s851_s21 + $0x1c0] sm:$0xff]  ;;  %v711_v22 = vpack.c.bf16 %v309_v15, %v305_v14  ;;  %v313_v24 = vld [vmem:[%s851_s21 + $0x190] sm:$0xff] }
  0x27   : >> { %706 = vmatprep.subr.bf16.mxu1 %v705_v1  ;;  %v318_v17 = vld [vmem:[%s851_s21 + $0x1b8] sm:$0xff]  ;;  %v323_v21 = vld [vmem:[%s851_s21 + $0x1e0] sm:$0xff]  ;;  %v317_v25 = vld [vmem:[%s851_s21 + $0x1b0] sm:$0xff] }
  0x28   : >> { %v713_v23 = vpack.c.bf16 %v318_v17, %v314_v16  ;;  %v322_v26 = vld [vmem:[%s851_s21 + $0x1d8] sm:$0xff]  ;;  %v687_v28 = vpack.c.bf16 %v323_v21, %v319_v20  ;;  %v715_v29 = vpack.c.bf16 %v317_v25, %v313_v24  ;;  %v321_v31 = vld [vmem:[%s851_s21 + $0x1d0] sm:$0xff]  ;;  %v262_v33 = vld [vmem:[#allocation2] sm:$0xf] }
  0x29   : >> { %676 = vmatpush1.bf16.msra.mxu0 %v675_v56  ;;  %v326_v27 = vld [vmem:[%s851_s21 + $0x1f8] sm:$0xff]  ;;  %v325_v32 = vld [vmem:[%s851_s21 + $0x1f0] sm:$0xff]  ;;  %v260_v36 = vld [vmem:[%s259_s29] sm:$0xff] }
  0x2a   : >> { %678 = vmatprep.subr.bf16.mxu0 %v677_v59  ;;  %708 = vmatpush1.bf16.msra.mxu1 %v707_v11  ;;  %v717_v30 = vpack.c.bf16 %v326_v27, %v322_v26  ;;  %v719_v34 = vpack.c.bf16 %v325_v32, %v321_v31  ;;  %v261_v43 = vld [vmem:[%s259_s29 + $0x8] sm:$0xff]  ;;  %v504_v57 = vld [vmem:[#allocation3] sm:$0xf] }
  0x2b   : >> { %710 = vmatprep.subr.bf16.mxu1 %v709_v13 }
  0x2d   : >> { %680 = vmatpush1.bf16.msra.mxu0 %v679_v6 }
  0x2e   : >> { %682 = vmatprep.subr.bf16.mxu0 %v681_v7  ;;  %712 = vmatpush1.bf16.msra.mxu1 %v711_v22 }
  0x2f   : >> { %714 = vmatprep.subr.bf16.mxu1 %v713_v23 }
  0x31   : >> { %684 = vmatpush1.bf16.msra.mxu0 %v683_v18 }
  0x32   : >> { %686 = vmatprep.subr.bf16.mxu0 %v685_v19  ;;  %716 = vmatpush1.bf16.msra.mxu1 %v715_v29 }
  0x33   : >> { %718 = vmatprep.subr.bf16.mxu1 %v717_v30 }
  0x35   : >> { %688 = vmatpush1.bf16.msra.mxu0 %v687_v28 }
  0x36   : >> { %720 = vmatpush1.bf16.msra.mxu1 %v719_v34 }
  0x38   : >> { %392 = vmatmul.mubr.f32.vlgmr.msra.gmra.mrb[0].mxu0 %v262_v33 }
  0x39   : >> { %463 = vmatmul.mubr.f32.vlgmr.msra.gmra.mrb[0].mxu1 %v262_v33 }
 0x10b   : >> { %v393_v35 = vpop.f32.mrb[0].mxu0 }
 0x10c   : >> { %v395_v37 = vpop.f32.mrb[1].mxu0  ;;  %v464_v40 = vpop.f32.mrb[0].mxu1 }
 0x10d   : >> { %v473_v38 = vcombine.low %v393_v35, %v395_v37  ;;  %v466_v44 = vpop.f32.mrb[1].mxu1 }
 0x10e   : >> { %v474_v45 = vcombine.low %v464_v40, %v466_v44 }
 0x10f   : >> { %v477_v39 = vadd.f32 %v473_v38, %v260_v36 }
 0x110   : >> { %v478_v47 = vadd.f32 %v474_v45, %v261_v43 }
 0x111   : >> { %v648_v41 = vmul.f32 -1.442695, %v477_v39  ;;  %v486_v42 = vrot.slane %v477_v39, 4 }
 0x112   : >> { %v496_v48 = vrot.slane %v478_v47, 4 }
 0x113   : >> { %755 = vpow2.f32 %v648_v41  ;;  %v649_v46 = vmul.f32 -1.442695, %v486_v42 }
 0x114   : >> { %v650_v49 = vmul.f32 -1.442695, %v496_v48 }
 0x115   : >> { %757 = vpow2.f32 %v649_v46 }
 0x116   : >> { %759 = vtanh.f32 %v478_v47 }
 0x117   : >> { %761 = vpow2.f32 %v650_v49 }
 0x11d   : >> { %v756_v50 = vpop.eup %755 }
 0x11e   : >> { %v482_v51 = vadd.f32 1.0, %v756_v50 }
 0x11f   : >> { %v758_v52 = vpop.eup %757 }
 0x120   : >> { %763 = vrcp.f32 %v482_v51  ;;  %v491_v53 = vadd.f32 1.0, %v758_v52  ;;  %v760_v54 = vpop.eup %759 }
 0x121   : >> { %v762_v55 = vpop.eup %761 }
 0x122   : >> { %765 = vrcp.f32 %v491_v53  ;;  %v501_v58 = vadd.f32 1.0, %v762_v55 }
 0x124   : >> { %767 = vrcp.f32 %v501_v58 }
 0x12a   : >> { %v764_v56 = vpop.eup %763 }
 0x12b   : >> { %v506_v59 = vmul.f32 %v764_v56, %v760_v54 }
 0x12c   : >> { %v766_v60 = vpop.eup %765 }
 0x12d   : >> { %v505_v61 = vmul.f32 %v766_v60, %v504_v57 }
 0x12e   : >> { %v768_v63 = vpop.eup %767 }
 0x12f   : >> { %v507_v62 = vadd.f32 %v506_v59, %v505_v61 }
 0x131   : >> { %769 = vtanh.f32 %v507_v62  ;;  %510 = vst [vmem:[#allocation3] sm:$0xf] %v507_v62 }
 0x138   : > { %253 = sbr.rel (!%p251_p6) target bundleno = 20 (0x14), region = 74 }
 0x13b   : >> { %v770_v0 = vpop.eup %769 }
 0x13c   : >> { %v509_v1 = vmul.f32 %v770_v0, %v768_v63 }
 0x13e   : >> { %511 = vst [vmem:[#allocation2] sm:$0xf] %v509_v1  ;;  %514 = vst.msk [vmem:[%s512_s3] sm:$0xf] %vm513_vm0, %v509_v1 }
 0x13f PF: > { %s12_s11 = sadd.s32 1, %s797_s11   ;;  %s952_s9 = smov %s793_s10 }
 0x140   : > { %p9_p7 = scmp.ge.s32.totalorder %s12_s11, 4   ;;  %s953_s10 = smov %s955_s12 }
 0x142   :  { %11 = sbr.rel (!%p9_p7) target bundleno = 2 (0x2), region = 85 }

// kernel: deeplight_forward.3
= control target key start
LH: loop header
LB: loop body
LE: loop exit
PB: predicated region body
PF: predicated region fallthrough
CT: control target
= control target key end

     0   :  { %vm67_vm0 = vcmask 130048   ;;  %vm4524_vm1 = vcmask 523264   ;;  %vm7457_vm2 = vcmask 261120   ;;  %s14580_s1 = inlined_call_operand.vmem [shape: f32[3,16,128], index: 1, kind: input, shape index: {}]   ;;  %s14581_s0 = inlined_call_operand.vmem [shape: f32[16,16,16], index: 0, kind: input, shape index: {}]   ;;  %s14582_s2 = inlined_call_operand.vmem [shape: f32[3,128,128], index: 2, kind: input, shape index: {}]   ;;  %s14583_s9 = inlined_call_operand.vmem [shape: f32[1,128], index: 9, kind: input, shape index: {}]   ;;  %s14584_s3 = inlined_call_operand.vmem [shape: f32[3,128,64], index: 3, kind: input, shape index: {}]   ;;  %s14585_s10 = inlined_call_operand.vmem [shape: f32[1,128], index: 10, kind: input, shape index: {}]   ;;  %s14586_s4 = inlined_call_operand.vmem [shape: f32[3,64,64], index: 4, kind: input, shape index: {}]   ;;  %s14587_s11 = inlined_call_operand.vmem [shape: f32[1,64], index: 11, kind: input, shape index: {}]   ;;  %s14588_s5 = inlined_call_operand.vmem [shape: f32[3,64,64], index: 5, kind: input, shape index: {}]   ;;  %s14589_s12 = inlined_call_operand.vmem [shape: f32[1,64], index: 12, kind: input, shape index: {}]   ;;  %s14590_s6 = inlined_call_operand.vmem [shape: f32[3,64,64], index: 6, kind: input, shape index: {}]   ;;  %s14591_s13 = inlined_call_operand.vmem [shape: f32[1,64], index: 13, kind: input, shape index: {}]   ;;  %s14592_s7 = inlined_call_operand.vmem [shape: f32[3,64,32], index: 7, kind: input, shape index: {}]   ;;  %s14593_s14 = inlined_call_operand.vmem [shape: f32[1,64], index: 14, kind: input, shape index: {}]   ;;  %s14594_s8 = inlined_call_operand.vmem [shape: f32[3,32,32], index: 8, kind: input, shape index: {}]   ;;  %s14595_s15 = inlined_call_operand.vmem [shape: f32[1,32], index: 15, kind: input, shape index: {}]   ;;  %s14596_s16 = inlined_call_operand.vmem [shape: f32[1,32], index: 16, kind: input, shape index: {}]   ;;  %s14597_s17 = inlined_call_operand.vmem [shape: f32[1,16,32], index: 17, kind: output, shape index: {}]  }
   0x1   :  { %14600 = sst [smem:[#allocation9_spill]] %s14580_s1  ;;  %v7709_v37 = vld [vmem:[%s14582_s2 + $0x100] sm:$0xff]  ;;  %v7710_v38 = vld [vmem:[%s14582_s2 + $0x108] sm:$0xff]  ;;  %v7711_v43 = vld [vmem:[%s14582_s2 + $0x110] sm:$0xff] }
   0x2   :  { %14601 = sst [smem:[#allocation10_spill]] %s14581_s0  ;;  %s14602_s26 = sld [smem:[#allocation9_spill]]  ;;  %v12763_v40 = vpack.c.bf16 %v7710_v38, %v7709_v37  ;;  %v7726_v41 = vld [vmem:[%s14582_s2 + $0x80] sm:$0xff]  ;;  %v7727_v42 = vld [vmem:[%s14582_s2 + $0x88] sm:$0xff]  ;;  %v7712_v44 = vld [vmem:[%s14582_s2 + $0x118] sm:$0xff] }
   0x3   :  { %s14603_s30 = sld [smem:[#allocation10_spill]]  ;;  %v12787_v46 = vpack.c.bf16 %v7727_v42, %v7726_v41  ;;  %v12793_v48 = vpack.c.bf16 %v7712_v44, %v7711_v43  ;;  %v7713_v49 = vld [vmem:[%s14582_s2 + $0x120] sm:$0xff]  ;;  %v7714_v50 = vld [vmem:[%s14582_s2 + $0x128] sm:$0xff]  ;;  %v7728_v51 = vld [vmem:[%s14582_s2 + $0x90] sm:$0xff] }
   0x4   :  { %v7729_v52 = vld [vmem:[%s14582_s2 + $0x98] sm:$0xff]  ;;  %v12813_v53 = vpack.c.bf16 %v7714_v50, %v7713_v49  ;;  %v7715_v55 = vld [vmem:[%s14582_s2 + $0x130] sm:$0xff]  ;;  %v7730_v58 = vld [vmem:[%s14582_s2 + $0xa0] sm:$0xff] }
   0x5   :  { %v7716_v56 = vld [vmem:[%s14582_s2 + $0x138] sm:$0xff]  ;;  %v12824_v57 = vpack.c.bf16 %v7729_v52, %v7728_v51  ;;  %v7731_v59 = vld [vmem:[%s14582_s2 + $0xa8] sm:$0xff]  ;;  %v7717_v61 = vld [vmem:[%s14582_s2 + $0x140] sm:$0xff] }
   0x6   :  { %v12835_v60 = vpack.c.bf16 %v7716_v56, %v7715_v55  ;;  %v7718_v62 = vld [vmem:[%s14582_s2 + $0x148] sm:$0xff]  ;;  %v12845_v63 = vpack.c.bf16 %v7731_v59, %v7730_v58  ;;  %v2361_v42 = vld [vmem:[%s14582_s2 + $0x20] sm:$0xff]  ;;  %v2364_v49 = vld [vmem:[%s14582_s2 + $0x38] sm:$0xff] }
   0x7   :  { %v2362_v43 = vld [vmem:[%s14582_s2 + $0x28] sm:$0xff]  ;;  %v2365_v51 = vld [vmem:[%s14582_s2 + $0x40] sm:$0xff]  ;;  %v2367_v59 = vld [vmem:[%s14582_s2 + $0x50] sm:$0xff] }
   0x8   :  { %v7578_v0 = vld [vmem:[%s14602_s26 + $0x10] sm:$0xff]  ;;  %v7579_v1 = vld [vmem:[%s14602_s26 + $0x18] sm:$0xff]  ;;  %v245_v4 = vld [vmem:[%s14602_s26] sm:$0xff] }
   0x9   :  { %v7576_v2 = vld [vmem:[%s14603_s30 + $0x20] sm:$0xff]  ;;  %v12574_v3 = vpack.c.bf16 %v7579_v1, %v7578_v0  ;;  %v246_v5 = vld [vmem:[%s14602_s26 + $0x8] sm:$0xff]  ;;  %v7574_v7 = vld [vmem:[%s14603_s30 + $0x10] sm:$0xff] }
   0xa   :  { %9179 = vmatprep.mubr.msk.f32.mxu1 %vm67_vm0, %v7576_v2  ;;  %v12583_v6 = vpack.c.bf16 %v246_v5, %v245_v4  ;;  %v7586_v8 = vld [vmem:[%s14602_s26 + $0x20] sm:$0xff]  ;;  %v7587_v9 = vld [vmem:[%s14602_s26 + $0x28] sm:$0xff]  ;;  %9165 = vmatprep.mubr.msk.f32.mxu0 %vm67_vm0, %v7574_v7  ;;  %v7575_v13 = vld [vmem:[%s14603_s30 + $0x18] sm:$0xff]  ;;  %v12855_v2 = vpack.c.bf16 %v7718_v62, %v7717_v61 }
   0xb   :  { %10896 = vmatprep.subr.bf16.mxu1 %v12574_v3  ;;  %v7577_v10 = vld [vmem:[%s14603_s30 + $0x28] sm:$0xff]  ;;  %v12600_v11 = vpack.c.bf16 %v7587_v9, %v7586_v8  ;;  %v56_v12 = vld [vmem:[%s14603_s30] sm:$0xff]  ;;  %v7584_v14 = vld [vmem:[%s14603_s30 + $0x30] sm:$0xff] }
   0xc   :  { %10898 = vmatpush3.bf16.msra.mxu1 %v12574_v3  ;;  %v57_v15 = vld [vmem:[%s14603_s30 + $0x8] sm:$0xff]  ;;  %v7593_v16 = vld [vmem:[%s14603_s30 + $0x40] sm:$0xff]  ;;  %v7585_v18 = vld [vmem:[%s14603_s30 + $0x38] sm:$0xff] }
   0xd   :  { %10900 = vmatprep.subr.bf16.mxu1 %v12583_v6  ;;  %10888 = vmatprep.subr.bf16.mxu0 %v12600_v11  ;;  %v7594_v17 = vld [vmem:[%s14603_s30 + $0x48] sm:$0xff]  ;;  %v7610_v19 = vld [vmem:[%s14603_s30 + $0x60] sm:$0xff]  ;;  %v7601_v21 = vld [vmem:[%s14603_s30 + $0x50] sm:$0xff] }
   0xe   :  { %10890 = vmatpush3.bf16.msra.mxu0 %v12600_v11  ;;  %v7611_v20 = vld [vmem:[%s14603_s30 + $0x68] sm:$0xff]  ;;  %v7618_v22 = vld [vmem:[%s14603_s30 + $0x70] sm:$0xff]  ;;  %v7602_v23 = vld [vmem:[%s14603_s30 + $0x58] sm:$0xff] }
   0xf   :  { %9180 = vmatmul.mubr.msk.f32.vlgmr.msra.gmra.mrb[0].mxu1 %vm67_vm0, %v7577_v10  ;;  %10892 = vmatprep.subr.bf16.mxu0 %v12574_v3  ;;  %v7627_v24 = vld [vmem:[%s14603_s30 + $0x80] sm:$0xff]  ;;  %v7628_v25 = vld [vmem:[%s14603_s30 + $0x88] sm:$0xff]  ;;  %v7619_v26 = vld [vmem:[%s14603_s30 + $0x78] sm:$0xff] }
  0x10   :  { %10902 = vmatpush3.bf16.msra.mxu1 %v12583_v6  ;;  %9186 = vmatprep.mubr.msk.f32.mxu1 %vm67_vm0, %v7574_v7  ;;  %v7644_v27 = vld [vmem:[%s14603_s30 + $0xa0] sm:$0xff]  ;;  %v7645_v28 = vld [vmem:[%s14603_s30 + $0xa8] sm:$0xff]  ;;  %v7635_v29 = vld [vmem:[%s14603_s30 + $0x90] sm:$0xff] }
  0x11   :  { %10904 = vmatprep.subr.bf16.mxu1 %v12600_v11  ;;  %9166 = vmatmul.mubr.msk.f32.vlgmr.msra.gmra.mrb[0].mxu0 %vm67_vm0, %v7575_v13  ;;  %v7636_v30 = vld [vmem:[%s14603_s30 + $0x98] sm:$0xff]  ;;  %v7661_v31 = vld [vmem:[%s14603_s30 + $0xc0] sm:$0xff]  ;;  %v7659_v32 = vld [vmem:[%s14603_s30 + $0xb0] sm:$0xff] }
  0x12   :  { %10894 = vmatpush3.bf16.msra.mxu0 %v12574_v3  ;;  %9172 = vmatprep.mubr.msk.f32.mxu0 %vm67_vm0, %v56_v12  ;;  %v7662_v33 = vld [vmem:[%s14603_s30 + $0xc8] sm:$0xff]  ;;  %v7678_v34 = vld [vmem:[%s14603_s30 + $0xe0] sm:$0xff]  ;;  %v7660_v35 = vld [vmem:[%s14603_s30 + $0xb8] sm:$0xff] }
  0x13   :  { %10908 = vmatprep.subr.bf16.mxu0 %v12574_v3  ;;  %v7679_v36 = vld [vmem:[%s14603_s30 + $0xe8] sm:$0xff]  ;;  %v7669_v39 = vld [vmem:[%s14603_s30 + $0xd0] sm:$0xff]  ;;  %v7670_v47 = vld [vmem:[%s14603_s30 + $0xd8] sm:$0xff] }
  0x14   :  { %v7686_v45 = vld [vmem:[%s14603_s30 + $0xf0] sm:$0xff]  ;;  %v7687_v54 = vld [vmem:[%s14603_s30 + $0xf8] sm:$0xff]  ;;  %v7735_v7 = vld [vmem:[%s14582_s2 + $0xc8] sm:$0xff] }
  0x15   :  { %v7732_v0 = vld [vmem:[%s14582_s2 + $0xb0] sm:$0xff]  ;;  %v7733_v1 = vld [vmem:[%s14582_s2 + $0xb8] sm:$0xff]  ;;  %v7721_v9 = vld [vmem:[%s14582_s2 + $0x160] sm:$0xff] }
  0x16   :  { %v7720_v4 = vld [vmem:[%s14582_s2 + $0x158] sm:$0xff]  ;;  %v12865_v5 = vpack.c.bf16 %v7733_v1, %v7732_v0  ;;  %v7722_v10 = vld [vmem:[%s14582_s2 + $0x168] sm:$0xff]  ;;  %v7736_v12 = vld [vmem:[%s14582_s2 + $0xd0] sm:$0xff] }
  0x17   :  { %9187 = vmatmul.mubr.msk.f32.vlgmr.msra.gmra.mrb[0].mxu1 %vm67_vm0, %v7575_v13  ;;  %v7737_v13 = vld [vmem:[%s14582_s2 + $0xd8] sm:$0xff]  ;;  %v2366_v52 = vld [vmem:[%s14582_s2 + $0x48] sm:$0xff]  ;;  %v2369_v1 = vld [vmem:[%s14582_s2 + $0x60] sm:$0xff] }
  0x18   :  { %10906 = vmatpush3.bf16.msra.mxu1 %v12600_v11  ;;  %9193 = vmatprep.mubr.msk.f32.mxu1 %vm67_vm0, %v7584_v14  ;;  %v13010_v58 = vpack.c.bf16 %v2366_v52, %v2365_v51  ;;  %v2368_v61 = vld [vmem:[%s14582_s2 + $0x58] sm:$0xff]  ;;  %v7870_v51 = vld [vmem:[%s14582_s2 + $0xe0] sm:$0xff]  ;;  %v7871_v52 = vld [vmem:[%s14582_s2 + $0xe8] sm:$0xff] }
  0x19   :  { %10920 = vmatprep.subr.bf16.mxu1 %v12574_v3  ;;  %9173 = vmatmul.mubr.msk.f32.vlgmr.msra.gmra.mrb[0].mxu0 %vm67_vm0, %v57_v15  ;;  %v12899_v15 = vpack.c.bf16 %v7737_v13, %v7736_v12  ;;  %v13022_v62 = vpack.c.bf16 %v2368_v61, %v2367_v59  ;;  %v2372_v12 = vld [vmem:[%s14582_s2 + $0x78] sm:$0xff]  ;;  %v7842_v59 = vld [vmem:[%s14582_s2 + $0x108] sm:$0xff]  ;;  %v3537_v61 = vld [vmem:[%s14582_s2] sm:$0xff] }
  0x1a   :  { %10910 = vmatpush3.bf16.msra.mxu0 %v12574_v3  ;;  %9200 = vmatprep.mubr.msk.f32.mxu0 %vm67_vm0, %v7593_v16  ;;  %v7738_v16 = vld [vmem:[%s14582_s2 + $0xe0] sm:$0xff] }
  0x1b   :  { %10912 = vmatprep.subr.bf16.mxu0 %v12583_v6 }
  0x1d   :  { %9201 = vmatmul.mubr.msk.f32.vlgmr.msra.gmra.mrb[2].mxu0 %vm67_vm0, %v7594_v17  ;;  %v7739_v17 = vld [vmem:[%s14582_s2 + $0xe8] sm:$0xff] }
  0x1e   :  { %10914 = vmatpush3.bf16.msra.mxu0 %v12583_v6  ;;  %9207 = vmatprep.mubr.msk.f32.mxu0 %vm67_vm0, %v7584_v14  ;;  %v12895_v14 = vpack.c.bf16 %v7722_v10, %v7721_v9  ;;  %v2371_v10 = vld [vmem:[%s14582_s2 + $0x70] sm:$0xff] }
  0x1f   :  { %9194 = vmatmul.mubr.msk.f32.vlgmr.msra.gmra.mrb[0].mxu1 %vm67_vm0, %v7585_v18  ;;  %10916 = vmatprep.subr.bf16.mxu0 %v12600_v11  ;;  %v13052_v13 = vpack.c.bf16 %v2372_v12, %v2371_v10 }
  0x20   :  { %10922 = vmatpush3.bf16.msra.mxu1 %v12574_v3  ;;  %9221 = vmatprep.mubr.msk.f32.mxu1 %vm67_vm0, %v7610_v19  ;;  %v7723_v19 = vld [vmem:[%s14582_s2 + $0x170] sm:$0xff] }
  0x21   :  { %10924 = vmatprep.subr.bf16.mxu1 %v12583_v6 }
  0x23   :  { %9222 = vmatmul.mubr.msk.f32.vlgmr.msra.gmra.mrb[2].mxu1 %vm67_vm0, %v7611_v20  ;;  %v7724_v20 = vld [vmem:[%s14582_s2 + $0x178] sm:$0xff] }
  0x24   :  { %10926 = vmatpush3.bf16.msra.mxu1 %v12583_v6  ;;  %9228 = vmatprep.mubr.msk.f32.mxu1 %vm67_vm0, %v7601_v21 }
  0x25   :  { %9208 = vmatmul.mubr.msk.f32.vlgmr.msra.gmra.mrb[2].mxu0 %vm67_vm0, %v7585_v18  ;;  %10928 = vmatprep.subr.bf16.mxu1 %v12600_v11  ;;  %v12911_v18 = vpack.c.bf16 %v7739_v17, %v7738_v16 }
  0x26   :  { %10918 = vmatpush3.bf16.msra.mxu0 %v12600_v11  ;;  %9214 = vmatprep.mubr.msk.f32.mxu0 %vm67_vm0, %v7601_v21  ;;  %v7740_v21 = vld [vmem:[%s14582_s2 + $0xf0] sm:$0xff] }
  0x27   :  { %10932 = vmatprep.subr.bf16.mxu0 %v12574_v3 }
  0x2b   :  { %9229 = vmatmul.mubr.msk.f32.vlgmr.msra.gmra.mrb[2].mxu1 %vm67_vm0, %v7602_v23 }
  0x2c   :  { %10930 = vmatpush3.bf16.msra.mxu1 %v12600_v11  ;;  %9235 = vmatprep.mubr.msk.f32.mxu1 %vm67_vm0, %v7618_v22 }
  0x2d   :  { %9215 = vmatmul.mubr.msk.f32.vlgmr.msra.gmra.mrb[2].mxu0 %vm67_vm0, %v7602_v23  ;;  %10944 = vmatprep.subr.bf16.mxu1 %v12574_v3  ;;  %v7741_v23 = vld [vmem:[%s14582_s2 + $0xf8] sm:$0xff] }
  0x2e   :  { %10934 = vmatpush3.bf16.msra.mxu0 %v12574_v3  ;;  %9242 = vmatprep.mubr.msk.f32.mxu0 %vm67_vm0, %v7627_v24  ;;  %v12930_v24 = vpack.c.bf16 %v7741_v23, %v7740_v21 }
  0x2f   :  { %10936 = vmatprep.subr.bf16.mxu0 %v12583_v6 }
  0x31   :  { %9243 = vmatmul.mubr.msk.f32.vlgmr.msra.gmra.mrb[4].mxu0 %vm67_vm0, %v7628_v25  ;;  %v2357_v25 = vld [vmem:[%s14582_s2] sm:$0xff] }
  0x32   :  { %10938 = vmatpush3.bf16.msra.mxu0 %v12583_v6  ;;  %9249 = vmatprep.mubr.msk.f32.mxu0 %vm67_vm0, %v7618_v22  ;;  %v12925_v22 = vpack.c.bf16 %v7724_v20, %v7723_v19 }
  0x33   :  { %9236 = vmatmul.mubr.msk.f32.vlgmr.msra.gmra.mrb[2].mxu1 %vm67_vm0, %v7619_v26  ;;  %10940 = vmatprep.subr.bf16.mxu0 %v12600_v11 }
  0x34   :  { %10946 = vmatpush3.bf16.msra.mxu1 %v12574_v3  ;;  %9263 = vmatprep.mubr.msk.f32.mxu1 %vm67_vm0, %v7644_v27 }
  0x35   :  { %10948 = vmatprep.subr.bf16.mxu1 %v12583_v6 }
  0x37   :  { %9264 = vmatmul.mubr.msk.f32.vlgmr.msra.gmra.mrb[4].mxu1 %vm67_vm0, %v7645_v28 }
  0x38   :  { %10950 = vmatpush3.bf16.msra.mxu1 %v12583_v6  ;;  %9270 = vmatprep.mubr.msk.f32.mxu1 %vm67_vm0, %v7635_v29 }
  0x39   :  { %9250 = vmatmul.mubr.msk.f32.vlgmr.msra.gmra.mrb[4].mxu0 %vm67_vm0, %v7619_v26  ;;  %10952 = vmatprep.subr.bf16.mxu1 %v12600_v11  ;;  %v2358_v26 = vld [vmem:[%s14582_s2 + $0x8] sm:$0xff] }
  0x3a   :  { %10942 = vmatpush3.bf16.msra.mxu0 %v12600_v11  ;;  %9256 = vmatprep.mubr.msk.f32.mxu0 %vm67_vm0, %v7635_v29  ;;  %v12943_v27 = vpack.c.bf16 %v2358_v26, %v2357_v25 }
  0x3b   :  { %10956 = vmatprep.subr.bf16.mxu0 %v12574_v3 }
  0x3f   :  { %9271 = vmatmul.mubr.msk.f32.vlgmr.msra.gmra.mrb[4].mxu1 %vm67_vm0, %v7636_v30 }
  0x40   :  { %10954 = vmatpush3.bf16.msra.mxu1 %v12600_v11  ;;  %9277 = vmatprep.mubr.msk.f32.mxu1 %vm67_vm0, %v7659_v32 }
  0x41   :  { %9257 = vmatmul.mubr.msk.f32.vlgmr.msra.gmra.mrb[4].mxu0 %vm67_vm0, %v7636_v30  ;;  %10968 = vmatprep.subr.bf16.mxu1 %v12574_v3  ;;  %v12952_v30 = vld [vmem:[%s14583_s9] ss:$0 sm:$0xff] }
  0x42   :  { %10958 = vmatpush3.bf16.msra.mxu0 %v12574_v3  ;;  %9284 = vmatprep.mubr.msk.f32.mxu0 %vm67_vm0, %v7661_v31 }
  0x43   :  { %10960 = vmatprep.subr.bf16.mxu0 %v12583_v6 }
  0x45   :  { %9285 = vmatmul.mubr.msk.f32.vlgmr.msra.gmra.mrb[6].mxu0 %vm67_vm0, %v7662_v33 }
  0x46   :  { %10962 = vmatpush3.bf16.msra.mxu0 %v12583_v6  ;;  %9291 = vmatprep.mubr.msk.f32.mxu0 %vm67_vm0, %v7659_v32 }
  0x47   :  { %9278 = vmatmul.mubr.msk.f32.vlgmr.msra.gmra.mrb[4].mxu1 %vm67_vm0, %v7660_v35  ;;  %10964 = vmatprep.subr.bf16.mxu0 %v12600_v11 }
  0x48   :  { %10970 = vmatpush3.bf16.msra.mxu1 %v12574_v3  ;;  %9305 = vmatprep.mubr.msk.f32.mxu1 %vm67_vm0, %v7678_v34  ;;  %v7719_v3 = vld [vmem:[%s14582_s2 + $0x150] sm:$0xff] }
  0x49   :  { %10972 = vmatprep.subr.bf16.mxu1 %v12583_v6  ;;  %v12875_v8 = vpack.c.bf16 %v7720_v4, %v7719_v3  ;;  %v2370_v3 = vld [vmem:[%s14582_s2 + $0x68] sm:$0xff] }
  0x4a   :  { %v13040_v9 = vpack.c.bf16 %v2370_v3, %v2369_v1 }
  0x4b   :  { %9306 = vmatmul.mubr.msk.f32.vlgmr.msra.gmra.mrb[6].mxu1 %vm67_vm0, %v7679_v36  ;;  %v2360_v36 = vld [vmem:[%s14582_s2 + $0x18] sm:$0xff] }
  0x4c   :  { %10974 = vmatpush3.bf16.msra.mxu1 %v12583_v6  ;;  %9312 = vmatprep.mubr.msk.f32.mxu1 %vm67_vm0, %v7669_v39  ;;  %v7734_v6 = vld [vmem:[%s14582_s2 + $0xc0] sm:$0xff] }
  0x4d   :  { %9292 = vmatmul.mubr.msk.f32.vlgmr.msra.gmra.mrb[6].mxu0 %vm67_vm0, %v7660_v35  ;;  %10976 = vmatprep.subr.bf16.mxu1 %v12600_v11  ;;  %v2359_v35 = vld [vmem:[%s14582_s2 + $0x10] sm:$0xff] }
  0x4e   :  { %10966 = vmatpush3.bf16.msra.mxu0 %v12600_v11  ;;  %9298 = vmatprep.mubr.msk.f32.mxu0 %vm67_vm0, %v7669_v39  ;;  %v12967_v41 = vpack.c.bf16 %v2360_v36, %v2359_v35 }
  0x4f   :  { %10980 = vmatprep.subr.bf16.mxu0 %v12763_v40 }
  0x53   :  { %9313 = vmatmul.mubr.msk.f32.vlgmr.msra.gmra.mrb[6].mxu1 %vm67_vm0, %v7670_v47 }
  0x54   :  { %10978 = vmatpush3.bf16.msra.mxu1 %v12600_v11  ;;  %9319 = vmatprep.mubr.msk.f32.mxu1 %vm67_vm0, %v7686_v45  ;;  %v12885_v11 = vpack.c.bf16 %v7735_v7, %v7734_v6  ;;  %v12983_v45 = vpack.c.bf16 %v2362_v43, %v2361_v42 }
  0x55   :  { %9299 = vmatmul.mubr.msk.f32.vlgmr.msra.gmra.mrb[6].mxu0 %vm67_vm0, %v7670_v47  ;;  %11044 = vmatprep.subr.bf16.mxu1 %v12787_v46  ;;  %v2363_v47 = vld [vmem:[%s14582_s2 + $0x30] sm:$0xff] }
  0x56   :  { %10982 = vmatpush3.bf16.msra.mxu0 %v12763_v40  ;;  %v12995_v50 = vpack.c.bf16 %v2364_v49, %v2363_v47  ;;  %v7868_v47 = vld [vmem:[%s14582_s2 + $0xd0] sm:$0xff]  ;;  %v7869_v49 = vld [vmem:[%s14582_s2 + $0xd8] sm:$0xff] }
  0x57   :  { %10984 = vmatprep.subr.bf16.mxu0 %v12793_v48 }
  0x5a   :  { %10986 = vmatpush3.bf16.msra.mxu0 %v12793_v48 }
  0x5b   :  { %9320 = vmatmul.mubr.msk.f32.vlgmr.msra.gmra.mrb[6].mxu1 %vm67_vm0, %v7687_v54  ;;  %10988 = vmatprep.subr.bf16.mxu0 %v12813_v53 }
  0x5c   :  { %11046 = vmatpush3.bf16.msra.mxu1 %v12787_v46 }
  0x5d   :  { %11048 = vmatprep.subr.bf16.mxu1 %v12824_v57 }
  0x5e   :  { %10990 = vmatpush3.bf16.msra.mxu0 %v12813_v53 }
  0x5f   :  { %10992 = vmatprep.subr.bf16.mxu0 %v12835_v60 }
  0x60   :  { %11050 = vmatpush3.bf16.msra.mxu1 %v12824_v57 }
  0x61   :  { %11052 = vmatprep.subr.bf16.mxu1 %v12845_v63 }
  0x62   :  { %10994 = vmatpush3.bf16.msra.mxu0 %v12835_v60 }
  0x63   :  { %10996 = vmatprep.subr.bf16.mxu0 %v12855_v2 }
  0x64   :  { %11054 = vmatpush3.bf16.msra.mxu1 %v12845_v63 }
  0x65   :  { %11056 = vmatprep.subr.bf16.mxu1 %v12865_v5 }
  0x66   :  { %10998 = vmatpush3.bf16.msra.mxu0 %v12855_v2 }
  0x67   :  { %11000 = vmatprep.subr.bf16.mxu0 %v12875_v8 }
  0x68   :  { %11058 = vmatpush3.bf16.msra.mxu1 %v12865_v5 }
  0x69   :  { %11060 = vmatprep.subr.bf16.mxu1 %v12885_v11 }
  0x6a   :  { %11002 = vmatpush3.bf16.msra.mxu0 %v12875_v8 }
  0x6b   :  { %11004 = vmatprep.subr.bf16.mxu0 %v12895_v14 }
  0x6c   :  { %11062 = vmatpush3.bf16.msra.mxu1 %v12885_v11 }
  0x6d   :  { %11064 = vmatprep.subr.bf16.mxu1 %v12899_v15 }
  0x6e   :  { %11006 = vmatpush3.bf16.msra.mxu0 %v12895_v14 }
  0x6f   :  { %11008 = vmatprep.subr.bf16.mxu0 %v12925_v22 }
  0x70   :  { %11066 = vmatpush3.bf16.msra.mxu1 %v12899_v15 }
  0x71   :  { %11068 = vmatprep.subr.bf16.mxu1 %v12911_v18 }
  0x72   :  { %11010 = vmatpush3.bf16.msra.mxu0 %v12925_v22 }
  0x73   :  { %11012 = vmatprep.subr.bf16.mxu0 %v12787_v46 }
  0x74   :  { %11070 = vmatpush3.bf16.msra.mxu1 %v12911_v18 }
  0x75   :  { %11072 = vmatprep.subr.bf16.mxu1 %v12930_v24 }
  0x78   :  { %11074 = vmatpush3.bf16.msra.mxu1 %v12930_v24 }
  0x79   :  { %11076 = vmatprep.subr.bf16.mxu1 %v12943_v27 }
  0xec   :  { %v12947_v28 = vpop.f32.mrb[0].mxu0 }
  0xed   :  { %v221_v29 = vpop.f32.mrb[1].mxu0  ;;  %v238_v16 = vadd.f32 %v12947_v28, %v12952_v30 }
  0xee   :  { %v237_v37 = vadd.f32 %v12952_v30, %v221_v29 }
  0xef   :  { %v240_v23 = vmax.f32 %v238_v16, 0.0 }
  0xf0   :  { %v239_v44 = vmax.f32 %v237_v37, 0.0  ;;  %v13172_v37 = vld [vmem:[%s14583_s9] ss:$0 sm:$0xff] }
  0xf2   :  { %v9195_v31 = vpop.f32.mrb[0].mxu1 }
  0xf3   :  { %v510_v32 = vadd.f32 %v9195_v31, %v12952_v30  ;;  %v491_v33 = vpop.f32.mrb[1].mxu1 }
  0xf4   :  { %v509_v34 = vadd.f32 %v12952_v30, %v491_v33 }
  0xf5   :  { %v12965_v39 = vmax.f32 %v510_v32, 0.0 }
  0xf6   :  { %v12963_v38 = vmax.f32 %v509_v34, 0.0 }
  0xf8   :  { %9354 = vmatprep.mubr.f32.mxu0 %v12963_v38  ;;  %9424 = vmatprep.mubr.f32.mxu1 %v12963_v38 }
  0xf9   :  { %9355 = vmatmul.mubr.f32.vlgmr.msra.gmra.mrb[8].mxu0 %v12965_v39  ;;  %9425 = vmatmul.mubr.f32.vlgmr.msra.gmra.mrb[8].mxu1 %v12965_v39 }
  0xfa   :  { %11014 = vmatpush3.bf16.msra.mxu0 %v12787_v46  ;;  %11078 = vmatpush3.bf16.msra.mxu1 %v12943_v27 }
  0xfb   :  { %11016 = vmatprep.subr.bf16.mxu0 %v12824_v57  ;;  %11080 = vmatprep.subr.bf16.mxu1 %v12967_v41 }
  0xfc   :  { %9389 = vmatprep.mubr.f32.mxu0 %v239_v44  ;;  %9459 = vmatprep.mubr.f32.mxu1 %v239_v44 }
  0xfe   :  { %11018 = vmatpush3.bf16.msra.mxu0 %v12824_v57  ;;  %11082 = vmatpush3.bf16.msra.mxu1 %v12967_v41 }
  0xff   :  { %11020 = vmatprep.subr.bf16.mxu0 %v12845_v63  ;;  %11084 = vmatprep.subr.bf16.mxu1 %v12983_v45 }
 0x100   :  { %v9216_v54 = vpop.f32.mrb[2].mxu0 }
 0x101   :  { %v13006_v55 = vadd.f32 %v9216_v54, %v12952_v30  ;;  %v764_v56 = vpop.f32.mrb[3].mxu0  ;;  %v7872_v54 = vld [vmem:[%s14582_s2 + $0xf0] sm:$0xff] }
 0x102   :  { %11022 = vmatpush3.bf16.msra.mxu0 %v12845_v63  ;;  %11086 = vmatpush3.bf16.msra.mxu1 %v12983_v45  ;;  %v782_v17 = vadd.f32 %v12952_v30, %v764_v56 }
 0x103   :  { %11024 = vmatprep.subr.bf16.mxu0 %v12865_v5  ;;  %11088 = vmatprep.subr.bf16.mxu1 %v12995_v50  ;;  %v13116_v34 = vmax.f32 %v13006_v55, 0.0  ;;  %v7873_v55 = vld [vmem:[%s14582_s2 + $0xf8] sm:$0xff] }
 0x104   :  { %v13071_v26 = vmax.f32 %v782_v17, 0.0  ;;  %v13345_v56 = vpack.c.bf16 %v7873_v55, %v7872_v54  ;;  %v7845_v17 = vld [vmem:[%s14582_s2 + $0x120] sm:$0xff] }
 0x106   :  { %11026 = vmatpush3.bf16.msra.mxu0 %v12865_v5  ;;  %11090 = vmatpush3.bf16.msra.mxu1 %v12995_v50  ;;  %v9237_v0 = vpop.f32.mrb[2].mxu1 }
 0x107   :  { %11028 = vmatprep.subr.bf16.mxu0 %v12885_v11  ;;  %11092 = vmatprep.subr.bf16.mxu1 %v13010_v58  ;;  %v13031_v4 = vadd.f32 %v9237_v0, %v12952_v30  ;;  %v1037_v6 = vpop.f32.mrb[3].mxu1 }
 0x108   :  { %v13034_v7 = vadd.f32 %v12952_v30, %v1037_v6  ;;  %v7844_v6 = vld [vmem:[%s14582_s2 + $0x118] sm:$0xff] }
 0x109   :  { %v13156_v36 = vmax.f32 %v13031_v4, 0.0  ;;  %v7843_v4 = vld [vmem:[%s14582_s2 + $0x110] sm:$0xff] }
 0x10a   :  { %11030 = vmatpush3.bf16.msra.mxu0 %v12885_v11  ;;  %11094 = vmatpush3.bf16.msra.mxu1 %v13010_v58  ;;  %v13121_v35 = vmax.f32 %v13034_v7, 0.0  ;;  %v3539_v7 = vld [vmem:[%s14582_s2 + $0x10] sm:$0xff]  ;;  %v13387_v12 = vpack.c.bf16 %v7844_v6, %v7843_v4  ;;  %v7961_v6 = vld [vmem:[%s14584_s3 + $0x120] sm:$0xff] }
 0x10b   :  { %11032 = vmatprep.subr.bf16.mxu0 %v12899_v15  ;;  %11096 = vmatprep.subr.bf16.mxu1 %v13022_v62 }
 0x10e   :  { %11034 = vmatpush3.bf16.msra.mxu0 %v12899_v15  ;;  %11098 = vmatpush3.bf16.msra.mxu1 %v13022_v62 }
 0x10f   :  { %11036 = vmatprep.subr.bf16.mxu0 %v12911_v18  ;;  %11100 = vmatprep.subr.bf16.mxu1 %v13040_v9 }
 0x112   :  { %11038 = vmatpush3.bf16.msra.mxu0 %v12911_v18  ;;  %11102 = vmatpush3.bf16.msra.mxu1 %v13040_v9 }
 0x113   :  { %11040 = vmatprep.subr.bf16.mxu0 %v12930_v24  ;;  %11104 = vmatprep.subr.bf16.mxu1 %v13052_v13 }
 0x114   :  { %v9258_v19 = vpop.f32.mrb[4].mxu0 }
 0x115   :  { %v13064_v20 = vadd.f32 %v9258_v19, %v12952_v30  ;;  %v1310_v21 = vpop.f32.mrb[5].mxu0  ;;  %v7846_v19 = vld [vmem:[%s14582_s2 + $0x128] sm:$0xff] }
 0x116   :  { %11042 = vmatpush3.bf16.msra.mxu0 %v12930_v24  ;;  %11106 = vmatpush3.bf16.msra.mxu1 %v13052_v13  ;;  %v13069_v25 = vadd.f32 %v12952_v30, %v1310_v21  ;;  %v13408_v21 = vpack.c.bf16 %v7846_v19, %v7845_v17  ;;  %v7963_v19 = vld [vmem:[%s14584_s3 + $0x130] sm:$0xff] }
 0x117   :  { %11108 = vmatprep.subr.bf16.mxu1 %v12763_v40  ;;  %11140 = vmatprep.subr.bf16.mxu0 %v12787_v46 }
 0x118   :  { %v13210_v44 = vmax.f32 %v13069_v25, 0.0  ;;  %v7847_v25 = vld [vmem:[%s14582_s2 + $0x130] sm:$0xff] }
 0x119   :  { %9390 = vmatmul.mubr.f32.vlgmr.msra.gmra.mrb[8].mxu0 %v240_v23  ;;  %9460 = vmatmul.mubr.f32.vlgmr.msra.gmra.mrb[8].mxu1 %v240_v23 }
 0x11a   :  { %11110 = vmatpush3.bf16.msra.mxu1 %v12763_v40  ;;  %11142 = vmatpush3.bf16.msra.mxu0 %v12787_v46  ;;  %v13105_v33 = vpop.f32.mrb[4].mxu1 }
 0x11b   :  { %11112 = vmatprep.subr.bf16.mxu1 %v12793_v48  ;;  %11144 = vmatprep.subr.bf16.mxu0 %v12824_v57  ;;  %v1602_v0 = vadd.f32 %v13105_v33, %v13172_v37 }
 0x11c   :  { %9494 = vmatprep.mubr.f32.mxu1 %v13071_v26  ;;  %9529 = vmatprep.mubr.f32.mxu0 %v13071_v26 }
 0x11d   :  { %v13381_v10 = vmax.f32 %v1602_v0, 0.0  ;;  %v7976_v0 = vld [vmem:[%s14584_s3 + $0x90] sm:$0xff] }
 0x11e   :  { %11114 = vmatpush3.bf16.msra.mxu1 %v12793_v48  ;;  %11146 = vmatpush3.bf16.msra.mxu0 %v12824_v57 }
 0x11f   :  { %11116 = vmatprep.subr.bf16.mxu1 %v12813_v53  ;;  %11148 = vmatprep.subr.bf16.mxu0 %v12845_v63 }
 0x122   :  { %11118 = vmatpush3.bf16.msra.mxu1 %v12813_v53  ;;  %11150 = vmatpush3.bf16.msra.mxu0 %v12845_v63 }
 0x123   :  { %11120 = vmatprep.subr.bf16.mxu1 %v12835_v60  ;;  %11152 = vmatprep.subr.bf16.mxu0 %v12865_v5 }
 0x126   :  { %11122 = vmatpush3.bf16.msra.mxu1 %v12835_v60  ;;  %11154 = vmatpush3.bf16.msra.mxu0 %v12865_v5 }
 0x127   :  { %11124 = vmatprep.subr.bf16.mxu1 %v12855_v2  ;;  %11156 = vmatprep.subr.bf16.mxu0 %v12885_v11 }
 0x128   :  { %v9300_v28 = vpop.f32.mrb[6].mxu0 }
 0x129   :  { %v13094_v29 = vadd.f32 %v9300_v28, %v12952_v30  ;;  %v1856_v31 = vpop.f32.mrb[7].mxu0  ;;  %v3543_v28 = vld [vmem:[%s14582_s2 + $0x30] sm:$0xff] }
 0x12a   :  { %11126 = vmatpush3.bf16.msra.mxu1 %v12855_v2  ;;  %11158 = vmatpush3.bf16.msra.mxu0 %v12885_v11  ;;  %v13099_v32 = vadd.f32 %v12952_v30, %v1856_v31  ;;  %v13111_v30 = vpop.f32.mrb[5].mxu1  ;;  %v3544_v31 = vld [vmem:[%s14582_s2 + $0x38] sm:$0xff] }
 0x12b   :  { %11128 = vmatprep.subr.bf16.mxu1 %v12875_v8  ;;  %11160 = vmatprep.subr.bf16.mxu0 %v12899_v15 }
 0x12e   :  { %11130 = vmatpush3.bf16.msra.mxu1 %v12875_v8  ;;  %11162 = vmatpush3.bf16.msra.mxu0 %v12899_v15 }
 0x12f   :  { %11132 = vmatprep.subr.bf16.mxu1 %v12895_v14  ;;  %11164 = vmatprep.subr.bf16.mxu0 %v12911_v18 }
 0x132   :  { %11134 = vmatpush3.bf16.msra.mxu1 %v12895_v14  ;;  %11166 = vmatpush3.bf16.msra.mxu0 %v12911_v18 }
 0x133   :  { %11136 = vmatprep.subr.bf16.mxu1 %v12925_v22  ;;  %11168 = vmatprep.subr.bf16.mxu0 %v12930_v24 }
 0x136   :  { %11138 = vmatpush3.bf16.msra.mxu1 %v12925_v22  ;;  %11170 = vmatpush3.bf16.msra.mxu0 %v12930_v24 }
 0x137   :  { %11172 = vmatprep.subr.bf16.mxu0 %v12943_v27  ;;  %11236 = vmatprep.subr.bf16.mxu1 %v12787_v46 }
 0x139   :  { %9495 = vmatmul.mubr.f32.vlgmr.msra.gmra.mrb[8].mxu1 %v13116_v34  ;;  %9530 = vmatmul.mubr.f32.vlgmr.msra.gmra.mrb[10].mxu0 %v13116_v34 }
 0x13a   :  { %11174 = vmatpush3.bf16.msra.mxu0 %v12943_v27  ;;  %9564 = vmatprep.mubr.f32.mxu0 %v12963_v38  ;;  %v9321_v38 = vpop.f32.mrb[6].mxu1 }
 0x13b   :  { %11238 = vmatpush3.bf16.msra.mxu1 %v12787_v46  ;;  %11176 = vmatprep.subr.bf16.mxu0 %v12967_v41  ;;  %v2129_v42 = vpop.f32.mrb[7].mxu1 }
 0x13c   :  { %11240 = vmatprep.subr.bf16.mxu1 %v12824_v57  ;;  %9634 = vmatprep.mubr.f32.mxu1 %v13121_v35  ;;  %v13180_v43 = vadd.f32 %v13172_v37, %v2129_v42 }
 0x13e   :  { %11178 = vmatpush3.bf16.msra.mxu0 %v12967_v41 }
 0x13f   :  { %11242 = vmatpush3.bf16.msra.mxu1 %v12824_v57  ;;  %11180 = vmatprep.subr.bf16.mxu0 %v12983_v45 }
 0x140   :  { %11244 = vmatprep.subr.bf16.mxu1 %v12845_v63 }
 0x142   :  { %11182 = vmatpush3.bf16.msra.mxu0 %v12983_v45 }
 0x143   :  { %11246 = vmatpush3.bf16.msra.mxu1 %v12845_v63  ;;  %11184 = vmatprep.subr.bf16.mxu0 %v12995_v50 }
 0x144   :  { %11248 = vmatprep.subr.bf16.mxu1 %v12865_v5 }
 0x146   :  { %11186 = vmatpush3.bf16.msra.mxu0 %v12995_v50 }
 0x147   :  { %11250 = vmatpush3.bf16.msra.mxu1 %v12865_v5  ;;  %11188 = vmatprep.subr.bf16.mxu0 %v13010_v58 }
 0x148   :  { %11252 = vmatprep.subr.bf16.mxu1 %v12885_v11 }
 0x14a   :  { %11190 = vmatpush3.bf16.msra.mxu0 %v13010_v58 }
 0x14b   :  { %11254 = vmatpush3.bf16.msra.mxu1 %v12885_v11  ;;  %11192 = vmatprep.subr.bf16.mxu0 %v13022_v62 }
 0x14c   :  { %11256 = vmatprep.subr.bf16.mxu1 %v12899_v15 }
 0x14e   :  { %11194 = vmatpush3.bf16.msra.mxu0 %v13022_v62 }
 0x14f   :  { %11258 = vmatpush3.bf16.msra.mxu1 %v12899_v15  ;;  %11196 = vmatprep.subr.bf16.mxu0 %v13040_v9 }
 0x150   :  { %11260 = vmatprep.subr.bf16.mxu1 %v12911_v18 }
 0x152   :  { %11198 = vmatpush3.bf16.msra.mxu0 %v13040_v9 }
 0x153   :  { %11262 = vmatpush3.bf16.msra.mxu1 %v12911_v18  ;;  %11200 = vmatprep.subr.bf16.mxu0 %v13052_v13 }
 0x154   :  { %11264 = vmatprep.subr.bf16.mxu1 %v12930_v24 }
 0x156   :  { %11202 = vmatpush3.bf16.msra.mxu0 %v13052_v13 }
 0x157   :  { %11266 = vmatpush3.bf16.msra.mxu1 %v12930_v24  ;;  %11204 = vmatprep.subr.bf16.mxu0 %v12763_v40 }
 0x158   :  { %11268 = vmatprep.subr.bf16.mxu1 %v12943_v27 }
 0x159   :  { %9565 = vmatmul.mubr.f32.vlgmr.msra.gmra.mrb[10].mxu0 %v12965_v39  ;;  %v13176_v39 = vadd.f32 %v9321_v38, %v13172_v37 }
 0x15a   :  { %9635 = vmatmul.mubr.f32.vlgmr.msra.gmra.mrb[10].mxu1 %v13156_v36  ;;  %11206 = vmatpush3.bf16.msra.mxu0 %v12763_v40 }
 0x15b   :  { %11270 = vmatpush3.bf16.msra.mxu1 %v12943_v27  ;;  %9669 = vmatprep.mubr.f32.mxu1 %v13071_v26  ;;  %v7848_v26 = vld [vmem:[%s14582_s2 + $0x138] sm:$0xff] }
 0x15c   :  { %11208 = vmatprep.subr.bf16.mxu0 %v12793_v48  ;;  %11272 = vmatprep.subr.bf16.mxu1 %v12967_v41  ;;  %v13430_v33 = vpack.c.bf16 %v7848_v26, %v7847_v25  ;;  %v7965_v26 = vld [vmem:[%s14584_s3 + $0x140] sm:$0xff] }
 0x15d   :  { %9599 = vmatprep.mubr.f32.mxu0 %v13121_v35 }
 0x15e   :  { %11210 = vmatpush3.bf16.msra.mxu0 %v12793_v48 }
 0x15f   :  { %11274 = vmatpush3.bf16.msra.mxu1 %v12967_v41  ;;  %11212 = vmatprep.subr.bf16.mxu0 %v12813_v53 }
 0x160   :  { %11276 = vmatprep.subr.bf16.mxu1 %v12983_v45 }
 0x162   :  { %11214 = vmatpush3.bf16.msra.mxu0 %v12813_v53 }
 0x163   :  { %11278 = vmatpush3.bf16.msra.mxu1 %v12983_v45  ;;  %11216 = vmatprep.subr.bf16.mxu0 %v12835_v60 }
 0x164   :  { %11280 = vmatprep.subr.bf16.mxu1 %v12995_v50 }
 0x166   :  { %11218 = vmatpush3.bf16.msra.mxu0 %v12835_v60 }
 0x167   :  { %11282 = vmatpush3.bf16.msra.mxu1 %v12995_v50  ;;  %11220 = vmatprep.subr.bf16.mxu0 %v12855_v2 }
 0x168   :  { %11284 = vmatprep.subr.bf16.mxu1 %v13010_v58 }
 0x16a   :  { %11222 = vmatpush3.bf16.msra.mxu0 %v12855_v2 }
 0x16b   :  { %11286 = vmatpush3.bf16.msra.mxu1 %v13010_v58  ;;  %11224 = vmatprep.subr.bf16.mxu0 %v12875_v8 }
 0x16c   :  { %11288 = vmatprep.subr.bf16.mxu1 %v13022_v62 }
 0x16e   :  { %11226 = vmatpush3.bf16.msra.mxu0 %v12875_v8 }
 0x16f   :  { %11290 = vmatpush3.bf16.msra.mxu1 %v13022_v62  ;;  %11228 = vmatprep.subr.bf16.mxu0 %v12895_v14 }
 0x170   :  { %11292 = vmatprep.subr.bf16.mxu1 %v13040_v9 }
 0x172   :  { %11230 = vmatpush3.bf16.msra.mxu0 %v12895_v14 }
 0x173   :  { %11294 = vmatpush3.bf16.msra.mxu1 %v13040_v9  ;;  %11232 = vmatprep.subr.bf16.mxu0 %v12925_v22 }
 0x174   :  { %11296 = vmatprep.subr.bf16.mxu1 %v13052_v13 }
 0x176   :  { %11234 = vmatpush3.bf16.msra.mxu0 %v12925_v22 }
 0x177   :  { %11298 = vmatpush3.bf16.msra.mxu1 %v13052_v13  ;;  %11332 = vmatprep.subr.bf16.mxu0 %v12787_v46 }
 0x178   :  { %11300 = vmatprep.subr.bf16.mxu1 %v12763_v40 }
 0x179   :  { %9600 = vmatmul.mubr.f32.vlgmr.msra.gmra.mrb[10].mxu0 %v13156_v36 }
 0x17a   :  { %9670 = vmatmul.mubr.f32.vlgmr.msra.gmra.mrb[10].mxu1 %v13116_v34  ;;  %11334 = vmatpush3.bf16.msra.mxu0 %v12787_v46  ;;  %v7859_v46 = vld [vmem:[%s14582_s2 + $0x88] sm:$0xff]  ;;  %v7849_v34 = vld [vmem:[%s14582_s2 + $0x140] sm:$0xff] }
 0x17b   :  { %11302 = vmatpush3.bf16.msra.mxu1 %v12763_v40  ;;  %11336 = vmatprep.subr.bf16.mxu0 %v12824_v57  ;;  %v7858_v40 = vld [vmem:[%s14582_s2 + $0x80] sm:$0xff] }
 0x17c   :  { %11304 = vmatprep.subr.bf16.mxu1 %v12793_v48  ;;  %9704 = vmatprep.mubr.f32.mxu1 %v13210_v44 }
 0x17d   :  { %9739 = vmatprep.mubr.f32.mxu0 %v13210_v44 }
 0x17e   :  { %11338 = vmatpush3.bf16.msra.mxu0 %v12824_v57  ;;  %v7861_v57 = vld [vmem:[%s14582_s2 + $0x98] sm:$0xff] }
 0x17f   :  { %11306 = vmatpush3.bf16.msra.mxu1 %v12793_v48  ;;  %11340 = vmatprep.subr.bf16.mxu0 %v12845_v63  ;;  %v13250_v48 = vpack.c.bf16 %v7859_v46, %v7858_v40  ;;  %v7852_v40 = vld [vmem:[%s14582_s2 + $0x158] sm:$0xff]  ;;  %v3547_v46 = vld [vmem:[%s14582_s2 + $0x50] sm:$0xff] }
 0x180   :  { %11308 = vmatprep.subr.bf16.mxu1 %v12813_v53 }
 0x182   :  { %11342 = vmatpush3.bf16.msra.mxu0 %v12845_v63  ;;  %v13262_v63 = vmax.f32 %v13064_v20, 0.0  ;;  %v3542_v20 = vld [vmem:[%s14582_s2 + $0x28] sm:$0xff] }
 0x183   :  { %11310 = vmatpush3.bf16.msra.mxu1 %v12813_v53  ;;  %11344 = vmatprep.subr.bf16.mxu0 %v12865_v5  ;;  %v7860_v53 = vld [vmem:[%s14582_s2 + $0x90] sm:$0xff] }
 0x184   :  { %11312 = vmatprep.subr.bf16.mxu1 %v12835_v60 }
 0x186   :  { %11346 = vmatpush3.bf16.msra.mxu0 %v12865_v5  ;;  %v7862_v5 = vld [vmem:[%s14582_s2 + $0xa0] sm:$0xff] }
 0x187   :  { %11314 = vmatpush3.bf16.msra.mxu1 %v12835_v60  ;;  %11348 = vmatprep.subr.bf16.mxu0 %v12885_v11  ;;  %v1601_v60 = vadd.f32 %v13172_v37, %v13111_v30  ;;  %v13433_v30 = vpack.c.bf16 %v3544_v31, %v3543_v28  ;;  %v3546_v37 = vld [vmem:[%s14582_s2 + $0x48] sm:$0xff]  ;;  %v7982_v31 = vld [vmem:[%s14584_s3 + $0xc0] sm:$0xff] }
 0x188   :  { %11316 = vmatprep.subr.bf16.mxu1 %v12855_v2  ;;  %v7966_v28 = vld [vmem:[%s14584_s3 + $0x148] sm:$0xff] }
 0x18a   :  { %11350 = vmatpush3.bf16.msra.mxu0 %v12885_v11  ;;  %v13276_v11 = vmax.f32 %v1601_v60, 0.0 }
 0x18b   :  { %11318 = vmatpush3.bf16.msra.mxu1 %v12855_v2  ;;  %11352 = vmatprep.subr.bf16.mxu0 %v12899_v15  ;;  %v13267_v2 = vpack.c.bf16 %v7861_v57, %v7860_v53  ;;  %v3548_v53 = vld [vmem:[%s14582_s2 + $0x58] sm:$0xff] }
 0x18c   :  { %11320 = vmatprep.subr.bf16.mxu1 %v12875_v8  ;;  %v13473_v60 = vpack.c.bf16 %v3548_v53, %v3547_v46  ;;  %v7970_v46 = vld [vmem:[%s14584_s3 + $0x168] sm:$0xff]  ;;  %v7986_v53 = vld [vmem:[%s14584_s3 + $0xe0] sm:$0xff] }
 0x18e   :  { %11354 = vmatpush3.bf16.msra.mxu0 %v12899_v15  ;;  %v7864_v15 = vld [vmem:[%s14582_s2 + $0xb0] sm:$0xff] }
 0x18f   :  { %11322 = vmatpush3.bf16.msra.mxu1 %v12875_v8  ;;  %11356 = vmatprep.subr.bf16.mxu0 %v12911_v18  ;;  %v7863_v8 = vld [vmem:[%s14582_s2 + $0xa8] sm:$0xff] }
 0x190   :  { %11324 = vmatprep.subr.bf16.mxu1 %v12895_v14 }
 0x192   :  { %11358 = vmatpush3.bf16.msra.mxu0 %v12911_v18  ;;  %v7865_v18 = vld [vmem:[%s14582_s2 + $0xb8] sm:$0xff] }
 0x193   :  { %11326 = vmatpush3.bf16.msra.mxu1 %v12895_v14  ;;  %11360 = vmatprep.subr.bf16.mxu0 %v12930_v24  ;;  %v13284_v14 = vpack.c.bf16 %v7863_v8, %v7862_v5  ;;  %v7853_v5 = vld [vmem:[%s14582_s2 + $0x160] sm:$0xff]  ;;  %v7854_v8 = vld [vmem:[%s14582_s2 + $0x168] sm:$0xff] }
 0x194   :  { %11328 = vmatprep.subr.bf16.mxu1 %v12925_v22 }
 0x196   :  { %11362 = vmatpush3.bf16.msra.mxu0 %v12930_v24  ;;  %v7866_v24 = vld [vmem:[%s14582_s2 + $0xc0] sm:$0xff] }
 0x197   :  { %11330 = vmatpush3.bf16.msra.mxu1 %v12925_v22  ;;  %11364 = vmatprep.subr.bf16.mxu0 %v12943_v27  ;;  %v13297_v22 = vpack.c.bf16 %v7865_v18, %v7864_v15  ;;  %v3549_v15 = vld [vmem:[%s14582_s2 + $0x60] sm:$0xff]  ;;  %v3550_v18 = vld [vmem:[%s14582_s2 + $0x68] sm:$0xff] }
 0x198   :  { %11428 = vmatprep.subr.bf16.mxu1 %v13250_v48 }
 0x199   :  { %9740 = vmatmul.mubr.f32.vlgmr.msra.gmra.mrb[12].mxu0 %v13262_v63 }
 0x19a   :  { %9705 = vmatmul.mubr.f32.vlgmr.msra.gmra.mrb[10].mxu1 %v13262_v63  ;;  %11366 = vmatpush3.bf16.msra.mxu0 %v12943_v27  ;;  %v7867_v27 = vld [vmem:[%s14582_s2 + $0xc8] sm:$0xff] }
 0x19b   :  { %9774 = vmatprep.mubr.f32.mxu0 %v13121_v35  ;;  %11430 = vmatpush3.bf16.msra.mxu1 %v13250_v48  ;;  %v7850_v35 = vld [vmem:[%s14582_s2 + $0x148] sm:$0xff] }
 0x19c   :  { %11368 = vmatprep.subr.bf16.mxu0 %v12967_v41  ;;  %11432 = vmatprep.subr.bf16.mxu1 %v13267_v2  ;;  %v13450_v38 = vpack.c.bf16 %v7850_v35, %v7849_v34  ;;  %v7967_v35 = vld [vmem:[%s14584_s3 + $0x150] sm:$0xff] }
 0x19d   :  { %9844 = vmatprep.mubr.f32.mxu1 %v13276_v11 }
 0x19e   :  { %11370 = vmatpush3.bf16.msra.mxu0 %v12967_v41  ;;  %v13309_v41 = vpack.c.bf16 %v7867_v27, %v7866_v24  ;;  %v13490_v24 = vpack.c.bf16 %v7854_v8, %v7853_v5  ;;  %v13493_v27 = vpack.c.bf16 %v3550_v18, %v3549_v15  ;;  %v7971_v15 = vld [vmem:[%s14584_s3 + $0x170] sm:$0xff]  ;;  %v7972_v18 = vld [vmem:[%s14584_s3 + $0x178] sm:$0xff] }
 0x19f   :  { %11434 = vmatpush3.bf16.msra.mxu1 %v13267_v2  ;;  %11372 = vmatprep.subr.bf16.mxu0 %v12983_v45 }
 0x1a0   :  { %11436 = vmatprep.subr.bf16.mxu1 %v13284_v14 }
 0x1a2   :  { %11374 = vmatpush3.bf16.msra.mxu0 %v12983_v45  ;;  %v13321_v45 = vpack.c.bf16 %v7869_v49, %v7868_v47  ;;  %v7855_v47 = vld [vmem:[%s14582_s2 + $0x170] sm:$0xff]  ;;  %v7856_v49 = vld [vmem:[%s14582_s2 + $0x178] sm:$0xff] }
 0x1a3   :  { %11438 = vmatpush3.bf16.msra.mxu1 %v13284_v14  ;;  %11376 = vmatprep.subr.bf16.mxu0 %v12995_v50  ;;  %v13510_v54 = vpack.c.bf16 %v7856_v49, %v7855_v47  ;;  %v7989_v47 = vld [vmem:[%s14584_s3 + $0xf8] sm:$0xff] }
 0x1a4   :  { %11440 = vmatprep.subr.bf16.mxu1 %v13297_v22 }
 0x1a6   :  { %11378 = vmatpush3.bf16.msra.mxu0 %v12995_v50  ;;  %v13333_v50 = vpack.c.bf16 %v7871_v52, %v7870_v51  ;;  %v3551_v51 = vld [vmem:[%s14582_s2 + $0x70] sm:$0xff]  ;;  %v3552_v52 = vld [vmem:[%s14582_s2 + $0x78] sm:$0xff] }
 0x1a7   :  { %11442 = vmatpush3.bf16.msra.mxu1 %v13297_v22  ;;  %11380 = vmatprep.subr.bf16.mxu0 %v13010_v58  ;;  %v13513_v55 = vpack.c.bf16 %v3552_v52, %v3551_v51  ;;  %v13802_v51 = vpack.c.bf16 %v7972_v18, %v7971_v15  ;;  %v8081_v18 = vld [vmem:[%s14586_s4 + $0x80] sm:$0xff] }
 0x1a8   :  { %11444 = vmatprep.subr.bf16.mxu1 %v13309_v41 }
 0x1aa   :  { %11382 = vmatpush3.bf16.msra.mxu0 %v13010_v58  ;;  %v7841_v58 = vld [vmem:[%s14582_s2 + $0x100] sm:$0xff] }
 0x1ab   :  { %11446 = vmatpush3.bf16.msra.mxu1 %v13309_v41  ;;  %11384 = vmatprep.subr.bf16.mxu0 %v13022_v62  ;;  %v13364_v1 = vpack.c.bf16 %v7842_v59, %v7841_v58  ;;  %v13524_v58 = vmax.f32 %v13099_v32, 0.0  ;;  %v13564_v59 = vmax.f32 %v13094_v29, 0.0 }
 0x1ac   :  { %11448 = vmatprep.subr.bf16.mxu1 %v13321_v45 }
 0x1ae   :  { %11386 = vmatpush3.bf16.msra.mxu0 %v13022_v62  ;;  %v3538_v62 = vld [vmem:[%s14582_s2 + $0x8] sm:$0xff] }
 0x1af   :  { %11450 = vmatpush3.bf16.msra.mxu1 %v13321_v45  ;;  %11388 = vmatprep.subr.bf16.mxu0 %v13040_v9  ;;  %v13367_v3 = vpack.c.bf16 %v3538_v62, %v3537_v61  ;;  %v2149_v61 = vmax.f32 %v13180_v43, 0.0  ;;  %v7960_v62 = vld [vmem:[%s14584_s3 + $0x118] sm:$0xff] }
 0x1b0   :  { %11452 = vmatprep.subr.bf16.mxu1 %v13333_v50 }
 0x1b2   :  { %11390 = vmatpush3.bf16.msra.mxu0 %v13040_v9  ;;  %v3540_v9 = vld [vmem:[%s14582_s2 + $0x18] sm:$0xff] }
 0x1b3   :  { %11454 = vmatpush3.bf16.msra.mxu1 %v13333_v50  ;;  %11392 = vmatprep.subr.bf16.mxu0 %v13052_v13  ;;  %v13389_v16 = vpack.c.bf16 %v3540_v9, %v3539_v7  ;;  %v7962_v7 = vld [vmem:[%s14584_s3 + $0x128] sm:$0xff] }
 0x1b4   :  { %11456 = vmatprep.subr.bf16.mxu1 %v13345_v56 }
 0x1b6   :  { %11394 = vmatpush3.bf16.msra.mxu0 %v13052_v13  ;;  %v3541_v13 = vld [vmem:[%s14582_s2 + $0x20] sm:$0xff] }
 0x1b7   :  { %11458 = vmatpush3.bf16.msra.mxu1 %v13345_v56  ;;  %11396 = vmatprep.subr.bf16.mxu0 %v13364_v1  ;;  %v13412_v23 = vpack.c.bf16 %v3542_v20, %v3541_v13  ;;  %v7964_v13 = vld [vmem:[%s14584_s3 + $0x138] sm:$0xff]  ;;  %v7980_v20 = vld [vmem:[%s14584_s3 + $0xb0] sm:$0xff] }
 0x1b8   :  { %11460 = vmatprep.subr.bf16.mxu1 %v13367_v3 }
 0x1b9   :  { %9775 = vmatmul.mubr.f32.vlgmr.msra.gmra.mrb[12].mxu0 %v13156_v36  ;;  %v3545_v36 = vld [vmem:[%s14582_s2 + $0x40] sm:$0xff] }
 0x1ba   :  { %9845 = vmatmul.mubr.f32.vlgmr.msra.gmra.mrb[12].mxu1 %v13381_v10  ;;  %11398 = vmatpush3.bf16.msra.mxu0 %v13364_v1  ;;  %v13453_v42 = vpack.c.bf16 %v3546_v37, %v3545_v36  ;;  %v7968_v36 = vld [vmem:[%s14584_s3 + $0x158] sm:$0xff]  ;;  %v7984_v37 = vld [vmem:[%s14584_s3 + $0xd0] sm:$0xff] }
 0x1bb   :  { %11462 = vmatpush3.bf16.msra.mxu1 %v13367_v3  ;;  %9879 = vmatprep.mubr.f32.mxu1 %v13210_v44  ;;  %v7851_v44 = vld [vmem:[%s14582_s2 + $0x150] sm:$0xff] }
 0x1bc   :  { %11400 = vmatprep.subr.bf16.mxu0 %v13387_v12  ;;  %11464 = vmatprep.subr.bf16.mxu1 %v13389_v16  ;;  %v13470_v57 = vpack.c.bf16 %v7852_v40, %v7851_v44  ;;  %v7969_v40 = vld [vmem:[%s14584_s3 + $0x160] sm:$0xff] }
 0x1bd   :  { %9809 = vmatprep.mubr.f32.mxu0 %v13276_v11 }
 0x1be   :  { %11402 = vmatpush3.bf16.msra.mxu0 %v13387_v12 }
 0x1bf   :  { %11466 = vmatpush3.bf16.msra.mxu1 %v13389_v16  ;;  %11404 = vmatprep.subr.bf16.mxu0 %v13408_v21 }
 0x1c0   :  { %11468 = vmatprep.subr.bf16.mxu1 %v13412_v23 }
 0x1c2   :  { %11406 = vmatpush3.bf16.msra.mxu0 %v13408_v21 }
 0x1c3   :  { %11470 = vmatpush3.bf16.msra.mxu1 %v13412_v23  ;;  %11408 = vmatprep.subr.bf16.mxu0 %v13430_v33 }
 0x1c4   :  { %11472 = vmatprep.subr.bf16.mxu1 %v13433_v30 }
 0x1c6   :  { %11410 = vmatpush3.bf16.msra.mxu0 %v13430_v33 }
 0x1c7   :  { %11474 = vmatpush3.bf16.msra.mxu1 %v13433_v30  ;;  %11412 = vmatprep.subr.bf16.mxu0 %v13450_v38 }
 0x1c8   :  { %11476 = vmatprep.subr.bf16.mxu1 %v13453_v42 }
 0x1ca   :  { %11414 = vmatpush3.bf16.msra.mxu0 %v13450_v38 }
 0x1cb   :  { %11478 = vmatpush3.bf16.msra.mxu1 %v13453_v42  ;;  %11416 = vmatprep.subr.bf16.mxu0 %v13470_v57 }
 0x1cc   :  { %11480 = vmatprep.subr.bf16.mxu1 %v13473_v60 }
 0x1ce   :  { %11418 = vmatpush3.bf16.msra.mxu0 %v13470_v57 }
 0x1cf   :  { %11482 = vmatpush3.bf16.msra.mxu1 %v13473_v60  ;;  %11420 = vmatprep.subr.bf16.mxu0 %v13490_v24 }
 0x1d0   :  { %11484 = vmatprep.subr.bf16.mxu1 %v13493_v27 }
 0x1d2   :  { %11422 = vmatpush3.bf16.msra.mxu0 %v13490_v24 }
 0x1d3   :  { %11486 = vmatpush3.bf16.msra.mxu1 %v13493_v27  ;;  %11424 = vmatprep.subr.bf16.mxu0 %v13510_v54 }
 0x1d4   :  { %11488 = vmatprep.subr.bf16.mxu1 %v13513_v55 }
 0x1d6   :  { %11426 = vmatpush3.bf16.msra.mxu0 %v13510_v54 }
 0x1d7   :  { %11490 = vmatpush3.bf16.msra.mxu1 %v13513_v55  ;;  %11524 = vmatprep.subr.bf16.mxu0 %v13250_v48 }
 0x1d8   :  { %11492 = vmatprep.subr.bf16.mxu1 %v13364_v1 }
 0x1d9   :  { %9810 = vmatmul.mubr.f32.vlgmr.msra.gmra.mrb[12].mxu0 %v13381_v10 }
 0x1da   :  { %9880 = vmatmul.mubr.f32.vlgmr.msra.gmra.mrb[12].mxu1 %v13262_v63  ;;  %11526 = vmatpush3.bf16.msra.mxu0 %v13250_v48 }
 0x1db   :  { %11494 = vmatpush3.bf16.msra.mxu1 %v13364_v1  ;;  %9914 = vmatprep.mubr.f32.mxu1 %v13524_v58 }
 0x1dc   :  { %9949 = vmatprep.mubr.f32.mxu0 %v13524_v58  ;;  %11496 = vmatprep.subr.bf16.mxu1 %v13387_v12 }
 0x1dd   :  { %11528 = vmatprep.subr.bf16.mxu0 %v13267_v2 }
 0x1de   :  { %11530 = vmatpush3.bf16.msra.mxu0 %v13267_v2 }
 0x1df   :  { %11498 = vmatpush3.bf16.msra.mxu1 %v13387_v12  ;;  %11532 = vmatprep.subr.bf16.mxu0 %v13284_v14 }
 0x1e0   :  { %11500 = vmatprep.subr.bf16.mxu1 %v13408_v21 }
 0x1e2   :  { %11534 = vmatpush3.bf16.msra.mxu0 %v13284_v14 }
 0x1e3   :  { %11502 = vmatpush3.bf16.msra.mxu1 %v13408_v21  ;;  %11536 = vmatprep.subr.bf16.mxu0 %v13297_v22 }
 0x1e4   :  { %11504 = vmatprep.subr.bf16.mxu1 %v13430_v33 }
 0x1e6   :  { %11538 = vmatpush3.bf16.msra.mxu0 %v13297_v22 }
 0x1e7   :  { %11506 = vmatpush3.bf16.msra.mxu1 %v13430_v33  ;;  %11540 = vmatprep.subr.bf16.mxu0 %v13309_v41 }
 0x1e8   :  { %11508 = vmatprep.subr.bf16.mxu1 %v13450_v38 }
 0x1ea   :  { %11542 = vmatpush3.bf16.msra.mxu0 %v13309_v41 }
 0x1eb   :  { %11510 = vmatpush3.bf16.msra.mxu1 %v13450_v38  ;;  %11544 = vmatprep.subr.bf16.mxu0 %v13321_v45 }
 0x1ec   :  { %v13549_v32 = vpop.f32.mrb[8].mxu0  ;;  %11512 = vmatprep.subr.bf16.mxu1 %v13470_v57 }
 0x1ed   :  { %v13552_v63 = vpop.f32.mrb[9].mxu0 }
 0x1ee   :  { %11546 = vmatpush3.bf16.msra.mxu0 %v13321_v45 }
 0x1ef   :  { %11514 = vmatpush3.bf16.msra.mxu1 %v13470_v57  ;;  %11548 = vmatprep.subr.bf16.mxu0 %v13333_v50 }
 0x1f0   :  { %11516 = vmatprep.subr.bf16.mxu1 %v13490_v24 }
 0x1f2   :  { %11550 = vmatpush3.bf16.msra.mxu0 %v13333_v50 }
 0x1f3   :  { %11518 = vmatpush3.bf16.msra.mxu1 %v13490_v24  ;;  %11552 = vmatprep.subr.bf16.mxu0 %v13345_v56 }
 0x1f4   :  { %11520 = vmatprep.subr.bf16.mxu1 %v13510_v54 }
 0x1f6   :  { %11554 = vmatpush3.bf16.msra.mxu0 %v13345_v56 }
 0x1f7   :  { %11522 = vmatpush3.bf16.msra.mxu1 %v13510_v54  ;;  %11556 = vmatprep.subr.bf16.mxu0 %v13367_v3 }
 0x1f8   :  { %11620 = vmatprep.subr.bf16.mxu1 %v13250_v48 }
 0x1f9   :  { %9950 = vmatmul.mubr.f32.vlgmr.msra.gmra.mrb[14].mxu0 %v13564_v59 }
 0x1fa   :  { %9915 = vmatmul.mubr.f32.vlgmr.msra.gmra.mrb[12].mxu1 %v13564_v59  ;;  %11558 = vmatpush3.bf16.msra.mxu0 %v13367_v3 }
 0x1fb   :  { %9984 = vmatprep.mubr.f32.mxu0 %v13276_v11  ;;  %11622 = vmatpush3.bf16.msra.mxu1 %v13250_v48  ;;  %v2150_v48 = vmax.f32 %v13176_v39, 0.0  ;;  %v7957_v39 = vld [vmem:[%s14584_s3 + $0x100] sm:$0xff] }
 0x1fc   :  { %10054 = vmatprep.mubr.f32.mxu1 %v2149_v61  ;;  %11560 = vmatprep.subr.bf16.mxu0 %v13389_v16  ;;  %v7974_v11 = vld [vmem:[%s14584_s3 + $0x80] sm:$0xff] }
 0x1fd   :  { %11624 = vmatprep.subr.bf16.mxu1 %v13267_v2 }
 0x1fe   :  { %11562 = vmatpush3.bf16.msra.mxu0 %v13389_v16 }
 0x1ff   :  { %11626 = vmatpush3.bf16.msra.mxu1 %v13267_v2  ;;  %11564 = vmatprep.subr.bf16.mxu0 %v13412_v23  ;;  %v7958_v2 = vld [vmem:[%s14584_s3 + $0x108] sm:$0xff] }
 0x200   :  { %11628 = vmatprep.subr.bf16.mxu1 %v13284_v14 }
 0x202   :  { %11566 = vmatpush3.bf16.msra.mxu0 %v13412_v23 }
 0x203   :  { %11630 = vmatpush3.bf16.msra.mxu1 %v13284_v14  ;;  %11568 = vmatprep.subr.bf16.mxu0 %v13433_v30  ;;  %v7975_v14 = vld [vmem:[%s14584_s3 + $0x88] sm:$0xff] }
 0x204   :  { %11632 = vmatprep.subr.bf16.mxu1 %v13297_v22 }
 0x206   :  { %11570 = vmatpush3.bf16.msra.mxu0 %v13433_v30 }
 0x207   :  { %11634 = vmatpush3.bf16.msra.mxu1 %v13297_v22  ;;  %11572 = vmatprep.subr.bf16.mxu0 %v13453_v42  ;;  %v13649_v22 = vpack.c.bf16 %v7958_v2, %v7957_v39  ;;  %v4532_v39 = vld [vmem:[%s14584_s3 + $0x18] sm:$0xff] }
 0x208   :  { %11636 = vmatprep.subr.bf16.mxu1 %v13309_v41 }
 0x20a   :  { %11574 = vmatpush3.bf16.msra.mxu0 %v13453_v42 }
 0x20b   :  { %11638 = vmatpush3.bf16.msra.mxu1 %v13309_v41  ;;  %11576 = vmatprep.subr.bf16.mxu0 %v13473_v60  ;;  %v13654_v41 = vld [vmem:[%s14585_s10] ss:$0 sm:$0xff] }
 0x20c   :  { %v13592_v29 = vpop.f32.mrb[8].mxu1  ;;  %11640 = vmatprep.subr.bf16.mxu1 %v13321_v45 }
 0x20d   :  { %v2625_v43 = vpop.f32.mrb[9].mxu1 }
 0x20e   :  { %11578 = vmatpush3.bf16.msra.mxu0 %v13473_v60 }
 0x20f   :  { %11642 = vmatpush3.bf16.msra.mxu1 %v13321_v45  ;;  %11580 = vmatprep.subr.bf16.mxu0 %v13493_v27  ;;  %v13657_v45 = vpack.c.bf16 %v7975_v14, %v7974_v11 }
 0x210   :  { %11644 = vmatprep.subr.bf16.mxu1 %v13333_v50 }
 0x212   :  { %11582 = vmatpush3.bf16.msra.mxu0 %v13493_v27 }
 0x213   :  { %11646 = vmatpush3.bf16.msra.mxu1 %v13333_v50  ;;  %11584 = vmatprep.subr.bf16.mxu0 %v13513_v55  ;;  %v7959_v50 = vld [vmem:[%s14584_s3 + $0x110] sm:$0xff] }
 0x214   :  { %11648 = vmatprep.subr.bf16.mxu1 %v13345_v56 }
 0x216   :  { %11586 = vmatpush3.bf16.msra.mxu0 %v13513_v55 }
 0x217   :  { %11650 = vmatpush3.bf16.msra.mxu1 %v13345_v56  ;;  %11588 = vmatprep.subr.bf16.mxu0 %v13364_v1  ;;  %v13663_v56 = vadd.f32 %v13654_v41, %v2625_v43 }
 0x218   :  { %11652 = vmatprep.subr.bf16.mxu1 %v13367_v3 }
 0x219   :  { %9985 = vmatmul.mubr.f32.vlgmr.msra.gmra.mrb[14].mxu0 %v13381_v10  ;;  %v2645_v9 = vmax.f32 %v13663_v56, 0.0  ;;  %v7978_v10 = vld [vmem:[%s14584_s3 + $0xa0] sm:$0xff] }
 0x21a   :  { %10055 = vmatmul.mubr.f32.vlgmr.msra.gmra.mrb[14].mxu1 %v2150_v48  ;;  %11590 = vmatpush3.bf16.msra.mxu0 %v13364_v1  ;;  %v7977_v1 = vld [vmem:[%s14584_s3 + $0x98] sm:$0xff] }
 0x21b   :  { %10019 = vmatprep.mubr.f32.mxu0 %v2149_v61  ;;  %11654 = vmatpush3.bf16.msra.mxu1 %v13367_v3  ;;  %v13678_v3 = vpack.c.bf16 %v7960_v62, %v7959_v50  ;;  %v13680_v4 = vpack.c.bf16 %v7977_v1, %v7976_v0  ;;  %v4533_v50 = vld [vmem:[%s14584_s3 + $0x20] sm:$0xff]  ;;  %v4534_v62 = vld [vmem:[%s14584_s3 + $0x28] sm:$0xff]  ;;  %v4535_v1 = vld [vmem:[%s14584_s3 + $0x30] sm:$0xff] }
 0x21c   :  { %10089 = vmatprep.mubr.f32.mxu1 %v13524_v58  ;;  %11592 = vmatprep.subr.bf16.mxu0 %v13387_v12  ;;  %v4530_v58 = vld [vmem:[%s14584_s3 + $0x8] sm:$0xff]  ;;  %v13852_v0 = vpack.c.bf16 %v4534_v62, %v4533_v50 }
 0x21d   :  { %11656 = vmatprep.subr.bf16.mxu1 %v13389_v16 }
 0x21e   :  { %11594 = vmatpush3.bf16.msra.mxu0 %v13387_v12  ;;  %v7979_v12 = vld [vmem:[%s14584_s3 + $0xa8] sm:$0xff] }
 0x21f   :  { %11658 = vmatpush3.bf16.msra.mxu1 %v13389_v16  ;;  %11596 = vmatprep.subr.bf16.mxu0 %v13408_v21  ;;  %v13700_v16 = vpack.c.bf16 %v7962_v7, %v7961_v6  ;;  %v13704_v17 = vpack.c.bf16 %v7979_v12, %v7978_v10  ;;  %v4536_v6 = vld [vmem:[%s14584_s3 + $0x38] sm:$0xff]  ;;  %v4537_v7 = vld [vmem:[%s14584_s3 + $0x40] sm:$0xff]  ;;  %v4539_v12 = vld [vmem:[%s14584_s3 + $0x50] sm:$0xff] }
 0x220   :  { %11660 = vmatprep.subr.bf16.mxu1 %v13412_v23  ;;  %v13865_v56 = vpack.c.bf16 %v4536_v6, %v4535_v1 }
 0x222   :  { %11598 = vmatpush3.bf16.msra.mxu0 %v13408_v21  ;;  %v7981_v21 = vld [vmem:[%s14584_s3 + $0xb8] sm:$0xff] }
 0x223   :  { %11662 = vmatpush3.bf16.msra.mxu1 %v13412_v23  ;;  %11600 = vmatprep.subr.bf16.mxu0 %v13430_v33  ;;  %v13721_v23 = vpack.c.bf16 %v7964_v13, %v7963_v19  ;;  %v13724_v25 = vpack.c.bf16 %v7981_v21, %v7980_v20  ;;  %v4540_v19 = vld [vmem:[%s14584_s3 + $0x58] sm:$0xff]  ;;  %v4541_v20 = vld [vmem:[%s14584_s3 + $0x60] sm:$0xff]  ;;  %v4542_v21 = vld [vmem:[%s14584_s3 + $0x68] sm:$0xff] }
 0x224   :  { %11664 = vmatprep.subr.bf16.mxu1 %v13433_v30  ;;  %v13889_v13 = vpack.c.bf16 %v4540_v19, %v4539_v12 }
 0x226   :  { %11602 = vmatpush3.bf16.msra.mxu0 %v13430_v33  ;;  %v7983_v33 = vld [vmem:[%s14584_s3 + $0xc8] sm:$0xff] }
 0x227   :  { %11666 = vmatpush3.bf16.msra.mxu1 %v13433_v30  ;;  %11604 = vmatprep.subr.bf16.mxu0 %v13450_v38  ;;  %v13741_v30 = vpack.c.bf16 %v7966_v28, %v7965_v26  ;;  %v13744_v34 = vpack.c.bf16 %v7983_v33, %v7982_v31  ;;  %v13901_v26 = vpack.c.bf16 %v4542_v21, %v4541_v20  ;;  %v4543_v31 = vld [vmem:[%s14584_s3 + $0x70] sm:$0xff]  ;;  %v4544_v33 = vld [vmem:[%s14584_s3 + $0x78] sm:$0xff]  ;;  %v8078_v21 = vld [vmem:[%s14586_s4 + $0x68] sm:$0xff] }
 0x228   :  { %11668 = vmatprep.subr.bf16.mxu1 %v13453_v42 }
 0x22a   :  { %11606 = vmatpush3.bf16.msra.mxu0 %v13450_v38  ;;  %v7985_v38 = vld [vmem:[%s14584_s3 + $0xd8] sm:$0xff] }
 0x22b   :  { %11670 = vmatpush3.bf16.msra.mxu1 %v13453_v42  ;;  %11608 = vmatprep.subr.bf16.mxu0 %v13470_v57  ;;  %v13761_v42 = vpack.c.bf16 %v7968_v36, %v7967_v35  ;;  %v13764_v44 = vpack.c.bf16 %v7985_v38, %v7984_v37  ;;  %v13913_v36 = vpack.c.bf16 %v4544_v33, %v4543_v31  ;;  %v8080_v31 = vld [vmem:[%s14586_s4 + $0x78] sm:$0xff] }
 0x22c   :  { %11672 = vmatprep.subr.bf16.mxu1 %v13473_v60  ;;  %v2350_v37 = vadd.f32 %v13549_v32, %v13654_v41 }
 0x22e   :  { %11610 = vmatpush3.bf16.msra.mxu0 %v13470_v57  ;;  %v7987_v57 = vld [vmem:[%s14584_s3 + $0xe8] sm:$0xff] }
 0x22f   :  { %11674 = vmatpush3.bf16.msra.mxu1 %v13473_v60  ;;  %11612 = vmatprep.subr.bf16.mxu0 %v13490_v24  ;;  %v13781_v60 = vpack.c.bf16 %v7970_v46, %v7969_v40  ;;  %v13784_v8 = vpack.c.bf16 %v7987_v57, %v7986_v53  ;;  %v2352_v40 = vmax.f32 %v2350_v37, 0.0 }
 0x230   :  { %11676 = vmatprep.subr.bf16.mxu1 %v13493_v27 }
 0x232   :  { %11614 = vmatpush3.bf16.msra.mxu0 %v13490_v24 }
 0x233   :  { %11678 = vmatpush3.bf16.msra.mxu1 %v13493_v27  ;;  %11616 = vmatprep.subr.bf16.mxu0 %v13510_v54  ;;  %v7988_v27 = vld [vmem:[%s14584_s3 + $0xf0] sm:$0xff] }
 0x234   :  { %11680 = vmatprep.subr.bf16.mxu1 %v13513_v55 }
 0x236   :  { %11618 = vmatpush3.bf16.msra.mxu0 %v13510_v54  ;;  %v13805_v54 = vpack.c.bf16 %v7989_v47, %v7988_v27 }
 0x237   :  { %11682 = vmatpush3.bf16.msra.mxu1 %v13513_v55  ;;  %11684 = vmatprep.subr.bf16.mxu0 %v13649_v22  ;;  %v4529_v55 = vld [vmem:[%s14584_s3] sm:$0xff] }
 0x238   :  { %11748 = vmatprep.subr.bf16.mxu1 %v13657_v45  ;;  %v13822_v43 = vpack.c.bf16 %v4530_v58, %v4529_v55  ;;  %v8085_v58 = vld [vmem:[%s14586_s4 + $0xa0] sm:$0xff] }
 0x239   :  { %10020 = vmatmul.mubr.f32.vlgmr.msra.gmra.mrb[14].mxu0 %v2150_v48  ;;  %v2349_v48 = vadd.f32 %v13654_v41, %v13552_v63 }
 0x23a   :  { %10090 = vmatmul.mubr.f32.vlgmr.msra.gmra.mrb[14].mxu1 %v13564_v59  ;;  %11686 = vmatpush3.bf16.msra.mxu0 %v13649_v22  ;;  %v13816_v59 = vadd.f32 %v13592_v29, %v13654_v41  ;;  %v4531_v29 = vld [vmem:[%s14584_s3 + $0x10] sm:$0xff] }
 0x23b   :  { %10124 = vmatprep.mubr.f32.mxu0 %v2645_v9  ;;  %11750 = vmatpush3.bf16.msra.mxu1 %v13657_v45  ;;  %v2351_v63 = vmax.f32 %v2349_v48, 0.0  ;;  %v13839_v14 = vpack.c.bf16 %v4532_v39, %v4531_v29  ;;  %v8087_v48 = vld [vmem:[%s14586_s4 + $0xb0] sm:$0xff]  ;;  %v8088_v29 = vld [vmem:[%s14586_s4 + $0xb8] sm:$0xff] }
 0x23c   :  { %11688 = vmatprep.subr.bf16.mxu0 %v13678_v3  ;;  %11752 = vmatprep.subr.bf16.mxu1 %v13680_v4  ;;  %v2646_v2 = vmax.f32 %v13816_v59, 0.0  ;;  %v8086_v59 = vld [vmem:[%s14586_s4 + $0xa8] sm:$0xff]  ;;  %v14055_v39 = vpack.c.bf16 %v8088_v29, %v8087_v48 }
 0x23e   :  { %11690 = vmatpush3.bf16.msra.mxu0 %v13678_v3 }
 0x23f   :  { %11754 = vmatpush3.bf16.msra.mxu1 %v13680_v4  ;;  %11692 = vmatprep.subr.bf16.mxu0 %v13700_v16 }
 0x240   :  { %11756 = vmatprep.subr.bf16.mxu1 %v13704_v17 }
 0x242   :  { %11694 = vmatpush3.bf16.msra.mxu0 %v13700_v16 }
 0x243   :  { %11758 = vmatpush3.bf16.msra.mxu1 %v13704_v17  ;;  %11696 = vmatprep.subr.bf16.mxu0 %v13721_v23 }
 0x244   :  { %11760 = vmatprep.subr.bf16.mxu1 %v13724_v25 }
 0x246   :  { %11698 = vmatpush3.bf16.msra.mxu0 %v13721_v23 }
 0x247   :  { %11762 = vmatpush3.bf16.msra.mxu1 %v13724_v25  ;;  %11700 = vmatprep.subr.bf16.mxu0 %v13741_v30 }
 0x248   :  { %11764 = vmatprep.subr.bf16.mxu1 %v13744_v34 }
 0x24a   :  { %11702 = vmatpush3.bf16.msra.mxu0 %v13741_v30 }
 0x24b   :  { %11766 = vmatpush3.bf16.msra.mxu1 %v13744_v34  ;;  %11704 = vmatprep.subr.bf16.mxu0 %v13761_v42 }
 0x24c   :  { %v9601_v5 = vpop.f32.mrb[10].mxu0  ;;  %11768 = vmatprep.subr.bf16.mxu1 %v13764_v44 }
 0x24d   :  { %v2920_v24 = vpop.f32.mrb[11].mxu0  ;;  %v2939_v61 = vadd.f32 %v9601_v5, %v13654_v41 }
 0x24e   :  { %v2938_v49 = vadd.f32 %v13654_v41, %v2920_v24  ;;  %11706 = vmatpush3.bf16.msra.mxu0 %v13761_v42  ;;  %v8082_v24 = vld [vmem:[%s14586_s4 + $0x88] sm:$0xff] }
 0x24f   :  { %11770 = vmatpush3.bf16.msra.mxu1 %v13764_v44  ;;  %11708 = vmatprep.subr.bf16.mxu0 %v13781_v60  ;;  %v2941_v11 = vmax.f32 %v2939_v61, 0.0  ;;  %v14025_v47 = vpack.c.bf16 %v8082_v24, %v8081_v18  ;;  %v14045_v61 = vpack.c.bf16 %v8086_v59, %v8085_v58  ;;  %v5617_v18 = vld [vmem:[%s14586_s4 + $0x30] sm:$0xff]  ;;  %v5618_v24 = vld [vmem:[%s14586_s4 + $0x38] sm:$0xff] }
 0x250   :  { %v2940_v52 = vmax.f32 %v2938_v49, 0.0  ;;  %11772 = vmatprep.subr.bf16.mxu1 %v13784_v8  ;;  %v8083_v49 = vld [vmem:[%s14586_s4 + $0x90] sm:$0xff] }
 0x252   :  { %11710 = vmatpush3.bf16.msra.mxu0 %v13781_v60  ;;  %10194 = vmatprep.mubr.f32.mxu1 %v2940_v52  ;;  %v8084_v52 = vld [vmem:[%s14586_s4 + $0x98] sm:$0xff] }
 0x253   :  { %11774 = vmatpush3.bf16.msra.mxu1 %v13784_v8  ;;  %11712 = vmatprep.subr.bf16.mxu0 %v13802_v51  ;;  %v14035_v55 = vpack.c.bf16 %v8084_v52, %v8083_v49 }
 0x254   :  { %11776 = vmatprep.subr.bf16.mxu1 %v13805_v54 }
 0x256   :  { %11714 = vmatpush3.bf16.msra.mxu0 %v13802_v51 }
 0x257   :  { %11778 = vmatpush3.bf16.msra.mxu1 %v13805_v54  ;;  %11716 = vmatprep.subr.bf16.mxu0 %v13657_v45 }
 0x258   :  { %11780 = vmatprep.subr.bf16.mxu1 %v13822_v43 }
 0x259   :  { %10125 = vmatmul.mubr.f32.vlgmr.msra.gmra.mrb[16].mxu0 %v2646_v2 }
 0x25a   :  { %10195 = vmatmul.mubr.f32.vlgmr.msra.gmra.mrb[16].mxu1 %v2941_v11  ;;  %11718 = vmatpush3.bf16.msra.mxu0 %v13657_v45  ;;  %v8074_v11 = vld [vmem:[%s14586_s4 + $0x48] sm:$0xff] }
 0x25b   :  { %10159 = vmatprep.mubr.f32.mxu0 %v2351_v63  ;;  %11782 = vmatpush3.bf16.msra.mxu1 %v13822_v43 }
 0x25c   :  { %10229 = vmatprep.mubr.f32.mxu1 %v2645_v9  ;;  %11720 = vmatprep.subr.bf16.mxu0 %v13680_v4  ;;  %v4538_v9 = vld [vmem:[%s14584_s3 + $0x48] sm:$0xff] }
 0x25d   :  { %11784 = vmatprep.subr.bf16.mxu1 %v13839_v14  ;;  %v13877_v10 = vpack.c.bf16 %v4538_v9, %v4537_v7 }
 0x25e   :  { %11722 = vmatpush3.bf16.msra.mxu0 %v13680_v4 }
 0x25f   :  { %11786 = vmatpush3.bf16.msra.mxu1 %v13839_v14  ;;  %11724 = vmatprep.subr.bf16.mxu0 %v13704_v17 }
 0x260   :  { %11788 = vmatprep.subr.bf16.mxu1 %v13852_v0 }
 0x262   :  { %11726 = vmatpush3.bf16.msra.mxu0 %v13704_v17 }
 0x263   :  { %11790 = vmatpush3.bf16.msra.mxu1 %v13852_v0  ;;  %11728 = vmatprep.subr.bf16.mxu0 %v13724_v25 }
 0x264   :  { %11792 = vmatprep.subr.bf16.mxu1 %v13865_v56 }
 0x266   :  { %11730 = vmatpush3.bf16.msra.mxu0 %v13724_v25 }
 0x267   :  { %11794 = vmatpush3.bf16.msra.mxu1 %v13865_v56  ;;  %11732 = vmatprep.subr.bf16.mxu0 %v13744_v34 }
 0x268   :  { %11796 = vmatprep.subr.bf16.mxu1 %v13877_v10 }
 0x26a   :  { %11734 = vmatpush3.bf16.msra.mxu0 %v13744_v34 }
 0x26b   :  { %11798 = vmatpush3.bf16.msra.mxu1 %v13877_v10  ;;  %11736 = vmatprep.subr.bf16.mxu0 %v13764_v44 }
 0x26c   :  { %11800 = vmatprep.subr.bf16.mxu1 %v13889_v13 }
 0x26d   :  { %v9706_v28 = vpop.f32.mrb[10].mxu1 }
 0x26e   :  { %v3215_v35 = vpop.f32.mrb[11].mxu1  ;;  %11738 = vmatpush3.bf16.msra.mxu0 %v13764_v44  ;;  %v3234_v46 = vadd.f32 %v9706_v28, %v13654_v41  ;;  %v8079_v28 = vld [vmem:[%s14586_s4 + $0x70] sm:$0xff] }
 0x26f   :  { %11802 = vmatpush3.bf16.msra.mxu1 %v13889_v13  ;;  %11740 = vmatprep.subr.bf16.mxu0 %v13784_v8  ;;  %v13922_v38 = vadd.f32 %v13654_v41, %v3215_v35  ;;  %v14140_v33 = vpack.c.bf16 %v8080_v31, %v8079_v28  ;;  %v5611_v35 = vld [vmem:[%s14586_s4] sm:$0xff] }
 0x270   :  { %11804 = vmatprep.subr.bf16.mxu1 %v13901_v26  ;;  %v3236_v53 = vmax.f32 %v3234_v46, 0.0  ;;  %v8093_v31 = vld [vmem:[%s14589_s12] ss:$0 sm:$0xff] }
 0x271   :  { %v3235_v32 = vmax.f32 %v13922_v38, 0.0 }
 0x272   :  { %11742 = vmatpush3.bf16.msra.mxu0 %v13784_v8 }
 0x273   :  { %11806 = vmatpush3.bf16.msra.mxu1 %v13901_v26  ;;  %11744 = vmatprep.subr.bf16.mxu0 %v13805_v54 }
 0x274   :  { %11808 = vmatprep.subr.bf16.mxu1 %v13913_v36 }
 0x276   :  { %11746 = vmatpush3.bf16.msra.mxu0 %v13805_v54 }
 0x277   :  { %11810 = vmatpush3.bf16.msra.mxu1 %v13913_v36  ;;  %11844 = vmatprep.subr.bf16.mxu0 %v13657_v45 }
 0x278   :  { %11812 = vmatprep.subr.bf16.mxu1 %v13649_v22 }
 0x279   :  { %10160 = vmatmul.mubr.f32.vlgmr.msra.gmra.mrb[16].mxu0 %v2352_v40 }
 0x27a   :  { %10230 = vmatmul.mubr.f32.vlgmr.msra.gmra.mrb[16].mxu1 %v2646_v2  ;;  %11846 = vmatpush3.bf16.msra.mxu0 %v13657_v45  ;;  %v8073_v2 = vld [vmem:[%s14586_s4 + $0x40] sm:$0xff] }
 0x27b   :  { %11814 = vmatpush3.bf16.msra.mxu1 %v13649_v22  ;;  %10264 = vmatprep.mubr.f32.mxu1 %v3235_v32  ;;  %v14065_v63 = vpack.c.bf16 %v8074_v11, %v8073_v2  ;;  %v8161_v11 = vld [vmem:[%s14588_s5 + $0x80] sm:$0xff] }
 0x27c   :  { %11816 = vmatprep.subr.bf16.mxu1 %v13678_v3  ;;  %11848 = vmatprep.subr.bf16.mxu0 %v13680_v4 }
 0x27e   :  { %11850 = vmatpush3.bf16.msra.mxu0 %v13680_v4 }
 0x27f   :  { %11818 = vmatpush3.bf16.msra.mxu1 %v13678_v3  ;;  %11852 = vmatprep.subr.bf16.mxu0 %v13704_v17 }
 0x280   :  { %11820 = vmatprep.subr.bf16.mxu1 %v13700_v16 }
 0x282   :  { %11854 = vmatpush3.bf16.msra.mxu0 %v13704_v17 }
 0x283   :  { %11822 = vmatpush3.bf16.msra.mxu1 %v13700_v16  ;;  %11856 = vmatprep.subr.bf16.mxu0 %v13724_v25 }
 0x284   :  { %11824 = vmatprep.subr.bf16.mxu1 %v13721_v23 }
 0x286   :  { %11858 = vmatpush3.bf16.msra.mxu0 %v13724_v25 }
 0x287   :  { %11826 = vmatpush3.bf16.msra.mxu1 %v13721_v23  ;;  %11860 = vmatprep.subr.bf16.mxu0 %v13744_v34 }
 0x288   :  { %11828 = vmatprep.subr.bf16.mxu1 %v13741_v30 }
 0x28a   :  { %11862 = vmatpush3.bf16.msra.mxu0 %v13744_v34 }
 0x28b   :  { %11830 = vmatpush3.bf16.msra.mxu1 %v13741_v30  ;;  %11864 = vmatprep.subr.bf16.mxu0 %v13764_v44 }
 0x28c   :  { %11832 = vmatprep.subr.bf16.mxu1 %v13761_v42 }
 0x28e   :  { %11866 = vmatpush3.bf16.msra.mxu0 %v13764_v44 }
 0x28f   :  { %11834 = vmatpush3.bf16.msra.mxu1 %v13761_v42  ;;  %11868 = vmatprep.subr.bf16.mxu0 %v13784_v8 }
 0x290   :  { %11836 = vmatprep.subr.bf16.mxu1 %v13781_v60 }
 0x292   :  { %11870 = vmatpush3.bf16.msra.mxu0 %v13784_v8 }
 0x293   :  { %11838 = vmatpush3.bf16.msra.mxu1 %v13781_v60  ;;  %11872 = vmatprep.subr.bf16.mxu0 %v13805_v54 }
 0x294   :  { %11840 = vmatprep.subr.bf16.mxu1 %v13802_v51 }
 0x296   :  { %11874 = vmatpush3.bf16.msra.mxu0 %v13805_v54 }
 0x297   :  { %11842 = vmatpush3.bf16.msra.mxu1 %v13802_v51  ;;  %11876 = vmatprep.subr.bf16.mxu0 %v13822_v43 }
 0x298   :  { %11940 = vmatprep.subr.bf16.mxu1 %v13657_v45 }
 0x29a   :  { %10265 = vmatmul.mubr.f32.vlgmr.msra.gmra.mrb[16].mxu1 %v3236_v53 }
 0x29b   :  { %11942 = vmatpush3.bf16.msra.mxu1 %v13657_v45 }
 0x29c   :  { %11944 = vmatprep.subr.bf16.mxu1 %v13680_v4 }
 0x29f   :  { %11946 = vmatpush3.bf16.msra.mxu1 %v13680_v4 }
 0x2a0   :  { %11948 = vmatprep.subr.bf16.mxu1 %v13704_v17 }
 0x2a3   :  { %11950 = vmatpush3.bf16.msra.mxu1 %v13704_v17 }
 0x2a4   :  { %11952 = vmatprep.subr.bf16.mxu1 %v13724_v25 }
 0x2a7   :  { %11954 = vmatpush3.bf16.msra.mxu1 %v13724_v25 }
 0x2a8   :  { %11956 = vmatprep.subr.bf16.mxu1 %v13744_v34 }
 0x2ab   :  { %11958 = vmatpush3.bf16.msra.mxu1 %v13744_v34 }
 0x2ac   :  { %v9811_v57 = vpop.f32.mrb[12].mxu0  ;;  %11960 = vmatprep.subr.bf16.mxu1 %v13764_v44 }
 0x2ad   :  { %v3529_v45 = vadd.f32 %v9811_v57, %v13654_v41  ;;  %v3510_v5 = vpop.f32.mrb[13].mxu0 }
 0x2ae   :  { %v3528_v4 = vadd.f32 %v13654_v41, %v3510_v5  ;;  %v13998_v41 = vld [vmem:[%s14585_s10] ss:$0 sm:$0xff] }
 0x2af   :  { %11962 = vmatpush3.bf16.msra.mxu1 %v13764_v44  ;;  %v3531_v17 = vmax.f32 %v3529_v45, 0.0 }
 0x2b0   :  { %v3530_v15 = vmax.f32 %v3528_v4, 0.0  ;;  %11964 = vmatprep.subr.bf16.mxu1 %v13784_v8 }
 0x2b2   :  { %10299 = vmatprep.mubr.f32.mxu0 %v3530_v15 }
 0x2b3   :  { %10300 = vmatmul.mubr.f32.vlgmr.msra.gmra.mrb[18].mxu0 %v3531_v17  ;;  %11966 = vmatpush3.bf16.msra.mxu1 %v13784_v8  ;;  %v5613_v17 = vld [vmem:[%s14586_s4 + $0x10] sm:$0xff] }
 0x2b4   :  { %11878 = vmatpush3.bf16.msra.mxu0 %v13822_v43  ;;  %10334 = vmatprep.mubr.f32.mxu0 %v3235_v32 }
 0x2b5   :  { %11880 = vmatprep.subr.bf16.mxu0 %v13839_v14  ;;  %11968 = vmatprep.subr.bf16.mxu1 %v13805_v54 }
 0x2b7   :  { %11970 = vmatpush3.bf16.msra.mxu1 %v13805_v54 }
 0x2b8   :  { %11882 = vmatpush3.bf16.msra.mxu0 %v13839_v14  ;;  %11972 = vmatprep.subr.bf16.mxu1 %v13822_v43 }
 0x2b9   :  { %11884 = vmatprep.subr.bf16.mxu0 %v13852_v0 }
 0x2bc   :  { %11886 = vmatpush3.bf16.msra.mxu0 %v13852_v0 }
 0x2bd   :  { %11888 = vmatprep.subr.bf16.mxu0 %v13865_v56 }
 0x2c0   :  { %11890 = vmatpush3.bf16.msra.mxu0 %v13865_v56 }
 0x2c1   :  { %11892 = vmatprep.subr.bf16.mxu0 %v13877_v10 }
 0x2c4   :  { %11894 = vmatpush3.bf16.msra.mxu0 %v13877_v10 }
 0x2c5   :  { %11896 = vmatprep.subr.bf16.mxu0 %v13889_v13 }
 0x2c8   :  { %11898 = vmatpush3.bf16.msra.mxu0 %v13889_v13 }
 0x2c9   :  { %11900 = vmatprep.subr.bf16.mxu0 %v13901_v26 }
 0x2cc   :  { %11902 = vmatpush3.bf16.msra.mxu0 %v13901_v26 }
 0x2cd   :  { %v9916_v25 = vpop.f32.mrb[12].mxu1  ;;  %11904 = vmatprep.subr.bf16.mxu0 %v13913_v36 }
 0x2ce   :  { %v3805_v34 = vpop.f32.mrb[13].mxu1  ;;  %v3824_v27 = vadd.f32 %v9916_v25, %v13998_v41 }
 0x2cf   :  { %v3823_v44 = vadd.f32 %v13998_v41, %v3805_v34  ;;  %v5615_v34 = vld [vmem:[%s14586_s4 + $0x20] sm:$0xff] }
 0x2d0   :  { %11906 = vmatpush3.bf16.msra.mxu0 %v13913_v36  ;;  %v3826_v54 = vmax.f32 %v3824_v27, 0.0  ;;  %v14215_v27 = vpack.c.bf16 %v5618_v24, %v5617_v18 }
 0x2d1   :  { %v3825_v8 = vmax.f32 %v3823_v44, 0.0  ;;  %11908 = vmatprep.subr.bf16.mxu0 %v13649_v22  ;;  %v5616_v44 = vld [vmem:[%s14586_s4 + $0x28] sm:$0xff] }
 0x2d3   :  { %10335 = vmatmul.mubr.f32.vlgmr.msra.gmra.mrb[18].mxu0 %v3236_v53 }
 0x2d4   :  { %11910 = vmatpush3.bf16.msra.mxu0 %v13649_v22  ;;  %10369 = vmatprep.mubr.f32.mxu0 %v3825_v8 }
 0x2d5   :  { %11912 = vmatprep.subr.bf16.mxu0 %v13678_v3 }
 0x2d8   :  { %11914 = vmatpush3.bf16.msra.mxu0 %v13678_v3 }
 0x2d9   :  { %11916 = vmatprep.subr.bf16.mxu0 %v13700_v16 }
 0x2dc   :  { %11918 = vmatpush3.bf16.msra.mxu0 %v13700_v16 }
 0x2dd   :  { %11920 = vmatprep.subr.bf16.mxu0 %v13721_v23 }
 0x2e0   :  { %11922 = vmatpush3.bf16.msra.mxu0 %v13721_v23 }
 0x2e1   :  { %11924 = vmatprep.subr.bf16.mxu0 %v13741_v30 }
 0x2e4   :  { %11926 = vmatpush3.bf16.msra.mxu0 %v13741_v30 }
 0x2e5   :  { %11928 = vmatprep.subr.bf16.mxu0 %v13761_v42 }
 0x2e8   :  { %11930 = vmatpush3.bf16.msra.mxu0 %v13761_v42 }
 0x2e9   :  { %11932 = vmatprep.subr.bf16.mxu0 %v13781_v60 }
 0x2ec   :  { %11934 = vmatpush3.bf16.msra.mxu0 %v13781_v60 }
 0x2ed   :  { %11936 = vmatprep.subr.bf16.mxu0 %v13802_v51 }
 0x2f0   :  { %11938 = vmatpush3.bf16.msra.mxu0 %v13802_v51 }
 0x2f1   :  { %12036 = vmatprep.subr.bf16.mxu0 %v14025_v47 }
 0x2f3   :  { %10370 = vmatmul.mubr.f32.vlgmr.msra.gmra.mrb[18].mxu0 %v3826_v54 }
 0x2f4   :  { %12038 = vmatpush3.bf16.msra.mxu0 %v14025_v47 }
 0x2f5   :  { %12040 = vmatprep.subr.bf16.mxu0 %v14035_v55 }
 0x2f8   :  { %12042 = vmatpush3.bf16.msra.mxu0 %v14035_v55 }
 0x2f9   :  { %12044 = vmatprep.subr.bf16.mxu0 %v14045_v61 }
 0x2fc   :  { %12046 = vmatpush3.bf16.msra.mxu0 %v14045_v61 }
 0x2fd   :  { %12048 = vmatprep.subr.bf16.mxu0 %v14055_v39 }
 0x300   :  { %12050 = vmatpush3.bf16.msra.mxu0 %v14055_v39 }
 0x301   :  { %12052 = vmatprep.subr.bf16.mxu0 %v14065_v63 }
 0x30c   :  { %v10021_v50 = vpop.f32.mrb[14].mxu0 }
 0x30d   :  { %v4119_v62 = vadd.f32 %v10021_v50, %v13998_v41  ;;  %v10091_v1 = vpop.f32.mrb[14].mxu1  ;;  %v4100_v6 = vpop.f32.mrb[15].mxu0 }
 0x30e   :  { %v4118_v7 = vadd.f32 %v13998_v41, %v4100_v6  ;;  %v4302_v9 = vpop.f32.mrb[15].mxu1 }
 0x30f   :  { %v4121_v19 = vmax.f32 %v4119_v62, 0.0 }
 0x310   :  { %v4120_v12 = vmax.f32 %v4118_v7, 0.0 }
 0x312   :  { %10404 = vmatprep.mubr.f32.mxu1 %v4120_v12 }
 0x313   :  { %10405 = vmatmul.mubr.f32.vlgmr.msra.gmra.mrb[18].mxu1 %v4121_v19 }
 0x314   :  { %11974 = vmatpush3.bf16.msra.mxu1 %v13822_v43  ;;  %10439 = vmatprep.mubr.f32.mxu1 %v3825_v8  ;;  %v4318_v43 = vadd.f32 %v13998_v41, %v4302_v9  ;;  %v14205_v8 = vpack.c.bf16 %v5616_v44, %v5615_v34 }
 0x315   :  { %11976 = vmatprep.subr.bf16.mxu1 %v13839_v14 }
 0x318   :  { %11978 = vmatpush3.bf16.msra.mxu1 %v13839_v14  ;;  %v4320_v14 = vmax.f32 %v4318_v43, 0.0  ;;  %v8165_v43 = vld [vmem:[%s14588_s5 + $0xa0] sm:$0xff] }
 0x319   :  { %11980 = vmatprep.subr.bf16.mxu1 %v13852_v0 }
 0x31c   :  { %11982 = vmatpush3.bf16.msra.mxu1 %v13852_v0 }
 0x31d   :  { %11984 = vmatprep.subr.bf16.mxu1 %v13865_v56 }
 0x320   :  { %11986 = vmatpush3.bf16.msra.mxu1 %v13865_v56 }
 0x321   :  { %11988 = vmatprep.subr.bf16.mxu1 %v13877_v10 }
 0x324   :  { %11990 = vmatpush3.bf16.msra.mxu1 %v13877_v10  ;;  %v8075_v10 = vld [vmem:[%s14586_s4 + $0x50] sm:$0xff] }
 0x325   :  { %11992 = vmatprep.subr.bf16.mxu1 %v13889_v13 }
 0x328   :  { %11994 = vmatpush3.bf16.msra.mxu1 %v13889_v13 }
 0x329   :  { %11996 = vmatprep.subr.bf16.mxu1 %v13901_v26 }
 0x32c   :  { %11998 = vmatpush3.bf16.msra.mxu1 %v13901_v26 }
 0x32d   :  { %12000 = vmatprep.subr.bf16.mxu1 %v13913_v36 }
 0x330   :  { %12002 = vmatpush3.bf16.msra.mxu1 %v13913_v36  ;;  %v5612_v36 = vld [vmem:[%s14586_s4 + $0x8] sm:$0xff] }
 0x331   :  { %12004 = vmatprep.subr.bf16.mxu1 %v13649_v22  ;;  %v14150_v37 = vpack.c.bf16 %v5612_v36, %v5611_v35 }
 0x333   :  { %10440 = vmatmul.mubr.f32.vlgmr.msra.gmra.mrb[18].mxu1 %v3826_v54 }
 0x334   :  { %12006 = vmatpush3.bf16.msra.mxu1 %v13649_v22  ;;  %10474 = vmatprep.mubr.f32.mxu1 %v4320_v14  ;;  %v14103_v22 = vld [vmem:[%s14587_s11] ss:$0 sm:$0xff]  ;;  %v8166_v14 = vld [vmem:[%s14588_s5 + $0xa8] sm:$0xff] }
 0x335   :  { %12008 = vmatprep.subr.bf16.mxu1 %v13678_v3 }
 0x338   :  { %12010 = vmatpush3.bf16.msra.mxu1 %v13678_v3 }
 0x339   :  { %12012 = vmatprep.subr.bf16.mxu1 %v13700_v16 }
 0x33c   :  { %12014 = vmatpush3.bf16.msra.mxu1 %v13700_v16  ;;  %v4319_v16 = vadd.f32 %v10091_v1, %v13998_v41  ;;  %v5614_v41 = vld [vmem:[%s14586_s4 + $0x18] sm:$0xff] }
 0x33d   :  { %12016 = vmatprep.subr.bf16.mxu1 %v13721_v23  ;;  %v14192_v25 = vpack.c.bf16 %v5614_v41, %v5613_v17 }
 0x33e   :  { %v4321_v13 = vmax.f32 %v4319_v16, 0.0  ;;  %v8168_v16 = vld [vmem:[%s14588_s5 + $0xb8] sm:$0xff] }
 0x340   :  { %12018 = vmatpush3.bf16.msra.mxu1 %v13721_v23 }
 0x341   :  { %12020 = vmatprep.subr.bf16.mxu1 %v13741_v30 }
 0x344   :  { %12022 = vmatpush3.bf16.msra.mxu1 %v13741_v30 }
 0x345   :  { %12024 = vmatprep.subr.bf16.mxu1 %v13761_v42 }
 0x348   :  { %12026 = vmatpush3.bf16.msra.mxu1 %v13761_v42 }
 0x349   :  { %12028 = vmatprep.subr.bf16.mxu1 %v13781_v60 }
 0x34c   :  { %12030 = vmatpush3.bf16.msra.mxu1 %v13781_v60  ;;  %v10161_v3 = vpop.f32.mrb[16].mxu0  ;;  %v8076_v60 = vld [vmem:[%s14586_s4 + $0x58] sm:$0xff] }
 0x34d   :  { %v4521_v23 = vadd.f32 %v10161_v3, %v14103_v22  ;;  %v4504_v0 = vpop.f32.mrb[17].mxu0  ;;  %12032 = vmatprep.subr.bf16.mxu1 %v13802_v51  ;;  %v14120_v20 = vpack.c.bf16 %v8076_v60, %v8075_v10  ;;  %v8167_v3 = vld [vmem:[%s14588_s5 + $0xb0] sm:$0xff]  ;;  %v8156_v10 = vld [vmem:[%s14588_s5 + $0x58] sm:$0xff] }
 0x34e   :  { %v4520_v30 = vadd.f32 %v14103_v22, %v4504_v0  ;;  %v8153_v0 = vld [vmem:[%s14588_s5 + $0x40] sm:$0xff] }
 0x34f   :  { %v4523_v42 = vmax.f32 %v4521_v23, 0.0  ;;  %v14317_v23 = vpack.c.bf16 %v8168_v16, %v8167_v3 }
 0x350   :  { %v4522_v56 = vmax.f32 %v4520_v30, 0.0  ;;  %12034 = vmatpush3.bf16.msra.mxu1 %v13802_v51  ;;  %v8077_v51 = vld [vmem:[%s14586_s4 + $0x60] sm:$0xff]  ;;  %v8154_v30 = vld [vmem:[%s14588_s5 + $0x48] sm:$0xff] }
 0x351   :  { %4526 = vst.msk [vmem:[#allocation4 + $0x8] sm:$0xff] %vm4524_vm1, %v4523_v42  ;;  %12116 = vmatprep.subr.bf16.mxu1 %v14065_v63  ;;  %v14130_v26 = vpack.c.bf16 %v8078_v21, %v8077_v51  ;;  %v12211_v42 = vpack.c.bf16 %v8154_v30, %v8153_v0  ;;  %v8159_v21 = vld [vmem:[%s14588_s5 + $0x70] sm:$0xff]  ;;  %v8208_v0 = vld [vmem:[%s14590_s6 + $0x98] sm:$0xff] }
 0x352   :  { %4525 = vst.msk [vmem:[#allocation4] sm:$0xff] %vm4524_vm1, %v4522_v56  ;;  %v8155_v56 = vld [vmem:[%s14588_s5 + $0x50] sm:$0xff] }
 0x353   :  { %10475 = vmatmul.mubr.f32.vlgmr.msra.gmra.mrb[18].mxu1 %v4321_v13  ;;  %v12215_v60 = vpack.c.bf16 %v8156_v10, %v8155_v56  ;;  %v8157_v13 = vld [vmem:[%s14588_s5 + $0x60] sm:$0xff]  ;;  %v8212_v56 = vld [vmem:[%s14590_s6 + $0xb8] sm:$0xff] }
 0x354   :  { %12118 = vmatpush3.bf16.msra.mxu1 %v14065_v63 }
 0x355   :  { %12120 = vmatprep.subr.bf16.mxu1 %v14120_v20 }
 0x358   :  { %12122 = vmatpush3.bf16.msra.mxu1 %v14120_v20  ;;  %v5413_v15 = vld [vmem:[#allocation4 + $0x8] sm:$0xff] }
 0x359   :  { %12124 = vmatprep.subr.bf16.mxu1 %v14130_v26  ;;  %v5412_v4 = vld [vmem:[#allocation4] sm:$0xff] }
 0x35c   :  { %12126 = vmatpush3.bf16.msra.mxu1 %v14130_v26 }
 0x35d   :  { %12128 = vmatprep.subr.bf16.mxu1 %v14140_v33 }
 0x360   :  { %12130 = vmatpush3.bf16.msra.mxu1 %v14140_v33 }
 0x361   :  { %12132 = vmatprep.subr.bf16.mxu1 %v14150_v37 }
 0x36d   :  { %v10266_v38 = vpop.f32.mrb[16].mxu1 }
 0x36e   :  { %v4816_v40 = vadd.f32 %v10266_v38, %v14103_v22  ;;  %v4797_v32 = vpop.f32.mrb[17].mxu1 }
 0x36f   :  { %v4815_v46 = vadd.f32 %v14103_v22, %v4797_v32  ;;  %v6582_v32 = vld [vmem:[%s14588_s5] sm:$0xff] }
 0x370   :  { %v4818_v53 = vmax.f32 %v4816_v40, 0.0 }
 0x371   :  { %v4817_v57 = vmax.f32 %v4815_v46, 0.0  ;;  %v6583_v46 = vld [vmem:[%s14588_s5 + $0x8] sm:$0xff] }
 0x372   :  { %4821 = vst.msk [vmem:[#allocation4 + $0x18] sm:$0xff] %vm4524_vm1, %v4818_v53  ;;  %v12243_v53 = vpack.c.bf16 %v6583_v46, %v6582_v32 }
 0x373   :  { %4820 = vst.msk [vmem:[#allocation4 + $0x10] sm:$0xff] %vm4524_vm1, %v4817_v57 }
 0x379   :  { %v14162_v5 = vld [vmem:[#allocation4 + $0x18] sm:$0xff] }
 0x37a   :  { %v14158_v45 = vld [vmem:[#allocation4 + $0x10] sm:$0xff] }
 0x37b   :  { %10493 = vmatprep.mubr.msk.f32.mxu0 %vm4524_vm1, %v14158_v45 }
 0x37c   :  { %10494 = vmatmul.mubr.msk.f32.vlgmr.msra.gmra.mrb[20].mxu0 %vm4524_vm1, %v14162_v5 }
 0x37d   :  { %12054 = vmatpush3.bf16.msra.mxu0 %v14065_v63  ;;  %10512 = vmatprep.mubr.msk.f32.mxu0 %vm4524_vm1, %v5412_v4 }
 0x37e   :  { %12056 = vmatprep.subr.bf16.mxu0 %v14120_v20 }
 0x381   :  { %12058 = vmatpush3.bf16.msra.mxu0 %v14120_v20 }
 0x382   :  { %12060 = vmatprep.subr.bf16.mxu0 %v14130_v26 }
 0x385   :  { %12062 = vmatpush3.bf16.msra.mxu0 %v14130_v26 }
 0x386   :  { %12064 = vmatprep.subr.bf16.mxu0 %v14140_v33 }
 0x389   :  { %12066 = vmatpush3.bf16.msra.mxu0 %v14140_v33 }
 0x38a   :  { %12068 = vmatprep.subr.bf16.mxu0 %v14065_v63 }
 0x38c   :  { %10513 = vmatmul.mubr.msk.f32.vlgmr.msra.gmra.mrb[20].mxu0 %vm4524_vm1, %v5413_v15 }
 0x38d   :  { %12070 = vmatpush3.bf16.msra.mxu0 %v14065_v63  ;;  %10531 = vmatprep.mubr.msk.f32.mxu0 %vm4524_vm1, %v14158_v45 }
 0x38e   :  { %12072 = vmatprep.subr.bf16.mxu0 %v14120_v20 }
 0x391   :  { %12074 = vmatpush3.bf16.msra.mxu0 %v14120_v20 }
 0x392   :  { %12076 = vmatprep.subr.bf16.mxu0 %v14130_v26 }
 0x395   :  { %12078 = vmatpush3.bf16.msra.mxu0 %v14130_v26 }
 0x396   :  { %12080 = vmatprep.subr.bf16.mxu0 %v14140_v33 }
 0x399   :  { %12082 = vmatpush3.bf16.msra.mxu0 %v14140_v33 }
 0x39a   :  { %12084 = vmatprep.subr.bf16.mxu0 %v14150_v37 }
 0x39c   :  { %10532 = vmatmul.mubr.msk.f32.vlgmr.msra.gmra.mrb[22].mxu0 %vm4524_vm1, %v14162_v5 }
 0x39d   :  { %12086 = vmatpush3.bf16.msra.mxu0 %v14150_v37  ;;  %10550 = vmatprep.mubr.msk.f32.mxu0 %vm4524_vm1, %v5412_v4 }
 0x39e   :  { %12088 = vmatprep.subr.bf16.mxu0 %v14192_v25 }
 0x3a1   :  { %12090 = vmatpush3.bf16.msra.mxu0 %v14192_v25 }
 0x3a2   :  { %12092 = vmatprep.subr.bf16.mxu0 %v14205_v8 }
 0x3a5   :  { %12094 = vmatpush3.bf16.msra.mxu0 %v14205_v8 }
 0x3a6   :  { %12096 = vmatprep.subr.bf16.mxu0 %v14215_v27 }
 0x3a9   :  { %12098 = vmatpush3.bf16.msra.mxu0 %v14215_v27 }
 0x3aa   :  { %12100 = vmatprep.subr.bf16.mxu0 %v14025_v47 }
 0x3ac   :  { %10551 = vmatmul.mubr.msk.f32.vlgmr.msra.gmra.mrb[22].mxu0 %vm4524_vm1, %v5413_v15 }
 0x3ad   :  { %12102 = vmatpush3.bf16.msra.mxu0 %v14025_v47 }
 0x3ae   :  { %12104 = vmatprep.subr.bf16.mxu0 %v14035_v55 }
 0x3b1   :  { %12106 = vmatpush3.bf16.msra.mxu0 %v14035_v55 }
 0x3b2   :  { %12108 = vmatprep.subr.bf16.mxu0 %v14045_v61 }
 0x3b5   :  { %12110 = vmatpush3.bf16.msra.mxu0 %v14045_v61 }
 0x3b6   :  { %12112 = vmatprep.subr.bf16.mxu0 %v14055_v39 }
 0x3b9   :  { %12114 = vmatpush3.bf16.msra.mxu0 %v14055_v39 }
 0x3ba   :  { %12164 = vmatprep.subr.bf16.mxu0 %v14065_v63 }
 0x3c6   :  { %v10371_v49 = vpop.f32.mrb[18].mxu0 }
 0x3c7   :  { %v5111_v52 = vadd.f32 %v10371_v49, %v14103_v22  ;;  %v5092_v54 = vpop.f32.mrb[19].mxu0 }
 0x3c8   :  { %v5110_v58 = vadd.f32 %v14103_v22, %v5092_v54  ;;  %v6584_v54 = vld [vmem:[%s14588_s5 + $0x10] sm:$0xff] }
 0x3c9   :  { %v5113_v59 = vmax.f32 %v5111_v52, 0.0 }
 0x3ca   :  { %v5112_v48 = vmax.f32 %v5110_v58, 0.0  ;;  %v6585_v58 = vld [vmem:[%s14588_s5 + $0x18] sm:$0xff] }
 0x3cb   :  { %5116 = vst.msk [vmem:[#allocation4 + $0x28] sm:$0xff] %vm4524_vm1, %v5113_v59 }
 0x3cc   :  { %5115 = vst.msk [vmem:[#allocation4 + $0x20] sm:$0xff] %vm4524_vm1, %v5112_v48  ;;  %v12247_v48 = vpack.c.bf16 %v6585_v58, %v6584_v54  ;;  %v7071_v54 = vld [vmem:[%s14590_s6 + $0x18] sm:$0xff] }
 0x3d2   :  { %v14236_v2 = vld [vmem:[#allocation4 + $0x28] sm:$0xff] }
 0x3d3   :  { %v5791_v29 = vld [vmem:[#allocation4 + $0x20] sm:$0xff] }
 0x3d4   :  { %10569 = vmatprep.mubr.msk.f32.mxu0 %vm4524_vm1, %v5791_v29  ;;  %10588 = vmatprep.mubr.msk.f32.mxu1 %vm4524_vm1, %v5791_v29 }
 0x3d5   :  { %10570 = vmatmul.mubr.msk.f32.vlgmr.msra.gmra.mrb[22].mxu0 %vm4524_vm1, %v14236_v2  ;;  %10589 = vmatmul.mubr.msk.f32.vlgmr.msra.gmra.mrb[20].mxu1 %vm4524_vm1, %v14236_v2 }
 0x3d6   :  { %12134 = vmatpush3.bf16.msra.mxu1 %v14150_v37  ;;  %10607 = vmatprep.mubr.msk.f32.mxu1 %vm4524_vm1, %v14158_v45 }
 0x3d7   :  { %12136 = vmatprep.subr.bf16.mxu1 %v14192_v25  ;;  %12166 = vmatpush3.bf16.msra.mxu0 %v14065_v63  ;;  %v8162_v63 = vld [vmem:[%s14588_s5 + $0x88] sm:$0xff] }
 0x3d8   :  { %12168 = vmatprep.subr.bf16.mxu0 %v14120_v20  ;;  %v14274_v50 = vpack.c.bf16 %v8162_v63, %v8161_v11  ;;  %v6587_v11 = vld [vmem:[%s14588_s5 + $0x28] sm:$0xff] }
 0x3da   :  { %12138 = vmatpush3.bf16.msra.mxu1 %v14192_v25 }
 0x3db   :  { %12140 = vmatprep.subr.bf16.mxu1 %v14205_v8  ;;  %12170 = vmatpush3.bf16.msra.mxu0 %v14120_v20  ;;  %v8158_v20 = vld [vmem:[%s14588_s5 + $0x68] sm:$0xff] }
 0x3dc   :  { %12172 = vmatprep.subr.bf16.mxu0 %v14130_v26  ;;  %v12219_v51 = vpack.c.bf16 %v8158_v20, %v8157_v13  ;;  %v8198_v13 = vld [vmem:[%s14590_s6 + $0x48] sm:$0xff] }
 0x3de   :  { %12142 = vmatpush3.bf16.msra.mxu1 %v14205_v8 }
 0x3df   :  { %12144 = vmatprep.subr.bf16.mxu1 %v14215_v27  ;;  %12174 = vmatpush3.bf16.msra.mxu0 %v14130_v26  ;;  %v8160_v26 = vld [vmem:[%s14588_s5 + $0x78] sm:$0xff] }
 0x3e0   :  { %12176 = vmatprep.subr.bf16.mxu0 %v14140_v33  ;;  %v12223_v28 = vpack.c.bf16 %v8160_v26, %v8159_v21 }
 0x3e2   :  { %12146 = vmatpush3.bf16.msra.mxu1 %v14215_v27 }
 0x3e3   :  { %12148 = vmatprep.subr.bf16.mxu1 %v14025_v47  ;;  %12178 = vmatpush3.bf16.msra.mxu0 %v14140_v33 }
 0x3e4   :  { %12180 = vmatprep.subr.bf16.mxu0 %v14150_v37 }
 0x3e5   :  { %10608 = vmatmul.mubr.msk.f32.vlgmr.msra.gmra.mrb[20].mxu1 %vm4524_vm1, %v14162_v5 }
 0x3e6   :  { %12150 = vmatpush3.bf16.msra.mxu1 %v14025_v47 }
 0x3e7   :  { %12152 = vmatprep.subr.bf16.mxu1 %v14035_v55 }
 0x3ea   :  { %12154 = vmatpush3.bf16.msra.mxu1 %v14035_v55 }
 0x3eb   :  { %12156 = vmatprep.subr.bf16.mxu1 %v14045_v61 }
 0x3ee   :  { %12158 = vmatpush3.bf16.msra.mxu1 %v14045_v61  ;;  %v8163_v61 = vld [vmem:[%s14588_s5 + $0x90] sm:$0xff] }
 0x3ef   :  { %12160 = vmatprep.subr.bf16.mxu1 %v14055_v39 }
 0x3f2   :  { %12162 = vmatpush3.bf16.msra.mxu1 %v14055_v39  ;;  %v8164_v39 = vld [vmem:[%s14588_s5 + $0x98] sm:$0xff] }
 0x3f3   :  { %12196 = vmatprep.subr.bf16.mxu1 %v14274_v50  ;;  %v14290_v19 = vpack.c.bf16 %v8164_v39, %v8163_v61 }
 0x426   :  { %v10476_v47 = vpop.f32.mrb[18].mxu1 }
 0x427   :  { %v5406_v55 = vadd.f32 %v10476_v47, %v14103_v22  ;;  %v5387_v62 = vpop.f32.mrb[19].mxu1 }
 0x428   :  { %v5405_v1 = vadd.f32 %v14103_v22, %v5387_v62  ;;  %v14305_v22 = vpack.c.bf16 %v8166_v14, %v8165_v43  ;;  %v8206_v43 = vld [vmem:[%s14590_s6 + $0x88] sm:$0xff] }
 0x429   :  { %v5408_v6 = vmax.f32 %v5406_v55, 0.0 }
 0x42a   :  { %v5407_v7 = vmax.f32 %v5405_v1, 0.0 }
 0x42b   :  { %5411 = vst.msk [vmem:[#allocation4 + $0x38] sm:$0xff] %vm4524_vm1, %v5408_v6  ;;  %v6588_v6 = vld [vmem:[%s14588_s5 + $0x30] sm:$0xff] }
 0x42c   :  { %5410 = vst.msk [vmem:[#allocation4 + $0x30] sm:$0xff] %vm4524_vm1, %v5407_v7  ;;  %v6589_v7 = vld [vmem:[%s14588_s5 + $0x38] sm:$0xff] }
 0x432   :  { %v6081_v12 = vld [vmem:[#allocation4 + $0x38] sm:$0xff] }
 0x433   :  { %v6080_v9 = vld [vmem:[#allocation4 + $0x30] sm:$0xff] }
 0x434   :  { %10626 = vmatprep.mubr.msk.f32.mxu1 %vm4524_vm1, %v6080_v9  ;;  %10645 = vmatprep.mubr.msk.f32.mxu0 %vm4524_vm1, %v6080_v9  ;;  %v12255_v9 = vpack.c.bf16 %v6589_v7, %v6588_v6  ;;  %v8242_v6 = vld [vmem:[%s14592_s7 + $0x98] sm:$0xff] }
 0x435   :  { %10627 = vmatmul.mubr.msk.f32.vlgmr.msra.gmra.mrb[20].mxu1 %vm4524_vm1, %v6081_v12  ;;  %10646 = vmatmul.mubr.msk.f32.vlgmr.msra.gmra.mrb[24].mxu0 %vm4524_vm1, %v6081_v12  ;;  %v8205_v12 = vld [vmem:[%s14590_s6 + $0x80] sm:$0xff] }
 0x436   :  { %12182 = vmatpush3.bf16.msra.mxu0 %v14150_v37  ;;  %10664 = vmatprep.mubr.msk.f32.mxu0 %vm4524_vm1, %v5791_v29  ;;  %v12275_v14 = vpack.c.bf16 %v8206_v43, %v8205_v12  ;;  %v8245_v12 = vld [vmem:[%s14592_s7 + $0xb0] sm:$0xff]  ;;  %v8246_v43 = vld [vmem:[%s14592_s7 + $0xb8] sm:$0xff] }
 0x437   :  { %12184 = vmatprep.subr.bf16.mxu0 %v14192_v25  ;;  %12198 = vmatpush3.bf16.msra.mxu1 %v14274_v50 }
 0x438   :  { %12200 = vmatprep.subr.bf16.mxu1 %v14290_v19 }
 0x43a   :  { %12186 = vmatpush3.bf16.msra.mxu0 %v14192_v25 }
 0x43b   :  { %12188 = vmatprep.subr.bf16.mxu0 %v14205_v8  ;;  %12202 = vmatpush3.bf16.msra.mxu1 %v14290_v19 }
 0x43c   :  { %12204 = vmatprep.subr.bf16.mxu1 %v14305_v22 }
 0x43e   :  { %12190 = vmatpush3.bf16.msra.mxu0 %v14205_v8 }
 0x43f   :  { %12192 = vmatprep.subr.bf16.mxu0 %v14215_v27  ;;  %12206 = vmatpush3.bf16.msra.mxu1 %v14305_v22 }
 0x440   :  { %12208 = vmatprep.subr.bf16.mxu1 %v14317_v23 }
 0x442   :  { %12194 = vmatpush3.bf16.msra.mxu0 %v14215_v27 }
 0x443   :  { %12210 = vmatpush3.bf16.msra.mxu1 %v14317_v23  ;;  %12228 = vmatprep.subr.bf16.mxu0 %v12211_v42 }
 0x444   :  { %12212 = vmatprep.subr.bf16.mxu1 %v12211_v42 }
 0x445   :  { %10665 = vmatmul.mubr.msk.f32.vlgmr.msra.gmra.mrb[24].mxu0 %vm4524_vm1, %v14236_v2  ;;  %v6586_v2 = vld [vmem:[%s14588_s5 + $0x20] sm:$0xff] }
 0x446   :  { %12230 = vmatpush3.bf16.msra.mxu0 %v12211_v42  ;;  %v12251_v62 = vpack.c.bf16 %v6587_v11, %v6586_v2  ;;  %v7074_v2 = vld [vmem:[%s14590_s6 + $0x30] sm:$0xff]  ;;  %v7075_v11 = vld [vmem:[%s14590_s6 + $0x38] sm:$0xff] }
 0x447   :  { %12232 = vmatprep.subr.bf16.mxu0 %v12215_v60 }
 0x44a   :  { %12234 = vmatpush3.bf16.msra.mxu0 %v12215_v60 }
 0x44b   :  { %12236 = vmatprep.subr.bf16.mxu0 %v12219_v51 }
 0x44e   :  { %12238 = vmatpush3.bf16.msra.mxu0 %v12219_v51 }
 0x44f   :  { %12240 = vmatprep.subr.bf16.mxu0 %v12223_v28 }
 0x452   :  { %12242 = vmatpush3.bf16.msra.mxu0 %v12223_v28 }
 0x453   :  { %12244 = vmatprep.subr.bf16.mxu0 %v12243_v53 }
 0x45f   :  { %v10514_v33 = vpop.f32.mrb[20].mxu0 }
 0x460   :  { %v5604_v35 = vadd.f32 %v10514_v33, %v8093_v31  ;;  %v5587_v36 = vpop.f32.mrb[21].mxu0 }
 0x461   :  { %v5603_v37 = vadd.f32 %v8093_v31, %v5587_v36 }
 0x462   :  { %v5606_v38 = vmax.f32 %v5604_v35, 0.0 }
 0x463   :  { %v5605_v40 = vmax.f32 %v5603_v37, 0.0 }
 0x464   :  { %5608 = vst.msk [vmem:[#allocation5 + $0x8] sm:$0xff] %vm4524_vm1, %v5606_v38 }
 0x465   :  { %5607 = vst.msk [vmem:[#allocation5] sm:$0xff] %vm4524_vm1, %v5605_v40 }
 0x46b   :  { %v6384_v44 = vld [vmem:[#allocation5 + $0x8] sm:$0xff] }
 0x46c   :  { %v6383_v34 = vld [vmem:[#allocation5] sm:$0xff] }
 0x4a8   :  { %v10571_v57 = vpop.f32.mrb[22].mxu0 }
 0x4a9   :  { %v5892_v45 = vadd.f32 %v10571_v57, %v8093_v31  ;;  %v5873_v5 = vpop.f32.mrb[23].mxu0  ;;  %v8200_v57 = vld [vmem:[%s14590_s6 + $0x58] sm:$0xff] }
 0x4aa   :  { %v5891_v4 = vadd.f32 %v8093_v31, %v5873_v5 }
 0x4ab   :  { %v5894_v15 = vmax.f32 %v5892_v45, 0.0 }
 0x4ac   :  { %v5893_v17 = vmax.f32 %v5891_v4, 0.0 }
 0x4ad   :  { %5897 = vst.msk [vmem:[#allocation5 + $0x18] sm:$0xff] %vm4524_vm1, %v5894_v15  ;;  %v8201_v15 = vld [vmem:[%s14590_s6 + $0x60] sm:$0xff] }
 0x4ae   :  { %5896 = vst.msk [vmem:[#allocation5 + $0x10] sm:$0xff] %vm4524_vm1, %v5893_v17  ;;  %v8202_v17 = vld [vmem:[%s14590_s6 + $0x68] sm:$0xff] }
 0x4b4   :  { %v6395_v25 = vld [vmem:[#allocation5 + $0x18] sm:$0xff] }
 0x4b5   :  { %v6394_v41 = vld [vmem:[#allocation5 + $0x10] sm:$0xff] }
 0x4b6   :  { %10683 = vmatprep.mubr.msk.f32.mxu1 %vm4524_vm1, %v6394_v41 }
 0x4b7   :  { %10684 = vmatmul.mubr.msk.f32.vlgmr.msra.gmra.mrb[22].mxu1 %vm4524_vm1, %v6395_v25 }
 0x4b8   :  { %12214 = vmatpush3.bf16.msra.mxu1 %v12211_v42  ;;  %10702 = vmatprep.mubr.msk.f32.mxu1 %vm4524_vm1, %v6383_v34  ;;  %v8211_v42 = vld [vmem:[%s14590_s6 + $0xb0] sm:$0xff] }
 0x4b9   :  { %12216 = vmatprep.subr.bf16.mxu1 %v12215_v60  ;;  %v12287_v10 = vpack.c.bf16 %v8212_v56, %v8211_v42  ;;  %v8203_v34 = vld [vmem:[%s14590_s6 + $0x70] sm:$0xff] }
 0x4bc   :  { %12218 = vmatpush3.bf16.msra.mxu1 %v12215_v60  ;;  %v8197_v60 = vld [vmem:[%s14590_s6 + $0x40] sm:$0xff] }
 0x4bd   :  { %12220 = vmatprep.subr.bf16.mxu1 %v12219_v51  ;;  %v12291_v20 = vpack.c.bf16 %v8198_v13, %v8197_v60 }
 0x4c0   :  { %12222 = vmatpush3.bf16.msra.mxu1 %v12219_v51  ;;  %v8173_v51 = vld [vmem:[%s14591_s13] ss:$0 sm:$0xff] }
 0x4c1   :  { %12224 = vmatprep.subr.bf16.mxu1 %v12223_v28 }
 0x4c4   :  { %12226 = vmatpush3.bf16.msra.mxu1 %v12223_v28 }
 0x4c5   :  { %12276 = vmatprep.subr.bf16.mxu1 %v12275_v14 }
 0x4c7   :  { %10703 = vmatmul.mubr.msk.f32.vlgmr.msra.gmra.mrb[22].mxu1 %vm4524_vm1, %v6384_v44  ;;  %v8204_v44 = vld [vmem:[%s14590_s6 + $0x78] sm:$0xff] }
 0x4c8   :  { %12278 = vmatpush3.bf16.msra.mxu1 %v12275_v14  ;;  %v12351_v14 = vpack.c.bf16 %v8246_v43, %v8245_v12 }
 0x508   :  { %v10628_v8 = vpop.f32.mrb[20].mxu1 }
 0x509   :  { %v6181_v18 = vadd.f32 %v10628_v8, %v8093_v31  ;;  %v6162_v24 = vpop.f32.mrb[21].mxu1  ;;  %v12303_v8 = vpack.c.bf16 %v8204_v44, %v8203_v34 }
 0x50a   :  { %v6180_v27 = vadd.f32 %v8093_v31, %v6162_v24  ;;  %v7068_v24 = vld [vmem:[%s14590_s6] sm:$0xff] }
 0x50b   :  { %v6183_v49 = vmax.f32 %v6181_v18, 0.0 }
 0x50c   :  { %v6182_v52 = vmax.f32 %v6180_v27, 0.0  ;;  %v7069_v27 = vld [vmem:[%s14590_s6 + $0x8] sm:$0xff] }
 0x50d   :  { %6186 = vst.msk [vmem:[#allocation5 + $0x28] sm:$0xff] %vm4524_vm1, %v6183_v49  ;;  %v12323_v49 = vpack.c.bf16 %v7069_v27, %v7068_v24 }
 0x50e   :  { %6185 = vst.msk [vmem:[#allocation5 + $0x20] sm:$0xff] %vm4524_vm1, %v6182_v52  ;;  %v7070_v52 = vld [vmem:[%s14590_s6 + $0x10] sm:$0xff] }
 0x50f   :  { %v12327_v58 = vpack.c.bf16 %v7071_v54, %v7070_v52  ;;  %v8256_v54 = vld [vmem:[%s14596_s16] ss:$0 sm:$0xff] }
 0x514   :  { %v6591_v29 = vld [vmem:[#allocation5 + $0x28] sm:$0xff] }
 0x515   :  { %v6590_v59 = vld [vmem:[#allocation5 + $0x20] sm:$0xff] }
 0x516   :  { %10721 = vmatprep.mubr.msk.f32.mxu0 %vm4524_vm1, %v6590_v59  ;;  %v7072_v59 = vld [vmem:[%s14590_s6 + $0x20] sm:$0xff] }
 0x517   :  { %10722 = vmatmul.mubr.msk.f32.vlgmr.msra.gmra.mrb[26].mxu0 %vm4524_vm1, %v6591_v29 }
 0x518   :  { %v10666_v63 = vpop.f32.mrb[24].mxu0  ;;  %12246 = vmatpush3.bf16.msra.mxu0 %v12243_v53  ;;  %10740 = vmatprep.mubr.msk.f32.mxu0 %vm4524_vm1, %v6394_v41  ;;  %v8199_v53 = vld [vmem:[%s14590_s6 + $0x50] sm:$0xff] }
 0x519   :  { %v6377_v47 = vadd.f32 %v10666_v63, %v8093_v31  ;;  %v6360_v55 = vpop.f32.mrb[25].mxu0  ;;  %12248 = vmatprep.subr.bf16.mxu0 %v12247_v48  ;;  %v12295_v5 = vpack.c.bf16 %v8200_v57, %v8199_v53  ;;  %v12335_v63 = vpack.c.bf16 %v7075_v11, %v7074_v2 }
 0x51a   :  { %v6376_v1 = vadd.f32 %v8093_v31, %v6360_v55  ;;  %v8240_v55 = vld [vmem:[%s14592_s7 + $0x88] sm:$0xff] }
 0x51b   :  { %v6379_v61 = vmax.f32 %v6377_v47, 0.0  ;;  %v8239_v47 = vld [vmem:[%s14592_s7 + $0x80] sm:$0xff] }
 0x51c   :  { %v6378_v39 = vmax.f32 %v6376_v1, 0.0  ;;  %12250 = vmatpush3.bf16.msra.mxu0 %v12247_v48  ;;  %v7073_v48 = vld [vmem:[%s14590_s6 + $0x28] sm:$0xff]  ;;  %v8241_v1 = vld [vmem:[%s14592_s7 + $0x90] sm:$0xff] }
 0x51d   :  { %6382 = vst.msk [vmem:[#allocation5 + $0x38] sm:$0xff] %vm4524_vm1, %v6379_v61  ;;  %12252 = vmatprep.subr.bf16.mxu0 %v12251_v62  ;;  %v12331_v29 = vpack.c.bf16 %v7073_v48, %v7072_v59  ;;  %v12343_v7 = vpack.c.bf16 %v8242_v6, %v8241_v1  ;;  %v8243_v61 = vld [vmem:[%s14592_s7 + $0xa0] sm:$0xff] }
 0x51e   :  { %6381 = vst.msk [vmem:[#allocation5 + $0x30] sm:$0xff] %vm4524_vm1, %v6378_v39  ;;  %v8244_v39 = vld [vmem:[%s14592_s7 + $0xa8] sm:$0xff] }
 0x520   :  { %12254 = vmatpush3.bf16.msra.mxu0 %v12251_v62  ;;  %v12339_v62 = vpack.c.bf16 %v8240_v55, %v8239_v47 }
 0x521   :  { %12256 = vmatprep.subr.bf16.mxu0 %v12255_v9 }
 0x524   :  { %12258 = vmatpush3.bf16.msra.mxu0 %v12255_v9  ;;  %v6763_v16 = vld [vmem:[#allocation5 + $0x38] sm:$0xff]  ;;  %v12347_v9 = vpack.c.bf16 %v8244_v39, %v8243_v61 }
 0x525   :  { %12260 = vmatprep.subr.bf16.mxu0 %v14274_v50  ;;  %v6762_v3 = vld [vmem:[#allocation5 + $0x30] sm:$0xff] }
 0x527   :  { %10741 = vmatmul.mubr.msk.f32.vlgmr.msra.gmra.mrb[26].mxu0 %vm4524_vm1, %v6395_v25  ;;  %v12299_v25 = vpack.c.bf16 %v8202_v17, %v8201_v15  ;;  %v8254_v15 = vld [vmem:[%s14594_s8 + $0x30] sm:$0xff]  ;;  %v8255_v17 = vld [vmem:[%s14594_s8 + $0x38] sm:$0xff] }
 0x528   :  { %12262 = vmatpush3.bf16.msra.mxu0 %v14274_v50  ;;  %10759 = vmatprep.mubr.msk.f32.mxu0 %vm4524_vm1, %v6762_v3  ;;  %v8207_v50 = vld [vmem:[%s14590_s6 + $0x90] sm:$0xff]  ;;  %v8231_v3 = vld [vmem:[%s14592_s7 + $0x40] sm:$0xff] }
 0x529   :  { %12264 = vmatprep.subr.bf16.mxu0 %v14290_v19 }
 0x52c   :  { %12266 = vmatpush3.bf16.msra.mxu0 %v14290_v19  ;;  %v12279_v19 = vpack.c.bf16 %v8208_v0, %v8207_v50  ;;  %v8217_v0 = vld [vmem:[%s14593_s14] ss:$0 sm:$0xff] }
 0x52d   :  { %12268 = vmatprep.subr.bf16.mxu0 %v14305_v22 }
 0x52e   :  { %12280 = vmatprep.subr.bf16.mxu1 %v12279_v19 }
 0x52f   :  { %12282 = vmatpush3.bf16.msra.mxu1 %v12279_v19 }
 0x530   :  { %12270 = vmatpush3.bf16.msra.mxu0 %v14305_v22  ;;  %v8209_v22 = vld [vmem:[%s14590_s6 + $0xa0] sm:$0xff] }
 0x531   :  { %12272 = vmatprep.subr.bf16.mxu0 %v14317_v23 }
 0x534   :  { %12274 = vmatpush3.bf16.msra.mxu0 %v14317_v23  ;;  %v8210_v23 = vld [vmem:[%s14590_s6 + $0xa8] sm:$0xff] }
 0x535   :  { %v12283_v30 = vpack.c.bf16 %v8210_v23, %v8209_v22  ;;  %12340 = vmatprep.subr.bf16.mxu0 %v12339_v62 }
 0x537   :  { %10760 = vmatmul.mubr.msk.f32.vlgmr.msra.gmra.mrb[26].mxu0 %vm4524_vm1, %v6763_v16  ;;  %12284 = vmatprep.subr.bf16.mxu1 %v12283_v30  ;;  %v8232_v16 = vld [vmem:[%s14592_s7 + $0x48] sm:$0xff] }
 0x538   :  { %12286 = vmatpush3.bf16.msra.mxu1 %v12283_v30  ;;  %12342 = vmatpush3.bf16.msra.mxu0 %v12339_v62  ;;  %v12355_v50 = vpack.c.bf16 %v8232_v16, %v8231_v3 }
 0x539   :  { %12288 = vmatprep.subr.bf16.mxu1 %v12287_v10  ;;  %12344 = vmatprep.subr.bf16.mxu0 %v12343_v7 }
 0x53c   :  { %12290 = vmatpush3.bf16.msra.mxu1 %v12287_v10  ;;  %12346 = vmatpush3.bf16.msra.mxu0 %v12343_v7 }
 0x53d   :  { %12292 = vmatprep.subr.bf16.mxu1 %v12291_v20  ;;  %12348 = vmatprep.subr.bf16.mxu0 %v12347_v9 }
 0x540   :  { %12350 = vmatpush3.bf16.msra.mxu0 %v12347_v9 }
 0x541   :  { %12352 = vmatprep.subr.bf16.mxu0 %v12351_v14 }
 0x544   :  { %12354 = vmatpush3.bf16.msra.mxu0 %v12351_v14 }
 0x545   :  { %12356 = vmatprep.subr.bf16.mxu0 %v12355_v50 }
 0x59a   :  { %v10704_v21 = vpop.f32.mrb[22].mxu1 }
 0x59b   :  { %v6575_v26 = vadd.f32 %v10704_v21, %v8173_v51  ;;  %v6558_v28 = vpop.f32.mrb[23].mxu1 }
 0x59c   :  { %v6574_v31 = vadd.f32 %v8173_v51, %v6558_v28  ;;  %v8234_v28 = vld [vmem:[%s14592_s7 + $0x58] sm:$0xff] }
 0x59d   :  { %v6577_v33 = vmax.f32 %v6575_v26, 0.0  ;;  %v8233_v26 = vld [vmem:[%s14592_s7 + $0x50] sm:$0xff] }
 0x59e   :  { %v6576_v35 = vmax.f32 %v6574_v31, 0.0 }
 0x59f   :  { %6579 = vst.msk [vmem:[#allocation6 + $0x8] sm:$0xff] %vm4524_vm1, %v6577_v33  ;;  %v12359_v33 = vpack.c.bf16 %v8234_v28, %v8233_v26 }
 0x5a0   :  { %6578 = vst.msk [vmem:[#allocation6] sm:$0xff] %vm4524_vm1, %v6576_v35 }
 0x5a6   :  { %v6870_v18 = vld [vmem:[#allocation6 + $0x8] sm:$0xff] }
 0x5a7   :  { %v6869_v41 = vld [vmem:[#allocation6] sm:$0xff] }
 0x60a   :  { %v10761_v36 = vpop.f32.mrb[26].mxu0 }
 0x60b   :  { %v6863_v37 = vadd.f32 %v10761_v36, %v8173_v51  ;;  %v6844_v38 = vpop.f32.mrb[27].mxu0  ;;  %v8235_v36 = vld [vmem:[%s14592_s7 + $0x60] sm:$0xff] }
 0x60c   :  { %v6862_v40 = vadd.f32 %v8173_v51, %v6844_v38 }
 0x60d   :  { %v6865_v32 = vmax.f32 %v6863_v37, 0.0  ;;  %v8236_v37 = vld [vmem:[%s14592_s7 + $0x68] sm:$0xff] }
 0x60e   :  { %v6864_v46 = vmax.f32 %v6862_v40, 0.0  ;;  %v12363_v40 = vpack.c.bf16 %v8236_v37, %v8235_v36 }
 0x60f   :  { %6868 = vst.msk [vmem:[#allocation6 + $0x18] sm:$0xff] %vm4524_vm1, %v6865_v32  ;;  %v8237_v32 = vld [vmem:[%s14592_s7 + $0x70] sm:$0xff] }
 0x610   :  { %6867 = vst.msk [vmem:[#allocation6 + $0x10] sm:$0xff] %vm4524_vm1, %v6864_v46  ;;  %v8238_v46 = vld [vmem:[%s14592_s7 + $0x78] sm:$0xff] }
 0x611   :  { %v12367_v53 = vpack.c.bf16 %v8238_v46, %v8237_v32 }
 0x616   :  { %v6881_v4 = vld [vmem:[#allocation6 + $0x18] sm:$0xff] }
 0x617   :  { %v6880_v45 = vld [vmem:[#allocation6 + $0x10] sm:$0xff] }
 0x618   :  { %10778 = vmatprep.mubr.msk.f32.mxu1 %vm4524_vm1, %v6880_v45 }
 0x619   :  { %10779 = vmatmul.mubr.msk.f32.vlgmr.msra.gmra.mrb[24].mxu1 %vm4524_vm1, %v6881_v4 }
 0x61a   :  { %12294 = vmatpush3.bf16.msra.mxu1 %v12291_v20  ;;  %10797 = vmatprep.mubr.msk.f32.mxu1 %vm4524_vm1, %v6869_v41 }
 0x61b   :  { %12296 = vmatprep.subr.bf16.mxu1 %v12295_v5 }
 0x61e   :  { %12298 = vmatpush3.bf16.msra.mxu1 %v12295_v5 }
 0x61f   :  { %12300 = vmatprep.subr.bf16.mxu1 %v12299_v25 }
 0x622   :  { %12302 = vmatpush3.bf16.msra.mxu1 %v12299_v25 }
 0x623   :  { %12304 = vmatprep.subr.bf16.mxu1 %v12303_v8 }
 0x626   :  { %12306 = vmatpush3.bf16.msra.mxu1 %v12303_v8 }
 0x627   :  { %12308 = vmatprep.subr.bf16.mxu1 %v12291_v20 }
 0x629   :  { %10798 = vmatmul.mubr.msk.f32.vlgmr.msra.gmra.mrb[24].mxu1 %vm4524_vm1, %v6870_v18 }
 0x62a   :  { %12310 = vmatpush3.bf16.msra.mxu1 %v12291_v20  ;;  %10816 = vmatprep.mubr.msk.f32.mxu1 %vm4524_vm1, %v6880_v45  ;;  %v8252_v45 = vld [vmem:[%s14594_s8 + $0x20] sm:$0xff] }
 0x62b   :  { %12312 = vmatprep.subr.bf16.mxu1 %v12295_v5 }
 0x62e   :  { %12314 = vmatpush3.bf16.msra.mxu1 %v12295_v5  ;;  %v8253_v5 = vld [vmem:[%s14594_s8 + $0x28] sm:$0xff] }
 0x62f   :  { %12316 = vmatprep.subr.bf16.mxu1 %v12299_v25 }
 0x632   :  { %12318 = vmatpush3.bf16.msra.mxu1 %v12299_v25  ;;  %v8251_v25 = vld [vmem:[%s14595_s15] ss:$0 sm:$0xff] }
 0x633   :  { %12320 = vmatprep.subr.bf16.mxu1 %v12303_v8 }
 0x636   :  { %12322 = vmatpush3.bf16.msra.mxu1 %v12303_v8 }
 0x637   :  { %12324 = vmatprep.subr.bf16.mxu1 %v12323_v49 }
 0x639   :  { %10817 = vmatmul.mubr.msk.f32.vlgmr.msra.gmra.mrb[26].mxu1 %vm4524_vm1, %v6881_v4  ;;  %v12371_v4 = vpack.c.bf16 %v8253_v5, %v8252_v45 }
 0x63a   :  { %12326 = vmatpush3.bf16.msra.mxu1 %v12323_v49  ;;  %10835 = vmatprep.mubr.msk.f32.mxu1 %vm4524_vm1, %v6869_v41  ;;  %v12375_v41 = vpack.c.bf16 %v8255_v17, %v8254_v15 }
 0x63b   :  { %12328 = vmatprep.subr.bf16.mxu1 %v12327_v58 }
 0x63e   :  { %12330 = vmatpush3.bf16.msra.mxu1 %v12327_v58 }
 0x63f   :  { %12332 = vmatprep.subr.bf16.mxu1 %v12331_v29 }
 0x642   :  { %12334 = vmatpush3.bf16.msra.mxu1 %v12331_v29 }
 0x643   :  { %12336 = vmatprep.subr.bf16.mxu1 %v12335_v63 }
 0x646   :  { %12338 = vmatpush3.bf16.msra.mxu1 %v12335_v63 }
 0x647   :  { %12372 = vmatprep.subr.bf16.mxu1 %v12371_v4 }
 0x649   :  { %10836 = vmatmul.mubr.msk.f32.vlgmr.msra.gmra.mrb[26].mxu1 %vm4524_vm1, %v6870_v18 }
 0x64a   :  { %12374 = vmatpush3.bf16.msra.mxu1 %v12371_v4 }
 0x64b   :  { %12376 = vmatprep.subr.bf16.mxu1 %v12375_v41 }
 0x64e   :  { %12378 = vmatpush3.bf16.msra.mxu1 %v12375_v41 }
 0x6fc   :  { %v10799_v19 = vpop.f32.mrb[24].mxu1 }
 0x6fd   :  { %v7061_v22 = vadd.f32 %v10799_v19, %v8217_v0  ;;  %v7044_v23 = vpop.f32.mrb[25].mxu1 }
 0x6fe   :  { %v7060_v30 = vadd.f32 %v8217_v0, %v7044_v23 }
 0x6ff   :  { %v7063_v42 = vmax.f32 %v7061_v22, 0.0 }
 0x700   :  { %v7062_v56 = vmax.f32 %v7060_v30, 0.0 }
 0x701   :  { %7065 = vst.msk [vmem:[#allocation7 + $0x8] sm:$0xff] %vm4524_vm1, %v7063_v42 }
 0x702   :  { %7064 = vst.msk [vmem:[#allocation7] sm:$0xff] %vm4524_vm1, %v7062_v56 }
 0x708   :  { %v7263_v57 = vld [vmem:[#allocation7 + $0x8] sm:$0xff] }
 0x709   :  { %v7262_v38 = vld [vmem:[#allocation7] sm:$0xff] }
 0x71c   :  { %v10837_v10 = vpop.f32.mrb[26].mxu1 }
 0x71d   :  { %v7256_v60 = vadd.f32 %v10837_v10, %v8217_v0  ;;  %v7239_v13 = vpop.f32.mrb[27].mxu1 }
 0x71e   :  { %v7255_v20 = vadd.f32 %v8217_v0, %v7239_v13 }
 0x71f   :  { %v7258_v51 = vmax.f32 %v7256_v60, 0.0 }
 0x720   :  { %v7257_v21 = vmax.f32 %v7255_v20, 0.0 }
 0x721   :  { %7261 = vst.msk [vmem:[#allocation7 + $0x18] sm:$0xff] %vm4524_vm1, %v7258_v51 }
 0x722   :  { %7260 = vst.msk [vmem:[#allocation7 + $0x10] sm:$0xff] %vm4524_vm1, %v7257_v21 }
 0x728   :  { %v7274_v35 = vld [vmem:[#allocation7 + $0x18] sm:$0xff] }
 0x729   :  { %v7273_v31 = vld [vmem:[#allocation7 + $0x10] sm:$0xff] }
 0x72a   :  { %10854 = vmatprep.mubr.msk.f32.mxu0 %vm4524_vm1, %v7273_v31 }
 0x72b   :  { %10855 = vmatmul.mubr.msk.f32.vlgmr.msra.gmra.mrb[28].mxu0 %vm4524_vm1, %v7274_v35 }
 0x72c   :  { %12358 = vmatpush3.bf16.msra.mxu0 %v12355_v50  ;;  %10873 = vmatprep.mubr.msk.f32.mxu0 %vm4524_vm1, %v7262_v38 }
 0x72d   :  { %12360 = vmatprep.subr.bf16.mxu0 %v12359_v33 }
 0x730   :  { %12362 = vmatpush3.bf16.msra.mxu0 %v12359_v33 }
 0x731   :  { %12364 = vmatprep.subr.bf16.mxu0 %v12363_v40 }
 0x734   :  { %12366 = vmatpush3.bf16.msra.mxu0 %v12363_v40 }
 0x735   :  { %12368 = vmatprep.subr.bf16.mxu0 %v12367_v53 }
 0x738   :  { %12370 = vmatpush3.bf16.msra.mxu0 %v12367_v53 }
 0x73b   :  { %10874 = vmatmul.mubr.msk.f32.vlgmr.msra.gmra.mrb[28].mxu0 %vm4524_vm1, %v7263_v57 }
 0x80e   :  { %v10875_v34 = vpop.f32.mrb[28].mxu0 }
 0x80f   :  { %v7454_v44 = vadd.f32 %v10875_v34, %v8251_v25  ;;  %v7437_v8 = vpop.f32.mrb[29].mxu0 }
 0x810   :  { %v7453_v18 = vadd.f32 %v8251_v25, %v7437_v8 }
 0x811   :  { %v7456_v24 = vmax.f32 %v7454_v44, 0.0 }
 0x812   :  { %v7455_v27 = vmax.f32 %v7453_v18, 0.0 }
 0x813   :  { %7459 = vst.msk [vmem:[#allocation8 + $0x8] sm:$0xff] %vm7457_vm2, %v7456_v24 }
 0x814   :  { %7458 = vst.msk [vmem:[#allocation8] sm:$0xff] %vm7457_vm2, %v7455_v27 }
 0x81a   :  { %v7461_v52 = vld [vmem:[#allocation8 + $0x8] sm:$0xff] }
 0x81b   :  { %v7460_v49 = vld [vmem:[#allocation8] sm:$0xff] }
 0x81c   :  { %10884 = vmatprep.mubr.msk.f32.mxu1 %vm7457_vm2, %v7460_v49 }
 0x81d   :  { %10885 = vmatmul.mubr.msk.f32.vlgmr.msra.gmra.mrb[28].mxu1 %vm7457_vm2, %v7461_v52 }
 0x8f0   :  { %v10886_v58 = vpop.f32.mrb[28].mxu1 }
 0x8f1   :  { %v7552_v59 = vadd.f32 %v10886_v58, %v8256_v54  ;;  %v7546_v48 = vpop.f32.mrb[29].mxu1 }
 0x8f2   :  { %v7547_v29 = vadd.f32 %v8256_v54, %v7546_v48 }
 0x8f3   :  { %v7556_v2 = vmax.f32 %v7552_v59, 0.0 }
 0x8f4   :  { %v7555_v11 = vmax.f32 %v7547_v29, 0.0 }
 0x8f5   :  { %7558 = vst.msk [vmem:[%s14597_s17 + $0x8] sm:$0xff] %vm7457_vm2, %v7556_v2 }
 0x8f6   :  { %7557 = vst.msk [vmem:[%s14597_s17] sm:$0xff] %vm7457_vm2, %v7555_v11 }

</bundles_post_ra>
